<compile_context>
chip_gen: v6e
topology: v6e:2x2x1
jax: 0.10.0
libtpu: 0.0.40
codegen_flags: <defaults>
</compile_context>

<pallas_src>
import jax
import jax.numpy as jnp
import numpy as np
from jax.experimental import pallas as pl
from jax.experimental.pallas import tpu as pltpu

EPS = 1e-5
_TAPS = [(dh, dw) for dh in range(3) for dw in range(3)]


def _make_kernel(has_proj, W, Cin, Cout, tile_h, n_tiles, tap_accum1, tap_accum2):
    """Build the ResidualBlock kernel body; static config captured via closure."""
    M1 = (tile_h + 2) * W     # conv1 output rows incl. 1-row halo on each side
    M2 = tile_h * W           # conv2 / block output rows

    def conv3x3(get_win, w_ref, c, tap_accum):
        """3x3 conv as matmul(s).  get_win(dh,dw) -> (M, c) bf16 shifted window."""
        if tap_accum:
            # 9 accumulated matmuls, K = c per tap (good MXU utilization for c>=128;
            # window loads overlap matmuls, no staging scratch).
            acc = None
            for t, (dh, dw) in enumerate(_TAPS):
                part = jnp.dot(get_win(dh, dw), w_ref[t * c:(t + 1) * c, :],
                               preferred_element_type=jnp.float32)
                acc = part if acc is None else acc + part
            return acc
        # small-C fallback: one matmul with K = 9*c so the MXU K-dim is not starved.
        cols = jnp.concatenate([get_win(dh, dw) for dh, dw in _TAPS], axis=1)
        return jnp.dot(cols, w_ref[...], preferred_element_type=jnp.float32)

    def kernel(*refs):
        if has_proj:
            (xp_ref, w1_ref, w2_ref, ws_ref, st_ref, o_ref, mid_ref) = refs
        else:
            (xp_ref, w1_ref, w2_ref, st_ref, o_ref, mid_ref) = refs

        h = pl.program_id(1)
        row0 = pl.multiple_of(h * tile_h, tile_h)   # start row of this tile (H-pad=2)

        # ---- conv1 over this tile's rows plus a 1-row halo on each side ----------
        def x_win(dh, dw):
            return xp_ref[0, pl.ds(row0 + dh, tile_h + 2),
                          dw:dw + W, :].reshape(M1, Cin)

        acc1 = conv3x3(x_win, w1_ref, Cin, tap_accum1)
        out1 = jnp.maximum(acc1 * st_ref[0:1, :] + st_ref[1:2, :], 0.0)   # BN1+ReLU

        # ---- stash BN1+ReLU output into the bf16 W-padded scratch for conv2 ------
        mid_ref[:, 1:1 + W, :] = out1.reshape(tile_h + 2, W, Cout).astype(mid_ref.dtype)
        zcol = jnp.zeros((tile_h + 2, 1, Cout), mid_ref.dtype)
        mid_ref[:, 0:1, :] = zcol
        mid_ref[:, W + 1:W + 2, :] = zcol

        # conv2's zero padding in H: the halo row above the first tile / below the
        # last tile is a pad row, not a conv1 output -> overwrite with zeros.
        # (Conditions depend only on the tile index, so this is megacore-safe.)
        zrow = jnp.zeros((1, W + 2, Cout), mid_ref.dtype)

        @pl.when(h == 0)
        def _():
            mid_ref[0:1, :, :] = zrow

        @pl.when(h == n_tiles - 1)
        def _():
            mid_ref[tile_h + 1:tile_h + 2, :, :] = zrow

        # ---- conv2 + BN2 ----------------------------------------------------------
        def m_win(dh, dw):
            return mid_ref[dh:dh + tile_h, dw:dw + W, :].reshape(M2, Cout)

        acc2 = conv3x3(m_win, w2_ref, Cout, tap_accum2)
        out2 = acc2 * st_ref[2:3, :] + st_ref[3:4, :]

        # ---- shortcut ---------------------------------------------------------------
        xc = xp_ref[0, pl.ds(row0 + 2, tile_h), 1:1 + W, :].reshape(M2, Cin)
        if has_proj:                                   # 1x1 conv + BN
            sc = jnp.dot(xc, ws_ref[...], preferred_element_type=jnp.float32)
            sc = sc * st_ref[4:5, :] + st_ref[5:6, :]
        else:                                          # identity: no matmul
            sc = xc.astype(jnp.float32)

        res = jnp.maximum(out2 + sc, 0.0)                                 # add + ReLU
        o_ref[...] = res.reshape(1, tile_h, W, Cout).astype(o_ref.dtype)

    return kernel


def _fold_bn(bias, gamma, beta, mean, var):
    """Fold conv bias + eval-mode BN into (scale, shift): y = conv*scale + shift."""
    scale = gamma / jnp.sqrt(var + EPS)
    shift = (bias - mean) * scale + beta
    return scale, shift


def _pick_tile_h(H, W, Cout, f32_budget_bytes=6 << 20):
    """Largest divisor of H whose f32 intermediates stay within a rough VMEM budget."""
    per_row = 6 * W * Cout * 4          # ~6 live f32 (M, Cout) intermediates
    th = int(max(1, min(H, f32_budget_bytes // per_row)))
    while H % th:
        th -= 1
    return th


def residual_block(x_nhwc, p, *, tile_h=None, min_tap_k=128, out_dtype=jnp.bfloat16):
    N, H, W, Cin = x_nhwc.shape
    Cout = p["w1"].shape[-1]
    has_proj = "ws" in p
    bf16 = jnp.bfloat16

    if tile_h is None:
        tile_h = _pick_tile_h(H, W, Cout)
    tile_h = min(tile_h, H)
    assert H % tile_h == 0, "tile_h must divide H"
    n_tiles = H // tile_h

    # bf16 MXU inputs (f32 accumulation in-kernel).  Pad H by 2 / W by 1 so every
    # tile's halo rows index in-bounds; the pad is fused with the bf16 cast -> a
    # single extra pass over x on the host side.
    xp = jnp.pad(x_nhwc, ((0, 0), (2, 2), (1, 1), (0, 0))).astype(bf16)

    w1 = p["w1"].reshape(9 * Cin, Cout).astype(bf16)     # (kh,kw,cin) flattened
    w2 = p["w2"].reshape(9 * Cout, Cout).astype(bf16)

    s1, t1 = _fold_bn(p["b1"], p["g1"], p["be1"], p["m1"], p["v1"])
    s2, t2 = _fold_bn(p["b2"], p["g2"], p["be2"], p["m2"], p["v2"])
    if has_proj:
        ws = p["ws"].astype(bf16)
        ss, ts = _fold_bn(p["bs"], p["gs"], p["bes"], p["ms"], p["vs"])
    else:
        ss = jnp.zeros((Cout,), jnp.float32)
        ts = jnp.zeros((Cout,), jnp.float32)
    zero = jnp.zeros((Cout,), jnp.float32)
    # six per-channel scale/shift vectors packed into one (8, Cout) f32 tile
    st = jnp.stack([s1, t1, s2, t2, ss, ts, zero, zero], axis=0)

    in_specs = [
        # full padded image per batch element; re-fetched only when n changes
        pl.BlockSpec((1, H + 4, W + 2, Cin), lambda n, h: (n, 0, 0, 0)),
        pl.BlockSpec((9 * Cin, Cout), lambda n, h: (0, 0)),
        pl.BlockSpec((9 * Cout, Cout), lambda n, h: (0, 0)),
    ]
    args = [xp, w1, w2]
    if has_proj:
        in_specs.append(pl.BlockSpec((Cin, Cout), lambda n, h: (0, 0)))
        args.append(ws)
    in_specs.append(pl.BlockSpec((8, Cout), lambda n, h: (0, 0)))
    args.append(st)

    grid_spec = pltpu.PrefetchScalarGridSpec(
        num_scalar_prefetch=0,
        grid=(N, n_tiles),
        in_specs=in_specs,
        out_specs=pl.BlockSpec((1, tile_h, W, Cout), lambda n, h: (n, h, 0, 0)),
        scratch_shapes=[
            # bf16 padded conv1 output for this tile (+1-row halo each side, +W halo)
            pltpu.VMEM((tile_h + 2, W + 2, Cout), bf16),
        ],
    )

    kernel = _make_kernel(has_proj, W, Cin, Cout, tile_h, n_tiles,
                          tap_accum1=(Cin >= min_tap_k),
                          tap_accum2=(Cout >= min_tap_k))

    return pl.pallas_call(
        kernel,
        out_shape=jax.ShapeDtypeStruct((N, H, W, Cout), out_dtype),
        grid_spec=grid_spec,
        compiler_params=pltpu.CompilerParams(
            # batch elements and row-tiles are independent -> both axes megacore-shardable
            dimension_semantics=("parallel", "parallel"),
            vmem_limit_bytes=48 * 1024 * 1024,
        ),
    )(*args)


def init_params(key, cin, cout):
    ks = jax.random.split(key, 18)
    f32 = jnp.float32
    p = {
        "w1": 0.1 * jax.random.normal(ks[0], (3, 3, cin, cout), f32),
        "b1": 0.1 * jax.random.normal(ks[1], (cout,), f32),
        "g1": 1.0 + 0.1 * jax.random.normal(ks[2], (cout,), f32),
        "be1": 0.1 * jax.random.normal(ks[3], (cout,), f32),
        "m1": 0.1 * jax.random.normal(ks[4], (cout,), f32),
        "v1": 0.5 + jnp.abs(jax.random.normal(ks[5], (cout,), f32)) * 0.5,
        "w2": 0.1 * jax.random.normal(ks[6], (3, 3, cout, cout), f32),
        "b2": 0.1 * jax.random.normal(ks[7], (cout,), f32),
        "g2": 1.0 + 0.1 * jax.random.normal(ks[8], (cout,), f32),
        "be2": 0.1 * jax.random.normal(ks[9], (cout,), f32),
        "m2": 0.1 * jax.random.normal(ks[10], (cout,), f32),
        "v2": 0.5 + jnp.abs(jax.random.normal(ks[11], (cout,), f32)) * 0.5,
    }
    if cin != cout:
        p.update({
            "ws": 0.1 * jax.random.normal(ks[12], (cin, cout), f32),
            "bs": 0.1 * jax.random.normal(ks[13], (cout,), f32),
            "gs": 1.0 + 0.1 * jax.random.normal(ks[14], (cout,), f32),
            "bes": 0.1 * jax.random.normal(ks[15], (cout,), f32),
            "ms": 0.1 * jax.random.normal(ks[16], (cout,), f32),
            "vs": 0.5 + jnp.abs(jax.random.normal(ks[17], (cout,), f32)) * 0.5,
        })
    return p


def reference(x_nhwc, p):
    """Plain-JAX reference of ResidualBlock.forward (eval-mode BN).

    Matmul inputs are cast to bf16 with f32 accumulation, mirroring the kernel's
    MXU dtype; everything else stays f32.
    """
    bf16 = jnp.bfloat16

    def conv3(x, w, b):
        y = jax.lax.conv_general_dilated(
            x.astype(bf16), w.astype(bf16), (1, 1), ((1, 1), (1, 1)),
            dimension_numbers=("NHWC", "HWIO", "NHWC"),
            preferred_element_type=jnp.float32)
        return y + b

    def bn(x, g, bta, m, v):
        return (x - m) / jnp.sqrt(v + EPS) * g + bta

    y = jax.nn.relu(bn(conv3(x_nhwc, p["w1"], p["b1"]),
                       p["g1"], p["be1"], p["m1"], p["v1"]))
    y = bn(conv3(y, p["w2"], p["b2"]), p["g2"], p["be2"], p["m2"], p["v2"])
    if "ws" in p:
        s = jnp.einsum("nhwc,cd->nhwd", x_nhwc.astype(bf16), p["ws"].astype(bf16),
                       preferred_element_type=jnp.float32) + p["bs"]
        s = bn(s, p["gs"], p["bes"], p["ms"], p["vs"])
    else:
        s = x_nhwc.astype(bf16).astype(jnp.float32)
    return jax.nn.relu(y + s)


if __name__ == "__main__":
    # Small shapes consistent with ResidualBlock(in_channels, out_channels):
    # batch=2, in_channels=8, out_channels=16, spatial=16x16.
    N, Cin, Cout, H, W = 2, 8, 16, 16, 16

    key = jax.random.PRNGKey(0)
    kx, kp = jax.random.split(key)
    x_nchw = jax.random.normal(kx, (N, Cin, H, W), jnp.float32)   # PyTorch NCHW
    x_nhwc = jnp.transpose(x_nchw, (0, 2, 3, 1))                  # kernel layout NHWC

    params = init_params(kp, Cin, Cout)
    ref = jax.block_until_ready(reference(x_nhwc, params))

    # 1) projection shortcut + explicit H-tiling (two row tiles -> halo logic exercised)
    out = jax.block_until_ready(residual_block(x_nhwc, params, tile_h=8))
    np.testing.assert_allclose(np.asarray(out.astype(jnp.float32)), np.asarray(ref),
                               rtol=2e-2, atol=2e-2)

    # 2) per-tap accumulated-matmul path (the C >= 128 production path), forced here
    out_tap = jax.block_until_ready(residual_block(x_nhwc, params, tile_h=8, min_tap_k=1))
    np.testing.assert_allclose(np.asarray(out_tap.astype(jnp.float32)), np.asarray(ref),
                               rtol=2e-2, atol=2e-2)

    # 3) identity-shortcut static branch (Cin == Cout), default (single) row tile
    params_id = init_params(jax.random.PRNGKey(1), Cout, Cout)
    x_id = jax.random.normal(jax.random.PRNGKey(2), (N, H, W, Cout), jnp.float32)
    out_id = jax.block_until_ready(residual_block(x_id, params_id))
    ref_id = jax.block_until_ready(reference(x_id, params_id))
    np.testing.assert_allclose(np.asarray(out_id.astype(jnp.float32)), np.asarray(ref_id),
                               rtol=2e-2, atol=2e-2)

    print("KERNEL_OK")
</pallas_src>

<mosaic_0001>
module attributes {stable_mosaic.version = 11 : i64} {
  func.func @kernel(%arg0: i32, %arg1: i32, %arg2: memref<1x20x18x8xbf16, #tpu.memory_space<vmem>>, %arg3: memref<72x16xbf16, #tpu.memory_space<vmem>>, %arg4: memref<144x16xbf16, #tpu.memory_space<vmem>>, %arg5: memref<8x16xbf16, #tpu.memory_space<vmem>>, %arg6: memref<8x16xf32, #tpu.memory_space<vmem>>, %arg7: memref<1x8x16x16xbf16, #tpu.memory_space<vmem>>, %arg8: memref<10x18x16xbf16, #tpu.memory_space<vmem>>) attributes {dimension_semantics = [#tpu.dimension_semantics<parallel>, #tpu.dimension_semantics<parallel>], iteration_bounds = array<i64: 2, 2>, scalar_prefetch = 0 : i64, scratch_operands = 1 : i64, tpu.core_type = #tpu.core_type<tc>, window_params = [{transform_indices = @transform_0, window_bounds = array<i64: 1, 20, 18, 8>}, {pipeline_mode = #tpu.pipeline_mode<synchronous>, transform_indices = @transform_1, window_bounds = array<i64: 72, 16>}, {pipeline_mode = #tpu.pipeline_mode<synchronous>, transform_indices = @transform_2, window_bounds = array<i64: 144, 16>}, {pipeline_mode = #tpu.pipeline_mode<synchronous>, transform_indices = @transform_3, window_bounds = array<i64: 8, 16>}, {pipeline_mode = #tpu.pipeline_mode<synchronous>, transform_indices = @transform_4, window_bounds = array<i64: 8, 16>}, {transform_indices = @transform_5, window_bounds = array<i64: 1, 8, 16, 16>}]} {
    %c8_i32 = arith.constant 8 : i32
    %0 = arith.muli %arg1, %c8_i32 : i32
    %1 = tpu.assume_multiple %0, 8 : i32
    %c0_i32 = arith.constant 0 : i32
    %2 = arith.addi %1, %c0_i32 : i32
    %c0 = arith.constant 0 : index
    %3 = arith.index_cast %2 : i32 to index
    %c0_0 = arith.constant 0 : index
    %c0_1 = arith.constant 0 : index
    %4 = vector.load %arg2[%c0, %3, %c0_0, %c0_1] : memref<1x20x18x8xbf16, #tpu.memory_space<vmem>>, vector<1x10x16x8xbf16>
    %5 = vector.shape_cast %4 : vector<1x10x16x8xbf16> to vector<10x16x8xbf16>
    %6 = vector.shape_cast %5 : vector<10x16x8xbf16> to vector<160x8xbf16>
    %c0_i32_2 = arith.constant 0 : i32
    %7 = arith.addi %1, %c0_i32_2 : i32
    %c0_3 = arith.constant 0 : index
    %8 = arith.index_cast %7 : i32 to index
    %c1 = arith.constant 1 : index
    %c0_4 = arith.constant 0 : index
    %9 = vector.load %arg2[%c0_3, %8, %c1, %c0_4] : memref<1x20x18x8xbf16, #tpu.memory_space<vmem>>, vector<1x10x16x8xbf16>
    %10 = vector.shape_cast %9 : vector<1x10x16x8xbf16> to vector<10x16x8xbf16>
    %11 = vector.shape_cast %10 : vector<10x16x8xbf16> to vector<160x8xbf16>
    %c0_i32_5 = arith.constant 0 : i32
    %12 = arith.addi %1, %c0_i32_5 : i32
    %c0_6 = arith.constant 0 : index
    %13 = arith.index_cast %12 : i32 to index
    %c2 = arith.constant 2 : index
    %c0_7 = arith.constant 0 : index
    %14 = vector.load %arg2[%c0_6, %13, %c2, %c0_7] : memref<1x20x18x8xbf16, #tpu.memory_space<vmem>>, vector<1x10x16x8xbf16>
    %15 = vector.shape_cast %14 : vector<1x10x16x8xbf16> to vector<10x16x8xbf16>
    %16 = vector.shape_cast %15 : vector<10x16x8xbf16> to vector<160x8xbf16>
    %c1_i32 = arith.constant 1 : i32
    %17 = arith.addi %1, %c1_i32 : i32
    %c0_8 = arith.constant 0 : index
    %18 = arith.index_cast %17 : i32 to index
    %c0_9 = arith.constant 0 : index
    %c0_10 = arith.constant 0 : index
    %19 = vector.load %arg2[%c0_8, %18, %c0_9, %c0_10] : memref<1x20x18x8xbf16, #tpu.memory_space<vmem>>, vector<1x10x16x8xbf16>
    %20 = vector.shape_cast %19 : vector<1x10x16x8xbf16> to vector<10x16x8xbf16>
    %21 = vector.shape_cast %20 : vector<10x16x8xbf16> to vector<160x8xbf16>
    %c1_i32_11 = arith.constant 1 : i32
    %22 = arith.addi %1, %c1_i32_11 : i32
    %c0_12 = arith.constant 0 : index
    %23 = arith.index_cast %22 : i32 to index
    %c1_13 = arith.constant 1 : index
    %c0_14 = arith.constant 0 : index
    %24 = vector.load %arg2[%c0_12, %23, %c1_13, %c0_14] : memref<1x20x18x8xbf16, #tpu.memory_space<vmem>>, vector<1x10x16x8xbf16>
    %25 = vector.shape_cast %24 : vector<1x10x16x8xbf16> to vector<10x16x8xbf16>
    %26 = vector.shape_cast %25 : vector<10x16x8xbf16> to vector<160x8xbf16>
    %c1_i32_15 = arith.constant 1 : i32
    %27 = arith.addi %1, %c1_i32_15 : i32
    %c0_16 = arith.constant 0 : index
    %28 = arith.index_cast %27 : i32 to index
    %c2_17 = arith.constant 2 : index
    %c0_18 = arith.constant 0 : index
    %29 = vector.load %arg2[%c0_16, %28, %c2_17, %c0_18] : memref<1x20x18x8xbf16, #tpu.memory_space<vmem>>, vector<1x10x16x8xbf16>
    %30 = vector.shape_cast %29 : vector<1x10x16x8xbf16> to vector<10x16x8xbf16>
    %31 = vector.shape_cast %30 : vector<10x16x8xbf16> to vector<160x8xbf16>
    %c2_i32 = arith.constant 2 : i32
    %32 = arith.addi %1, %c2_i32 : i32
    %c0_19 = arith.constant 0 : index
    %33 = arith.index_cast %32 : i32 to index
    %c0_20 = arith.constant 0 : index
    %c0_21 = arith.constant 0 : index
    %34 = vector.load %arg2[%c0_19, %33, %c0_20, %c0_21] : memref<1x20x18x8xbf16, #tpu.memory_space<vmem>>, vector<1x10x16x8xbf16>
    %35 = vector.shape_cast %34 : vector<1x10x16x8xbf16> to vector<10x16x8xbf16>
    %36 = vector.shape_cast %35 : vector<10x16x8xbf16> to vector<160x8xbf16>
    %c2_i32_22 = arith.constant 2 : i32
    %37 = arith.addi %1, %c2_i32_22 : i32
    %c0_23 = arith.constant 0 : index
    %38 = arith.index_cast %37 : i32 to index
    %c1_24 = arith.constant 1 : index
    %c0_25 = arith.constant 0 : index
    %39 = vector.load %arg2[%c0_23, %38, %c1_24, %c0_25] : memref<1x20x18x8xbf16, #tpu.memory_space<vmem>>, vector<1x10x16x8xbf16>
    %40 = vector.shape_cast %39 : vector<1x10x16x8xbf16> to vector<10x16x8xbf16>
    %41 = vector.shape_cast %40 : vector<10x16x8xbf16> to vector<160x8xbf16>
    %c2_i32_26 = arith.constant 2 : i32
    %42 = arith.addi %1, %c2_i32_26 : i32
    %c0_27 = arith.constant 0 : index
    %43 = arith.index_cast %42 : i32 to index
    %c2_28 = arith.constant 2 : index
    %c0_29 = arith.constant 0 : index
    %44 = vector.load %arg2[%c0_27, %43, %c2_28, %c0_29] : memref<1x20x18x8xbf16, #tpu.memory_space<vmem>>, vector<1x10x16x8xbf16>
    %45 = vector.shape_cast %44 : vector<1x10x16x8xbf16> to vector<10x16x8xbf16>
    %46 = vector.shape_cast %45 : vector<10x16x8xbf16> to vector<160x8xbf16>
    %47 = tpu.concatenate %6, %11, %16, %21, %26, %31, %36, %41, %46 in 1 : vector<160x8xbf16>, vector<160x8xbf16>, vector<160x8xbf16>, vector<160x8xbf16>, vector<160x8xbf16>, vector<160x8xbf16>, vector<160x8xbf16>, vector<160x8xbf16>, vector<160x8xbf16> -> vector<160x72xbf16>
    %c0_30 = arith.constant 0 : index
    %c0_31 = arith.constant 0 : index
    %48 = vector.load %arg3[%c0_30, %c0_31] : memref<72x16xbf16, #tpu.memory_space<vmem>>, vector<72x16xbf16>
    %cst = arith.constant dense<0.000000e+00> : vector<160x16xf32>
    %49 = tpu.matmul %47, %48, %cst {dimension_numbers = #tpu.dot_dimension_numbers<[1], [0], [0], [1], [0, 0, 1, 1], [], []>} : vector<160x72xbf16>, vector<72x16xbf16>, vector<160x16xf32> -> vector<160x16xf32>
    %c0_32 = arith.constant 0 : index
    %c0_33 = arith.constant 0 : index
    %50 = vector.load %arg6[%c0_32, %c0_33] : memref<8x16xf32, #tpu.memory_space<vmem>>, vector<1x16xf32>
    %51 = vector.broadcast %50 : vector<1x16xf32> to vector<160x16xf32>
    %52 = arith.mulf %49, %51 : vector<160x16xf32>
    %c1_34 = arith.constant 1 : index
    %c0_35 = arith.constant 0 : index
    %53 = vector.load %arg6[%c1_34, %c0_35] : memref<8x16xf32, #tpu.memory_space<vmem>>, vector<1x16xf32>
    %54 = vector.broadcast %53 : vector<1x16xf32> to vector<160x16xf32>
    %55 = arith.addf %52, %54 : vector<160x16xf32>
    %cst_36 = arith.constant 0.000000e+00 : f32
    %56 = vector.broadcast %cst_36 : f32 to vector<160x16xf32>
    %57 = arith.maximumf %55, %56 : vector<160x16xf32>
    %58 = vector.shape_cast %57 : vector<160x16xf32> to vector<10x16x16xf32>
    %59 = arith.truncf %58 : vector<10x16x16xf32> to vector<10x16x16xbf16>
    %c0_37 = arith.constant 0 : index
    %c1_38 = arith.constant 1 : index
    %c0_39 = arith.constant 0 : index
    %60 = vector.load %arg8[%c0_37, %c1_38, %c0_39] : memref<10x18x16xbf16, #tpu.memory_space<vmem>>, vector<10x16x16xbf16>
    tpu.vector_store %arg8[%c0_37, %c1_38, %c0_39], %59 {strides = array<i32>} : memref<10x18x16xbf16, #tpu.memory_space<vmem>>, vector<10x16x16xbf16>,
    %cst_40 = arith.constant 0.000000e+00 : bf16
    %61 = vector.broadcast %cst_40 : bf16 to vector<10x1x16xbf16>
    %c0_41 = arith.constant 0 : index
    %c0_42 = arith.constant 0 : index
    %c0_43 = arith.constant 0 : index
    %62 = vector.load %arg8[%c0_41, %c0_42, %c0_43] : memref<10x18x16xbf16, #tpu.memory_space<vmem>>, vector<10x1x16xbf16>
    tpu.vector_store %arg8[%c0_41, %c0_42, %c0_43], %61 {strides = array<i32>} : memref<10x18x16xbf16, #tpu.memory_space<vmem>>, vector<10x1x16xbf16>,
    %c0_44 = arith.constant 0 : index
    %c17 = arith.constant 17 : index
    %c0_45 = arith.constant 0 : index
    %63 = vector.load %arg8[%c0_44, %c17, %c0_45] : memref<10x18x16xbf16, #tpu.memory_space<vmem>>, vector<10x1x16xbf16>
    tpu.vector_store %arg8[%c0_44, %c17, %c0_45], %61 {strides = array<i32>} : memref<10x18x16xbf16, #tpu.memory_space<vmem>>, vector<10x1x16xbf16>,
    %cst_46 = arith.constant 0.000000e+00 : bf16
    %64 = vector.broadcast %cst_46 : bf16 to vector<1x18x16xbf16>
    %c0_i32_47 = arith.constant 0 : i32
    %65 = arith.cmpi eq, %arg1, %c0_i32_47 : i32
    %66 = arith.extui %65 : i1 to i32
    %c0_i32_48 = arith.constant 0 : i32
    %67 = arith.cmpi ne, %66, %c0_i32_48 : i32
    scf.if %67 {
      %c0_98 = arith.constant 0 : index
      %c0_99 = arith.constant 0 : index
      %c0_100 = arith.constant 0 : index
      %117 = vector.load %arg8[%c0_98, %c0_99, %c0_100] : memref<10x18x16xbf16, #tpu.memory_space<vmem>>, vector<1x18x16xbf16>
      tpu.vector_store %arg8[%c0_98, %c0_99, %c0_100], %64 {strides = array<i32>} : memref<10x18x16xbf16, #tpu.memory_space<vmem>>, vector<1x18x16xbf16>,
    } else {
    }
    %c1_i32_49 = arith.constant 1 : i32
    %68 = arith.cmpi eq, %arg1, %c1_i32_49 : i32
    %69 = arith.extui %68 : i1 to i32
    %c0_i32_50 = arith.constant 0 : i32
    %70 = arith.cmpi ne, %69, %c0_i32_50 : i32
    scf.if %70 {
      %c9 = arith.constant 9 : index
      %c0_98 = arith.constant 0 : index
      %c0_99 = arith.constant 0 : index
      %117 = vector.load %arg8[%c9, %c0_98, %c0_99] : memref<10x18x16xbf16, #tpu.memory_space<vmem>>, vector<1x18x16xbf16>
      tpu.vector_store %arg8[%c9, %c0_98, %c0_99], %64 {strides = array<i32>} : memref<10x18x16xbf16, #tpu.memory_space<vmem>>, vector<1x18x16xbf16>,
    } else {
    }
    %c0_51 = arith.constant 0 : index
    %c0_52 = arith.constant 0 : index
    %c0_53 = arith.constant 0 : index
    %71 = vector.load %arg8[%c0_51, %c0_52, %c0_53] : memref<10x18x16xbf16, #tpu.memory_space<vmem>>, vector<8x16x16xbf16>
    %72 = vector.shape_cast %71 : vector<8x16x16xbf16> to vector<128x16xbf16>
    %c0_54 = arith.constant 0 : index
    %c1_55 = arith.constant 1 : index
    %c0_56 = arith.constant 0 : index
    %73 = vector.load %arg8[%c0_54, %c1_55, %c0_56] : memref<10x18x16xbf16, #tpu.memory_space<vmem>>, vector<8x16x16xbf16>
    %74 = vector.shape_cast %73 : vector<8x16x16xbf16> to vector<128x16xbf16>
    %c0_57 = arith.constant 0 : index
    %c2_58 = arith.constant 2 : index
    %c0_59 = arith.constant 0 : index
    %75 = vector.load %arg8[%c0_57, %c2_58, %c0_59] : memref<10x18x16xbf16, #tpu.memory_space<vmem>>, vector<8x16x16xbf16>
    %76 = vector.shape_cast %75 : vector<8x16x16xbf16> to vector<128x16xbf16>
    %c1_60 = arith.constant 1 : index
    %c0_61 = arith.constant 0 : index
    %c0_62 = arith.constant 0 : index
    %77 = vector.load %arg8[%c1_60, %c0_61, %c0_62] : memref<10x18x16xbf16, #tpu.memory_space<vmem>>, vector<8x16x16xbf16>
    %78 = vector.shape_cast %77 : vector<8x16x16xbf16> to vector<128x16xbf16>
    %c1_63 = arith.constant 1 : index
    %c1_64 = arith.constant 1 : index
    %c0_65 = arith.constant 0 : index
    %79 = vector.load %arg8[%c1_63, %c1_64, %c0_65] : memref<10x18x16xbf16, #tpu.memory_space<vmem>>, vector<8x16x16xbf16>
    %80 = vector.shape_cast %79 : vector<8x16x16xbf16> to vector<128x16xbf16>
    %c1_66 = arith.constant 1 : index
    %c2_67 = arith.constant 2 : index
    %c0_68 = arith.constant 0 : index
    %81 = vector.load %arg8[%c1_66, %c2_67, %c0_68] : memref<10x18x16xbf16, #tpu.memory_space<vmem>>, vector<8x16x16xbf16>
    %82 = vector.shape_cast %81 : vector<8x16x16xbf16> to vector<128x16xbf16>
    %c2_69 = arith.constant 2 : index
    %c0_70 = arith.constant 0 : index
    %c0_71 = arith.constant 0 : index
    %83 = vector.load %arg8[%c2_69, %c0_70, %c0_71] : memref<10x18x16xbf16, #tpu.memory_space<vmem>>, vector<8x16x16xbf16>
    %84 = vector.shape_cast %83 : vector<8x16x16xbf16> to vector<128x16xbf16>
    %c2_72 = arith.constant 2 : index
    %c1_73 = arith.constant 1 : index
    %c0_74 = arith.constant 0 : index
    %85 = vector.load %arg8[%c2_72, %c1_73, %c0_74] : memref<10x18x16xbf16, #tpu.memory_space<vmem>>, vector<8x16x16xbf16>
    %86 = vector.shape_cast %85 : vector<8x16x16xbf16> to vector<128x16xbf16>
    %c2_75 = arith.constant 2 : index
    %c2_76 = arith.constant 2 : index
    %c0_77 = arith.constant 0 : index
    %87 = vector.load %arg8[%c2_75, %c2_76, %c0_77] : memref<10x18x16xbf16, #tpu.memory_space<vmem>>, vector<8x16x16xbf16>
    %88 = vector.shape_cast %87 : vector<8x16x16xbf16> to vector<128x16xbf16>
    %89 = tpu.concatenate %72, %74, %76, %78, %80, %82, %84, %86, %88 in 1 : vector<128x16xbf16>, vector<128x16xbf16>, vector<128x16xbf16>, vector<128x16xbf16>, vector<128x16xbf16>, vector<128x16xbf16>, vector<128x16xbf16>, vector<128x16xbf16>, vector<128x16xbf16> -> vector<128x144xbf16>
    %c0_78 = arith.constant 0 : index
    %c0_79 = arith.constant 0 : index
    %90 = vector.load %arg4[%c0_78, %c0_79] : memref<144x16xbf16, #tpu.memory_space<vmem>>, vector<144x16xbf16>
    %cst_80 = arith.constant dense<0.000000e+00> : vector<128x16xf32>
    %91 = tpu.matmul %89, %90, %cst_80 {dimension_numbers = #tpu.dot_dimension_numbers<[1], [0], [0], [1], [0, 0, 1, 1], [], []>} : vector<128x144xbf16>, vector<144x16xbf16>, vector<128x16xf32> -> vector<128x16xf32>
    %c2_81 = arith.constant 2 : index
    %c0_82 = arith.constant 0 : index
    %92 = vector.load %arg6[%c2_81, %c0_82] : memref<8x16xf32, #tpu.memory_space<vmem>>, vector<1x16xf32>
    %93 = vector.broadcast %92 : vector<1x16xf32> to vector<128x16xf32>
    %94 = arith.mulf %91, %93 : vector<128x16xf32>
    %c3 = arith.constant 3 : index
    %c0_83 = arith.constant 0 : index
    %95 = vector.load %arg6[%c3, %c0_83] : memref<8x16xf32, #tpu.memory_space<vmem>>, vector<1x16xf32>
    %96 = vector.broadcast %95 : vector<1x16xf32> to vector<128x16xf32>
    %97 = arith.addf %94, %96 : vector<128x16xf32>
    %c2_i32_84 = arith.constant 2 : i32
    %98 = arith.addi %1, %c2_i32_84 : i32
    %c0_85 = arith.constant 0 : index
    %99 = arith.index_cast %98 : i32 to index
    %c1_86 = arith.constant 1 : index
    %c0_87 = arith.constant 0 : index
    %100 = vector.load %arg2[%c0_85, %99, %c1_86, %c0_87] : memref<1x20x18x8xbf16, #tpu.memory_space<vmem>>, vector<1x8x16x8xbf16>
    %101 = vector.shape_cast %100 : vector<1x8x16x8xbf16> to vector<8x16x8xbf16>
    %102 = vector.shape_cast %101 : vector<8x16x8xbf16> to vector<128x8xbf16>
    %c0_88 = arith.constant 0 : index
    %c0_89 = arith.constant 0 : index
    %103 = vector.load %arg5[%c0_88, %c0_89] : memref<8x16xbf16, #tpu.memory_space<vmem>>, vector<8x16xbf16>
    %cst_90 = arith.constant dense<0.000000e+00> : vector<128x16xf32>
    %104 = tpu.matmul %102, %103, %cst_90 {dimension_numbers = #tpu.dot_dimension_numbers<[1], [0], [0], [1], [0, 0, 1, 1], [], []>} : vector<128x8xbf16>, vector<8x16xbf16>, vector<128x16xf32> -> vector<128x16xf32>
    %c4 = arith.constant 4 : index
    %c0_91 = arith.constant 0 : index
    %105 = vector.load %arg6[%c4, %c0_91] : memref<8x16xf32, #tpu.memory_space<vmem>>, vector<1x16xf32>
    %106 = vector.broadcast %105 : vector<1x16xf32> to vector<128x16xf32>
    %107 = arith.mulf %104, %106 : vector<128x16xf32>
    %c5 = arith.constant 5 : index
    %c0_92 = arith.constant 0 : index
    %108 = vector.load %arg6[%c5, %c0_92] : memref<8x16xf32, #tpu.memory_space<vmem>>, vector<1x16xf32>
    %109 = vector.broadcast %108 : vector<1x16xf32> to vector<128x16xf32>
    %110 = arith.addf %107, %109 : vector<128x16xf32>
    %111 = arith.addf %97, %110 : vector<128x16xf32>
    %cst_93 = arith.constant 0.000000e+00 : f32
    %112 = vector.broadcast %cst_93 : f32 to vector<128x16xf32>
    %113 = arith.maximumf %111, %112 : vector<128x16xf32>
    %114 = vector.shape_cast %113 : vector<128x16xf32> to vector<1x8x16x16xf32>
    %115 = arith.truncf %114 : vector<1x8x16x16xf32> to vector<1x8x16x16xbf16>
    %c0_94 = arith.constant 0 : index
    %c0_95 = arith.constant 0 : index
    %c0_96 = arith.constant 0 : index
    %c0_97 = arith.constant 0 : index
    %116 = vector.load %arg7[%c0_94, %c0_95, %c0_96, %c0_97] : memref<1x8x16x16xbf16, #tpu.memory_space<vmem>>, vector<1x8x16x16xbf16>
    tpu.vector_store %arg7[%c0_94, %c0_95, %c0_96, %c0_97], %115 {strides = array<i32>} : memref<1x8x16x16xbf16, #tpu.memory_space<vmem>>, vector<1x8x16x16xbf16>,
    return
  }
  func.func @transform_0(%arg0: i32, %arg1: i32) -> (i32, i32, i32, i32) {
    %c0_i32 = arith.constant 0 : i32
    %c0_i32_0 = arith.constant 0 : i32
    %c0_i32_1 = arith.constant 0 : i32
    %c0_i32_2 = arith.constant 0 : i32
    return %arg0, %c0_i32, %c0_i32_0, %c0_i32_1 : i32, i32, i32, i32
  }
  func.func @transform_1(%arg0: i32, %arg1: i32) -> (i32, i32) {
    %c0_i32 = arith.constant 0 : i32
    %c0_i32_0 = arith.constant 0 : i32
    %c0_i32_1 = arith.constant 0 : i32
    return %c0_i32, %c0_i32_0 : i32, i32
  }
  func.func @transform_2(%arg0: i32, %arg1: i32) -> (i32, i32) {
    %c0_i32 = arith.constant 0 : i32
    %c0_i32_0 = arith.constant 0 : i32
    %c0_i32_1 = arith.constant 0 : i32
    return %c0_i32, %c0_i32_0 : i32, i32
  }
  func.func @transform_3(%arg0: i32, %arg1: i32) -> (i32, i32) {
    %c0_i32 = arith.constant 0 : i32
    %c0_i32_0 = arith.constant 0 : i32
    %c0_i32_1 = arith.constant 0 : i32
    return %c0_i32, %c0_i32_0 : i32, i32
  }
  func.func @transform_4(%arg0: i32, %arg1: i32) -> (i32, i32) {
    %c0_i32 = arith.constant 0 : i32
    %c0_i32_0 = arith.constant 0 : i32
    %c0_i32_1 = arith.constant 0 : i32
    return %c0_i32, %c0_i32_0 : i32, i32
  }
  func.func @transform_5(%arg0: i32, %arg1: i32) -> (i32, i32, i32, i32) {
    %c0_i32 = arith.constant 0 : i32
    %c0_i32_0 = arith.constant 0 : i32
    %c0_i32_1 = arith.constant 0 : i32
    return %arg0, %arg1, %c0_i32, %c0_i32_0 : i32, i32, i32, i32
  }
}

</mosaic_0001>

<bundles_post_ra>
// kernel: tpu_custom_call.1
= control target key start
LH: loop header
LB: loop body
LE: loop exit
PB: predicated region body
PF: predicated region fallthrough
CT: control target
= control target key end

     0   :  { %10 = vsyncpa [#allocation4], 0  ;;  %s7833_s0 = inlined_call_operand.vmem [shape: bf16[2,20,18,8], index: 0, kind: input, shape index: {}]   ;;  %s7834_s1 = inlined_call_operand.vmem [shape: bf16[72,16], index: 1, kind: input, shape index: {}]   ;;  %s7835_s2 = inlined_call_operand.vmem [shape: bf16[144,16], index: 2, kind: input, shape index: {}]   ;;  %s7836_s3 = inlined_call_operand.vmem [shape: bf16[8,16], index: 3, kind: input, shape index: {}]   ;;  %s7837_s4 = inlined_call_operand.vmem [shape: f32[8,16], index: 4, kind: input, shape index: {}]   ;;  %s7838_s5 = inlined_call_operand.hbm [shape: bf16[2,16,16,16], index: 5, kind: output, shape index: {}]  }
   0x1   :  { %12 = vsyncpa [#allocation4 + $0x1], 0  ;;  %s5832_s18 = smov 0   ;;  %s5834_s19 = smov 0  }
   0x2   :  { %s5836_s20 = smov 0   ;;  %s5838_s21 = smov 0  }
   0x3   :  { %s5840_s22 = smov 0   ;;  %s5842_s23 = smov 0  }
   0x4   :  { %s5844_s24 = smov 0   ;;  %s5846_s25 = smov 0  }
   0x5 LB: > { %s4950_s26 = sadd.s32 4294967295, %s5784_s25   ;;  %s4951_s27 = sadd.s32 4294967294, %s5784_s25   ;;  %s5784_s25 = sphi %s5846_s25, %s18_s25   ;;  %s5780_s24 = sphi %s5844_s24, %s7861_s24   ;;  %s5776_s23 = sphi %s5842_s23, %s7860_s23   ;;  %s5772_s22 = sphi %s5840_s22, %s7859_s22   ;;  %s5768_s21 = sphi %s5838_s21, %s7858_s21   ;;  %s5764_s20 = sphi %s5836_s20, %s7857_s20   ;;  %s5760_s19 = sphi %s5834_s19, %s7856_s19   ;;  %s5756_s18 = sphi %s5832_s18, %s7855_s18  }
   0x6   : > { %s27_s28 = sadd.s32 1, %s5776_s23  ;;  %s30_s29 = sadd.s32 1, %s5780_s24 }
   0x7   : > { %p28_p0 = scmp.ge.s32.totalorder %s27_s28, 2  ;;  %p159_p1 = scmp.ne.s32.totalorder %s5764_s20, %s5760_s19 }
   0x8   : > { %p160_p2 = scmp.eq.s32.totalorder %s4950_s26, 3  ;;  %p165_p5 = scmp.ne.s32.totalorder %s5760_s19, %s5756_s18 }
   0x9   : > { %s7863_s28 = smov (%p28_p0, %s27_s28), 0  ;;  %s7865_s29 = smov (!%p28_p0, %s30_s29), %s5780_s24 }
   0xa   : > { %s145_s30 = ssub.s32 %s5776_s23, %s7863_s28  ;;  %p5883_p3 = por %p160_p2, %p159_p1 }
   0xb   : > { %p32_p4 = scmp.ge.s32.totalorder %s7865_s29, 2  ;;  %p166_p6 = scmp.eq.s32.totalorder %s4951_s27, 3 }
   0xc   : > { %p4954_p7 = scmp.ge.s32.totalorder %s5784_s25, 1  ;;  %p204_p9 = scmp.lt.s32.totalorder %s5784_s25, 5 }
   0xd   : > { %s7867_s29 = smov (%p32_p4, %s7865_s29), 0  ;;  %p5892_p8 = por %p166_p6, %p165_p5 }
   0xe   : > { %s144_s8 = ssub.s32 %s5780_s24, %s7867_s29  ;;  %s149_s9 = sadd.s32 1, %s5764_s20 }
   0xf   : > { %s146_s10 = sor.u32 %s145_s30, %s144_s8  ;;  %p205_p10 = pnand %p4954_p7, %p204_p9 }
  0x10   : > { %p147_p11 = scmp.eq.s32.totalorder %s146_s10, 0  ;;  %p232_p12 = scmp.lt.s32.totalorder (!%p205_p10), %s5772_s22, 1 }
  0x11   : > { %208 = sbr.rel (%p205_p10) target bundleno = 1059 (0x423), region = 40  ;;  %s5786_s27 = smov (!%p205_p10), 24  }
  0x12   : > { %s5901_s11 = scalar_select %p147_p11, %s5764_s20, %s149_s9  }
  0x13   : > { %s5383_s13 = smul.u32 (!%p205_p10), 96, %s5768_s21  ;;  %s5787_s30 = smov (!%p205_p10), 48  }
  0x14   : > { %s5788_s8 = smov (!%p205_p10), 40   ;;  %s5789_s9 = smov (!%p205_p10), 16  }
  0x15   : > { %s5790_s10 = smov (!%p205_p10), 8   ;;  %s5792_s15 = smov (!%p205_p10), 56  }
  0x16   : > { %s233_s12 = scalar_select %p232_p12, %s5772_s22, 1  ;;  %vm556_vm0 = vcmask 1042432   ;;  %vm557_vm1 = vcmask 1046532   ;;  %vm273_vm3 = vsmask.f32 3328  ;;  %vm1857_vm6 = vcmask 64512  }
  0x17   : > { %vm5953_vm2 = vmor %vm556_vm0, %vm557_vm1  ;;  %vm274_vm4 = vsmask.f32 7440  ;;  %s5793_s16 = smov 64   ;;  %vm1888_vm7 = vcmask 130048   ;;  %vm2092_vm8 = vcmask 1043456   ;;  %vm1909_vm9 = vcmask 195584  }
  0x18   : > { %s5495_s14 = smul.u32 240, %s233_s12  ;;  %vm6000_vm5 = vmor %vm273_vm3, %vm274_vm4  ;;  %s7839_s12 = sand.u32 1, %s5760_s19   ;;  %vm1930_vm10 = vcmask 261120   ;;  %vm1951_vm11 = vcmask 326656   ;;  %vm1972_vm12 = vcmask 392192   ;;  %vm1993_vm13 = vcmask 457728  }
  0x19   : > { %vm2014_vm14 = vcmask 523264   ;;  %vm2071_vm15 = vcmask 588800   ;;  %vm2542_vm0 = vcmask 125952   ;;  %vm2543_vm1 = vsmask.f32 7938  ;;  %p5201_p13 = scmp.ne.s32.totalorder %s5768_s21, 0 }
  0x1a   : > { %s236_s17 = scalar_lea.vmem %s7833_s0, %s5495_s14  ;;  %s6067_s14 = sshll.u32 %s7839_s12, 6  ;;  %vm2339_vm3 = vsmask.f32 256  ;;  %vm6876_vm4 = vmand %vm2542_vm0, %vm2543_vm1 }
  0x1b   : > { %s5909_s26 = scalar_lea.vmem %s236_s17, %s5383_s13  ;;  %s5791_s13 = smov 32  }
  0x1c   : > { %v4974_v0 = vld [vmem:[%s5909_s26 + $0x18] sm:$0xf]  ;;  %v5913_v1 = vld [vmem:[%s5909_s26 + $0x1c] sm:$0xf]  ;;  %v4972_v2 = vld [vmem:[%s5909_s26 + $0xc] sm:$0xf] }
  0x1d   : > { %v697_v3 = vshll.u32 %v5913_v1, 16  ;;  %v701_v4 = vshrl.u32 %v5913_v1, 16  ;;  %v5105_v5 = vcombine.low %v4974_v0, %v5913_v1  ;;  %v688_v6 = vshrl.u32 %v4974_v0, 16  ;;  %v5920_v7 = vld [vmem:[%s5909_s26 + $0x10] sm:$0xf] }
  0x1e   : > { %v691_v8 = vshll.u32 %v4974_v0, 16  ;;  %v673_v9 = vshll.u32 %v5920_v7, 16  ;;  %v677_v10 = vshrl.u32 %v5920_v7, 16  ;;  %v5104_v11 = vcombine.low %v4972_v2, %v5920_v7  ;;  %v5026_v12 = vld [vmem:[%s5909_s26 + $0x24] sm:$0xf] }
  0x1f   : > { %v5926_v13 = vrot.slane %v701_v4, 4  ;;  %1579 = vrot.lane.b32.xlu1 %v5105_v5, %s5786_s27  ;;  %v690_v14 = vrot.slane %v688_v6, 4  ;;  %v664_v15 = vshrl.u32 %v4972_v2, 16  ;;  %v667_v16 = vshll.u32 %v4972_v2, 16  ;;  %v5930_v17 = vld [vmem:[%s5909_s26 + $0x28] sm:$0xf] }
  0x20   : > { %v693_v18 = vrot.slane %v691_v8, 5  ;;  %v5932_v19 = vrot.slane %v677_v10, 4  ;;  %1577 = vrot.lane.b32.xlu0 %v5104_v11, %s5786_s27  ;;  %v1072_v20 = vshrl.u32 %v5026_v12, 16  ;;  %v1075_v21 = vshll.u32 %v5026_v12, 16  ;;  %v5024_v22 = vld [vmem:[%s5909_s26 + $0x18] sm:$0xf] }
  0x21   : > { %v666_v23 = vrot.slane %v664_v15, 4  ;;  %v669_v24 = vrot.slane %v667_v16, 5  ;;  %v1085_v25 = vshrl.u32 %v5930_v17, 16  ;;  %v5135_v26 = vcombine.low %v5026_v12, %v5930_v17  ;;  %v5939_v27 = vld [vmem:[%s5909_s26 + $0x1c] sm:$0xf] }
  0x22   : > { %v694_v28 = vor.u32 %v693_v18, %v690_v14  ;;  %v5941_v29 = vrot.slane %v1072_v20, 4  ;;  %v5943_v30 = vrot.slane %v1075_v21, 5  ;;  %v1048_v31 = vshrl.u32 %v5024_v22, 16  ;;  %v5946_v32 = vld [vmem:[%s5909_s26 + $0x14] sm:$0x1] }
  0x23   : > { %v670_v33 = vor.u32 %v669_v24, %v666_v23  ;;  %1739 = vrot.lane.b32.xlu1 %v5135_v26, %s5787_s30  ;;  %v1051_v34 = vshll.u32 %v5024_v22, 16  ;;  %v1061_v35 = vshrl.u32 %v5939_v27, 16  ;;  %v5134_v36 = vcombine.low %v5024_v22, %v5939_v27  ;;  %v5002_v38 = vld [vmem:[%s5909_s26 + $0xc] sm:$0xe]  ;;  %v244_v39 = vld [vmem:[%s5909_s26 + $0x4] sm:$0xf] }
  0x24   : > { %v5959_v40 = vrot.slane %v694_v28, 4  ;;  %v5961_v41 = vrot.slane %v1048_v31, 4  ;;  %v5012_v42 = vrot.slane %v5002_v38, 9  ;;  %v945_v43 = vrot.slane %v5920_v7, 5  ;;  %v263_v44 = vld [vmem:[%s5909_s26 + $0x8] sm:$0x1] }
  0x25   : > { %v5965_v45 = vrot.slane %v670_v33, 4  ;;  %v5967_v46 = vrot.slane %v1051_v34, 5  ;;  %1737 = vrot.lane.b32.xlu0 %v5134_v36, %s5787_s30  ;;  %v948_v47 = vrot.slane %v5946_v32, 5  ;;  %v516_v48 = vld [vmem:[%s5909_s26] sm:$0xe]  ;;  %v561_v49 = vrot.slane %v244_v39, 5 }
  0x26   : > { %v946_v50 = vsel %vm5953_vm2, %v5012_v42, %v945_v43  ;;  %v947_v51 = vrot.slane %v945_v43, 4  ;;  %v4960_v52 = vrot.slane %v516_v48, 9  ;;  %v564_v53 = vrot.slane %v263_v44, 5  ;;  %v246_v54 = vld [vmem:[%s5909_s26 + $0x10] sm:$0xf] }
  0x27   : > { %v563_v55 = vrot.slane %v561_v49, 4  ;;  %v264_v56 = vld [vmem:[%s5909_s26 + $0x14] sm:$0x1]  ;;  %v517_v57 = vld [vmem:[%s5909_s26 + $0xc] sm:$0xe]  ;;  %v568_v58 = vrot.slane %v246_v54, 5  ;;  %v1078_v59 = vor.u32 %v5943_v30, %v5941_v29  ;;  %v1054_v60 = vor.u32 %v5967_v46, %v5961_v41 }
  0x28   : > { %v949_v61 = vsel %vm5953_vm2, %v947_v51, %v948_v47  ;;  %v562_v62 = vsel %vm5953_vm2, %v4960_v52, %v561_v49  ;;  %v4961_v63 = vrot.slane %v517_v57, 9  ;;  %v571_v0 = vrot.slane %v264_v56, 5  ;;  %v243_v2 = vld [vmem:[%s5909_s26] sm:$0xf]  ;;  %v5003_v10 = vld [vmem:[%s5909_s26 + $0x18] sm:$0xe] }
  0x29   : > { %v5124_v4 = vcombine.low %v946_v50, %v949_v61  ;;  %v565_v5 = vsel %vm5953_vm2, %v563_v55, %v564_v53  ;;  %v570_v6 = vrot.slane %v568_v58, 4  ;;  %v277_v8 = vshrl.u32 %v243_v2, 16  ;;  %v4993_v16 = vld [vmem:[%s5909_s26 + $0x20] sm:$0x1]  ;;  %v245_v23 = vld [vmem:[%s5909_s26 + $0xc] sm:$0xf] }
  0x2a   : > { %v5094_v11 = vcombine.low %v562_v62, %v565_v5  ;;  %v569_v12 = vsel %vm5953_vm2, %v4961_v63, %v568_v58  ;;  %v280_v14 = vshll.u32 %v243_v2, 16  ;;  %v286_v15 = vshll.u32 %v244_v39, 16 }
  0x2b   : > { %1677 = vrot.lane.b32.xlu0 %v5124_v4, %s5788_s8  ;;  %v572_v18 = vsel %vm5953_vm2, %v570_v6, %v571_v0  ;;  %v279_v20 = vrot.slane %v277_v8, 4  ;;  %v290_v21 = vshrl.u32 %v244_v39, 16  ;;  %v296_v22 = vshll.u32 %v263_v44, 16 }
  0x2c   : > { %1517 = vrot.lane.b32.xlu1 %v5094_v11, %s5789_s9  ;;  %v5095_v24 = vcombine.low %v569_v12, %v572_v18  ;;  %v282_v26 = vrot.slane %v280_v14, 5  ;;  %v288_v28 = vrot.slane %v286_v15, 5  ;;  %v5013_v31 = vrot.slane %v5003_v10, 9 }
  0x2d   : > { %v292_v33 = vrot.slane %v290_v21, 4  ;;  %v298_v34 = vrot.slane %v296_v22, 5  ;;  %v952_v36 = vrot.slane %v5913_v1, 5  ;;  %v955_v38 = vrot.slane %v4993_v16, 5  ;;  %v6027_v21 = vld [vmem:[%s5909_s26 + $0x2c] sm:$0x1] }
  0x2e   : > { %v283_v42 = vor.u32 %v282_v26, %v279_v20  ;;  %v301_v43 = vshrl.u32 %v245_v23, 16  ;;  %v304_v47 = vshll.u32 %v245_v23, 16  ;;  %v310_v48 = vshll.u32 %v246_v54, 16  ;;  %v247_v26 = vld [vmem:[%s5909_s26 + $0x18] sm:$0xf] }
  0x2f   : > { %v293_v44 = vor.u32 %v292_v33, %v288_v28  ;;  %v953_v49 = vsel %vm5953_vm2, %v5013_v31, %v952_v36  ;;  %v954_v50 = vrot.slane %v952_v36, 4  ;;  %v314_v51 = vshrl.u32 %v246_v54, 16 }
  0x30   : > { %1519 = vrot.lane.b32.xlu1 %v5095_v24, %s5789_s9  ;;  %v284_v52 = vrot.slane %v283_v42, 4  ;;  %v303_v53 = vrot.slane %v301_v43, 4  ;;  %v306_v55 = vrot.slane %v304_v47, 5  ;;  %v312_v57 = vrot.slane %v310_v48, 5  ;;  %v6070_v48 = vld [vmem:[%s5909_s26 + $0x20] sm:$0x1] }
  0x31   : > { %v294_v58 = vrot.slane %v293_v44, 4  ;;  %v956_v61 = vsel %vm5953_vm2, %v954_v50, %v955_v38  ;;  %v316_v62 = vrot.slane %v314_v51, 4  ;;  %v320_v63 = vshll.u32 %v264_v56, 16  ;;  %v6059_v38 = vld [vmem:[%s5909_s26 + $0x1c] sm:$0xf] }
  0x32   : > { %v289_v0 = vsel %vm6000_vm5, %v284_v52, %v288_v28  ;;  %v5125_v2 = vcombine.low %v953_v49, %v956_v61  ;;  %v307_v4 = vor.u32 %v306_v55, %v303_v53  ;;  %v699_v54 = vrot.slane %v697_v3, 5  ;;  %v5054_v53 = vld [vmem:[%s5909_s26 + $0x18] sm:$0xe] }
  0x33   : > { %v299_v5 = vsel %vm6000_vm5, %v294_v58, %v298_v34  ;;  %v317_v6 = vor.u32 %v316_v62, %v312_v57  ;;  %v322_v8 = vrot.slane %v320_v63, 5  ;;  %v707_v10 = vshll.u32 %v4993_v16, 16  ;;  %v249_v62 = vld [vmem:[%s5909_s26 + $0x24] sm:$0xf] }
  0x34   : > { %v5084_v11 = vcombine.low %v289_v0, %v299_v5  ;;  %1679 = vrot.lane.b32.xlu1 %v5125_v2, %s5788_s8  ;;  %v308_v12 = vrot.slane %v307_v4, 4  ;;  %v700_v56 = vsel %vm6000_vm5, %v5959_v40, %v699_v54  ;;  %v704_v14 = vor.u32 %v5926_v13, %v699_v54 }
  0x35   : > { %v318_v15 = vrot.slane %v317_v6, 4  ;;  %v709_v1 = vrot.slane %v707_v10, 5  ;;  %v675_v3 = vrot.slane %v673_v9, 5  ;;  %v683_v18 = vshll.u32 %v5946_v32, 16 }
  0x36   : > { %1467 = vrot.lane.b32.xlu0 %v5084_v11, %s5790_s10  ;;  %v313_v16 = vsel %vm6000_vm5, %v308_v12, %v312_v57  ;;  %v705_v20 = vrot.slane %v704_v14, 4  ;;  %v1079_v13 = vrot.slane %v1078_v59, 4  ;;  %v1081_v7 = vshll.u32 %v5930_v17, 16  ;;  %v6044_v59 = vld [vmem:[%s5909_s26 + $0x20] sm:$0x1] }
  0x37   : > { %v323_v9 = vsel %vm6000_vm5, %v318_v15, %v322_v8  ;;  %v676_v32 = vsel %vm6000_vm5, %v5965_v45, %v675_v3  ;;  %v680_v40 = vor.u32 %v5932_v19, %v675_v3  ;;  %v685_v22 = vrot.slane %v683_v18, 5 }
  0x38   : > { %v5085_v23 = vcombine.low %v313_v16, %v323_v9  ;;  %v710_v24 = vsel %vm6000_vm5, %v705_v20, %v709_v1  ;;  %v1083_v29 = vrot.slane %v1081_v7, 5  ;;  %v1087_v30 = vrot.slane %v1085_v25, 4  ;;  %v5055_v9 = vld [vmem:[%s5909_s26 + $0x24] sm:$0xe] }
  0x39   : > { %v5115_v28 = vcombine.low %v700_v56, %v710_v24  ;;  %v681_v31 = vrot.slane %v680_v40, 4  ;;  %v1091_v45 = vshll.u32 %v6027_v21, 16  ;;  %v1055_v19 = vrot.slane %v1054_v60, 4  ;;  %v250_v56 = vld [vmem:[%s5909_s26 + $0x28] sm:$0xf] }
  0x3a   : > { %1469 = vrot.lane.b32.xlu0 %v5085_v23, %s5790_s10  ;;  %v1084_v33 = vsel %vm6000_vm5, %v1079_v13, %v1083_v29  ;;  %v1088_v25 = vor.u32 %v1087_v30, %v1083_v29  ;;  %v1057_v34 = vshll.u32 %v5939_v27, 16  ;;  %v1063_v36 = vrot.slane %v1061_v35, 4 }
  0x3b   : > { %1629 = vrot.lane.b32.xlu1 %v5115_v28, %s5791_s13  ;;  %v686_v41 = vsel %vm6000_vm5, %v681_v31, %v685_v22  ;;  %v1093_v46 = vrot.slane %v1091_v45, 5  ;;  %v1067_v60 = vshll.u32 %v6044_v59, 16  ;;  %v325_v42 = vshrl.u32 %v247_v26, 16 }
  0x3c   : > { %v5114_v43 = vcombine.low %v676_v32, %v686_v41  ;;  %v1089_v47 = vrot.slane %v1088_v25, 4  ;;  %v1059_v35 = vrot.slane %v1057_v34, 5  ;;  %v328_v44 = vshll.u32 %v247_v26, 16  ;;  %v519_v26 = vld [vmem:[%s5909_s26 + $0x24] sm:$0xe] }
  0x3d   : > { %v1069_v49 = vrot.slane %v1067_v60, 5  ;;  %v327_v50 = vrot.slane %v325_v42, 4  ;;  %v334_v51 = vshll.u32 %v6059_v38, 16  ;;  %v338_v52 = vshrl.u32 %v6059_v38, 16 }
  0x3e   : > { %1627 = vrot.lane.b32.xlu0 %v5114_v43, %s5791_s13  ;;  %v1094_v55 = vsel %vm6000_vm5, %v1089_v47, %v1093_v46  ;;  %v1060_v57 = vsel %vm6000_vm5, %v1055_v19, %v1059_v35  ;;  %v1064_v58 = vor.u32 %v1063_v36, %v1059_v35  ;;  %v330_v61 = vrot.slane %v328_v44, 5  ;;  %v6105_v47 = vld [vmem:[%s5909_s26 + $0x30] sm:$0xf] }
  0x3f   : > { %v5145_v63 = vcombine.low %v1084_v33, %v1094_v55  ;;  %v336_v0 = vrot.slane %v334_v51, 5  ;;  %v340_v2 = vrot.slane %v338_v52, 4  ;;  %v344_v4 = vshll.u32 %v6070_v48, 16  ;;  %v518_v33 = vld [vmem:[%s5909_s26 + $0x18] sm:$0xe] }
  0x40   : > { %v1065_v54 = vrot.slane %v1064_v58, 4  ;;  %v331_v5 = vor.u32 %v330_v61, %v327_v50  ;;  %v5064_v6 = vrot.slane %v5054_v53, 9  ;;  %v1329_v8 = vrot.slane %v5939_v27, 5  ;;  %v266_v27 = vld [vmem:[%s5909_s26 + $0x2c] sm:$0x1] }
  0x41   : > { %1789 = vrot.lane.b32.xlu1 %v5145_v63, %s5792_s15  ;;  %v341_v10 = vor.u32 %v340_v2, %v336_v0  ;;  %v346_v11 = vrot.slane %v344_v4, 5  ;;  %v1332_v12 = vrot.slane %v6044_v59, 5  ;;  %v349_v14 = vshrl.u32 %v249_v62, 16  ;;  %v4979_v58 = vld [vmem:[%s5909_s26 + $0x34] sm:$0xf] }
  0x42   : > { %v1070_v15 = vsel %vm6000_vm5, %v1065_v54, %v1069_v49  ;;  %v332_v1 = vrot.slane %v331_v5, 4  ;;  %v1330_v3 = vsel %vm5953_vm2, %v5064_v6, %v1329_v8  ;;  %v1331_v18 = vrot.slane %v1329_v8, 4  ;;  %v6128_v4 = vld [vmem:[%s5909_s26 + $0x28] sm:$0xf] }
  0x43   : > { %v5144_v16 = vcombine.low %v1060_v57, %v1070_v15  ;;  %v342_v20 = vrot.slane %v341_v10, 4  ;;  %v351_v13 = vrot.slane %v349_v14, 4  ;;  %v352_v7 = vshll.u32 %v249_v62, 16  ;;  %v4976_v62 = vld [vmem:[%s5909_s26 + $0x24] sm:$0xf] }
  0x44   : > { %v337_v32 = vsel %vm6000_vm5, %v332_v1, %v336_v0  ;;  %v1333_v40 = vsel %vm5953_vm2, %v1331_v18, %v1332_v12  ;;  %v358_v22 = vshll.u32 %v250_v56, 16  ;;  %v362_v23 = vshrl.u32 %v250_v56, 16  ;;  %v6140_v18 = vld [vmem:[%s5909_s26 + $0x2c] sm:$0x1] }
  0x45   : > { %1787 = vrot.lane.b32.xlu0 %v5144_v16, %s5792_s15  ;;  %v347_v24 = vsel %vm6000_vm5, %v342_v20, %v346_v11  ;;  %v5154_v29 = vcombine.low %v1330_v3, %v1333_v40  ;;  %v354_v30 = vrot.slane %v352_v7, 5  ;;  %v368_v59 = vshll.u32 %v266_v27, 16  ;;  %v5005_v7 = vld [vmem:[%s5909_s26 + $0x30] sm:$0xe] }
  0x46   : > { %v5086_v28 = vcombine.low %v337_v32, %v347_v24  ;;  %v360_v31 = vrot.slane %v358_v22, 5  ;;  %v364_v45 = vrot.slane %v362_v23, 4  ;;  %v5065_v19 = vrot.slane %v5055_v9, 9 }
  0x47   : > { %v355_v25 = vor.u32 %v354_v30, %v351_v13  ;;  %v370_v34 = vrot.slane %v368_v59, 5  ;;  %v1336_v36 = vrot.slane %v5930_v17, 5  ;;  %v1339_v41 = vrot.slane %v6027_v21, 5  ;;  %v5004_v59 = vld [vmem:[%s5909_s26 + $0x24] sm:$0xe] }
  0x48   : > { %1471 = vrot.lane.b32.xlu1 %v5086_v28, %s5790_s10  ;;  %v365_v46 = vor.u32 %v364_v45, %v360_v31  ;;  %v4963_v60 = vrot.slane %v519_v26, 9  ;;  %v582_v42 = vrot.slane %v250_v56, 5  ;;  %v585_v43 = vrot.slane %v266_v27, 5  ;;  %v4995_v56 = vld [vmem:[%s5909_s26 + $0x38] sm:$0x1] }
  0x49   : > { %1837 = vrot.lane.b32.xlu0 %v5154_v29, %s5793_s16  ;;  %v356_v35 = vrot.slane %v355_v25, 4  ;;  %v1337_v44 = vsel %vm5953_vm2, %v5065_v19, %v1336_v36  ;;  %v1338_v17 = vrot.slane %v1336_v36, 4  ;;  %v4962_v21 = vrot.slane %v518_v33, 9 }
  0x4a   : > { %v366_v49 = vrot.slane %v365_v46, 4  ;;  %v583_v50 = vsel %vm5953_vm2, %v4963_v60, %v582_v42  ;;  %v584_v51 = vrot.slane %v582_v42, 4  ;;  %v575_v52 = vrot.slane %v6059_v38, 5  ;;  %v6149_v42 = vld [vmem:[%s5909_s26 + $0x3c] sm:$0xf] }
  0x4b   : > { %v361_v53 = vsel %vm6000_vm5, %v356_v35, %v360_v31  ;;  %v1340_v55 = vsel %vm5953_vm2, %v1338_v17, %v1339_v41  ;;  %v578_v57 = vrot.slane %v6070_v48, 5  ;;  %v736_v61 = vshrl.u32 %v6105_v47, 16 }
  0x4c   : > { %v371_v63 = vsel %vm6000_vm5, %v366_v49, %v370_v34  ;;  %v5155_v0 = vcombine.low %v1337_v44, %v1340_v55  ;;  %v586_v38 = vsel %vm5953_vm2, %v584_v51, %v585_v43  ;;  %v576_v2 = vsel %vm5953_vm2, %v4962_v21, %v575_v52 }
  0x4d   : > { %v5087_v54 = vcombine.low %v361_v53, %v371_v63  ;;  %v5097_v48 = vcombine.low %v583_v50, %v586_v38  ;;  %v577_v5 = vrot.slane %v575_v52, 4  ;;  %v738_v6 = vrot.slane %v736_v61, 4  ;;  %v6166_v53 = vld [vmem:[%s5909_s26 + $0x40] sm:$0xf]  ;;  %v6176_v38 = vld [vmem:[%s5909_s26 + $0x34] sm:$0xf] }
  0x4e   : > { %1839 = vrot.lane.b32.xlu0 %v5155_v0, %s5793_s16  ;;  %v739_v8 = vshll.u32 %v6105_v47, 16  ;;  %v749_v10 = vshrl.u32 %v4979_v58, 16  ;;  %v5107_v11 = vcombine.low %v6105_v47, %v4979_v58  ;;  %v712_v12 = vshrl.u32 %v4976_v62, 16 }
  0x4f   : > { %1473 = vrot.lane.b32.xlu1 %v5087_v54, %s5790_s10  ;;  %v579_v14 = vsel %vm5953_vm2, %v577_v5, %v578_v57  ;;  %v715_v15 = vshll.u32 %v4976_v62, 16  ;;  %v725_v1 = vshrl.u32 %v6128_v4, 16  ;;  %v5106_v3 = vcombine.low %v4976_v62, %v6128_v4 }
  0x50   : > { %v5096_v27 = vcombine.low %v576_v2, %v579_v14  ;;  %v741_v16 = vrot.slane %v739_v8, 5  ;;  %v714_v20 = vrot.slane %v712_v12, 4  ;;  %v745_v13 = vshll.u32 %v4979_v58, 16 }
  0x51   : > { %v717_v9 = vrot.slane %v715_v15, 5  ;;  %v751_v32 = vrot.slane %v749_v10, 4  ;;  %v755_v40 = vshll.u32 %v4995_v56, 16  ;;  %v721_v22 = vshll.u32 %v6128_v4, 16 }
  0x52   : > { %1521 = vrot.lane.b32.xlu0 %v5096_v27, %s5789_s9  ;;  %v742_v23 = vor.u32 %v741_v16, %v738_v6  ;;  %v747_v24 = vrot.slane %v745_v13, 5  ;;  %v727_v29 = vrot.slane %v725_v1, 4  ;;  %v731_v30 = vshll.u32 %v6140_v18, 16  ;;  %v6191_v1 = vld [vmem:[%s5909_s26 + $0x38] sm:$0x1] }
  0x53   : > { %1523 = vrot.lane.b32.xlu1 %v5097_v48, %s5789_s9  ;;  %v757_v26 = vrot.slane %v755_v40, 5  ;;  %v718_v28 = vor.u32 %v717_v9, %v714_v20  ;;  %v723_v31 = vrot.slane %v721_v22, 5  ;;  %v5015_v45 = vrot.slane %v5005_v7, 9  ;;  %v251_v20 = vld [vmem:[%s5909_s26 + $0x30] sm:$0xf] }
  0x54   : > { %v743_v19 = vrot.slane %v742_v23, 4  ;;  %v752_v33 = vor.u32 %v751_v32, %v747_v24  ;;  %v733_v25 = vrot.slane %v731_v30, 5  ;;  %v966_v34 = vrot.slane %v4979_v58, 5  ;;  %v5028_v58 = vld [vmem:[%s5909_s26 + $0x30] sm:$0xf] }
  0x55   : > { %v719_v36 = vrot.slane %v718_v28, 4  ;;  %v728_v41 = vor.u32 %v727_v29, %v723_v31  ;;  %v969_v46 = vrot.slane %v4995_v56, 5  ;;  %v5014_v60 = vrot.slane %v5004_v59, 9  ;;  %v6200_v29 = vld [vmem:[%s5909_s26 + $0x34] sm:$0xf] }
  0x56   : > { %1581 = vrot.lane.b32.xlu0 %v5106_v3, %s5786_s27  ;;  %v748_v43 = vsel %vm6000_vm5, %v743_v19, %v747_v24  ;;  %v753_v47 = vrot.slane %v752_v33, 4  ;;  %v967_v35 = vsel %vm5953_vm2, %v5015_v45, %v966_v34  ;;  %v968_v44 = vrot.slane %v966_v34, 4  ;;  %v5056_v34 = vld [vmem:[%s5909_s26 + $0x30] sm:$0xe] }
  0x57   : > { %1583 = vrot.lane.b32.xlu1 %v5107_v11, %s5786_s27  ;;  %v724_v17 = vsel %vm6000_vm5, %v719_v36, %v723_v31  ;;  %v729_v21 = vrot.slane %v728_v41, 4  ;;  %v959_v49 = vrot.slane %v6128_v4, 5  ;;  %v962_v50 = vrot.slane %v6140_v18, 5  ;;  %v6183_v11 = vld [vmem:[%s5909_s26 + $0x44] sm:$0x1] }
  0x58   : > { %v758_v51 = vsel %vm6000_vm5, %v753_v47, %v757_v26  ;;  %v970_v52 = vsel %vm5953_vm2, %v968_v44, %v969_v46  ;;  %v1120_v55 = vshrl.u32 %v6149_v42, 16  ;;  %v1123_v57 = vshll.u32 %v6149_v42, 16  ;;  %v6204_v26 = vld [vmem:[%s5909_s26 + $0x38] sm:$0x1] }
  0x59   : > { %v5117_v61 = vcombine.low %v748_v43, %v758_v51  ;;  %v734_v62 = vsel %vm6000_vm5, %v729_v21, %v733_v25  ;;  %v5127_v63 = vcombine.low %v967_v35, %v970_v52  ;;  %v960_v0 = vsel %vm5953_vm2, %v5014_v60, %v959_v49 }
  0x5a   : > { %v5116_v2 = vcombine.low %v724_v17, %v734_v62  ;;  %v961_v4 = vrot.slane %v959_v49, 4  ;;  %v1122_v54 = vrot.slane %v1120_v55, 4  ;;  %v1125_v48 = vrot.slane %v1123_v57, 5 }
  0x5b   : > { %1633 = vrot.lane.b32.xlu1 %v5117_v61, %s5791_s13  ;;  %v1133_v5 = vshrl.u32 %v6166_v53, 16  ;;  %v5137_v6 = vcombine.low %v6149_v42, %v6166_v53  ;;  %v1096_v8 = vshrl.u32 %v5028_v58, 16  ;;  %v1099_v10 = vshll.u32 %v5028_v58, 16 }
  0x5c   : > { %1631 = vrot.lane.b32.xlu0 %v5116_v2, %s5791_s13  ;;  %v963_v12 = vsel %vm5953_vm2, %v961_v4, %v962_v50  ;;  %v1109_v56 = vshrl.u32 %v6176_v38, 16  ;;  %v5136_v14 = vcombine.low %v5028_v58, %v6176_v38  ;;  %v1126_v15 = vor.u32 %v1125_v48, %v1122_v54  ;;  %v253_v50 = vld [vmem:[%s5909_s26 + $0x3c] sm:$0xf]  ;;  %v254_v58 = vld [vmem:[%s5909_s26 + $0x40] sm:$0xf] }
  0x5d   : > { %v5126_v3 = vcombine.low %v960_v0, %v963_v12  ;;  %v1098_v18 = vrot.slane %v1096_v8, 4  ;;  %v1101_v27 = vrot.slane %v1099_v10, 5  ;;  %v1129_v16 = vshll.u32 %v6166_v53, 16  ;;  %v268_v2 = vld [vmem:[%s5909_s26 + $0x44] sm:$0x1] }
  0x5e   : > { %v1127_v13 = vrot.slane %v1126_v15, 4  ;;  %v1135_v7 = vrot.slane %v1133_v5, 4  ;;  %v1139_v9 = vshll.u32 %v6183_v11, 16  ;;  %v1105_v32 = vshll.u32 %v6176_v38, 16  ;;  %v5057_v12 = vld [vmem:[%s5909_s26 + $0x3c] sm:$0xe] }
  0x5f   : > { %1683 = vrot.lane.b32.xlu1 %v5127_v63, %s5788_s8  ;;  %v1131_v40 = vrot.slane %v1129_v16, 5  ;;  %v1102_v22 = vor.u32 %v1101_v27, %v1098_v18  ;;  %v1111_v23 = vrot.slane %v1109_v56, 4  ;;  %v1115_v24 = vshll.u32 %v6191_v1, 16 }
  0x60   : > { %1681 = vrot.lane.b32.xlu0 %v5126_v3, %s5788_s8  ;;  %v1141_v30 = vrot.slane %v1139_v9, 5  ;;  %v1107_v59 = vrot.slane %v1105_v32, 5  ;;  %v373_v28 = vshrl.u32 %v251_v20, 16  ;;  %v376_v31 = vshll.u32 %v251_v20, 16  ;;  %v521_v20 = vld [vmem:[%s5909_s26 + $0x3c] sm:$0xe] }
  0x61   : > { %v1132_v45 = vsel %vm6000_vm5, %v1127_v13, %v1131_v40  ;;  %v1136_v19 = vor.u32 %v1135_v7, %v1131_v40  ;;  %v1103_v33 = vrot.slane %v1102_v22, 4  ;;  %v1117_v25 = vrot.slane %v1115_v24, 5  ;;  %v520_v40 = vld [vmem:[%s5909_s26 + $0x30] sm:$0xe] }
  0x62   : > { %v1112_v36 = vor.u32 %v1111_v23, %v1107_v59  ;;  %v375_v41 = vrot.slane %v373_v28, 4  ;;  %v378_v46 = vrot.slane %v376_v31, 5  ;;  %v382_v60 = vshll.u32 %v6200_v29, 16 }
  0x63   : > { %1743 = vrot.lane.b32.xlu1 %v5137_v6, %s5787_s30  ;;  %v1137_v42 = vrot.slane %v1136_v19, 4  ;;  %v1108_v43 = vsel %vm6000_vm5, %v1103_v33, %v1107_v59  ;;  %v386_v47 = vshrl.u32 %v6200_v29, 16  ;;  %v392_v35 = vshll.u32 %v6204_v26, 16  ;;  %v6242_v19 = vld [vmem:[%s5909_s26 + $0x48] sm:$0xf] }
  0x64   : > { %1741 = vrot.lane.b32.xlu0 %v5136_v14, %s5787_s30  ;;  %v1113_v44 = vrot.slane %v1112_v36, 4  ;;  %v379_v17 = vor.u32 %v378_v46, %v375_v41  ;;  %v384_v21 = vrot.slane %v382_v60, 5  ;;  %v5066_v49 = vrot.slane %v5056_v34, 9 }
  0x65   : > { %v1142_v51 = vsel %vm6000_vm5, %v1137_v42, %v1141_v30  ;;  %v388_v52 = vrot.slane %v386_v47, 4  ;;  %v394_v55 = vrot.slane %v392_v35, 5  ;;  %v1343_v57 = vrot.slane %v6176_v38, 5  ;;  %v4983_v47 = vld [vmem:[%s5909_s26 + $0x4c] sm:$0xf] }
  0x66   : > { %v5147_v61 = vcombine.low %v1132_v45, %v1142_v51  ;;  %v1118_v62 = vsel %vm6000_vm5, %v1113_v44, %v1117_v25  ;;  %v380_v63 = vrot.slane %v379_v17, 4  ;;  %v1346_v0 = vrot.slane %v6191_v1, 5  ;;  %v4980_v44 = vld [vmem:[%s5909_s26 + $0x3c] sm:$0xf] }
  0x67   : > { %v5146_v4 = vcombine.low %v1108_v43, %v1118_v62  ;;  %v389_v54 = vor.u32 %v388_v52, %v384_v21  ;;  %v1344_v48 = vsel %vm5953_vm2, %v5066_v49, %v1343_v57  ;;  %v1345_v5 = vrot.slane %v1343_v57, 4 }
  0x68   : > { %1793 = vrot.lane.b32.xlu1 %v5147_v61, %s5792_s15  ;;  %v385_v38 = vsel %vm6000_vm5, %v380_v63, %v384_v21  ;;  %v397_v6 = vshrl.u32 %v253_v50, 16  ;;  %v400_v8 = vshll.u32 %v253_v50, 16  ;;  %v406_v10 = vshll.u32 %v254_v58, 16  ;;  %v6265_v50 = vld [vmem:[%s5909_s26 + $0x40] sm:$0xf] }
  0x69   : > { %1791 = vrot.lane.b32.xlu0 %v5146_v4, %s5792_s15  ;;  %v390_v56 = vrot.slane %v389_v54, 4  ;;  %v1347_v14 = vsel %vm5953_vm2, %v1345_v5, %v1346_v0  ;;  %v410_v15 = vshrl.u32 %v254_v58, 16  ;;  %v416_v1 = vshll.u32 %v268_v2, 16  ;;  %v4997_v63 = vld [vmem:[%s5909_s26 + $0x50] sm:$0x1] }
  0x6a   : > { %v5156_v3 = vcombine.low %v1344_v48, %v1347_v14  ;;  %v399_v18 = vrot.slane %v397_v6, 4  ;;  %v402_v27 = vrot.slane %v400_v8, 5  ;;  %v408_v16 = vrot.slane %v406_v10, 5  ;;  %v6277_v48 = vld [vmem:[%s5909_s26 + $0x44] sm:$0x1] }
  0x6b   : > { %v395_v13 = vsel %vm6000_vm5, %v390_v56, %v394_v55  ;;  %v412_v7 = vrot.slane %v410_v15, 4  ;;  %v418_v9 = vrot.slane %v416_v1, 5  ;;  %v5067_v32 = vrot.slane %v5057_v12, 9  ;;  %v5007_v10 = vld [vmem:[%s5909_s26 + $0x48] sm:$0xe] }
  0x6c   : > { %v5088_v22 = vcombine.low %v385_v38, %v395_v13  ;;  %v403_v23 = vor.u32 %v402_v27, %v399_v18  ;;  %v1350_v24 = vrot.slane %v6166_v53, 5  ;;  %v1353_v30 = vrot.slane %v6183_v11, 5 }
  0x6d   : > { %1841 = vrot.lane.b32.xlu0 %v5156_v3, %s5793_s16  ;;  %v413_v59 = vor.u32 %v412_v7, %v408_v16  ;;  %v4965_v28 = vrot.slane %v521_v20, 9  ;;  %v596_v31 = vrot.slane %v254_v58, 5  ;;  %v599_v45 = vrot.slane %v268_v2, 5 }
  0x6e   : > { %1475 = vrot.lane.b32.xlu1 %v5088_v22, %s5790_s10  ;;  %v404_v33 = vrot.slane %v403_v23, 4  ;;  %v1351_v25 = vsel %vm5953_vm2, %v5067_v32, %v1350_v24  ;;  %v1352_v34 = vrot.slane %v1350_v24, 4  ;;  %v4964_v53 = vrot.slane %v520_v40, 9 }
  0x6f   : > { %v414_v11 = vrot.slane %v413_v59, 4  ;;  %v597_v36 = vsel %vm5953_vm2, %v4965_v28, %v596_v31  ;;  %v598_v41 = vrot.slane %v596_v31, 4  ;;  %v589_v46 = vrot.slane %v6200_v29, 5  ;;  %v6286_v31 = vld [vmem:[%s5909_s26 + $0x54] sm:$0xf] }
  0x70   : > { %v409_v60 = vsel %vm6000_vm5, %v404_v33, %v408_v16  ;;  %v1354_v42 = vsel %vm5953_vm2, %v1352_v34, %v1353_v30  ;;  %v592_v43 = vrot.slane %v6204_v26, 5  ;;  %v784_v35 = vshrl.u32 %v6242_v19, 16  ;;  %v5006_v16 = vld [vmem:[%s5909_s26 + $0x3c] sm:$0xe] }
  0x71   : > { %v419_v17 = vsel %vm6000_vm5, %v414_v11, %v418_v9  ;;  %v5157_v21 = vcombine.low %v1351_v25, %v1354_v42  ;;  %v600_v29 = vsel %vm5953_vm2, %v598_v41, %v599_v45  ;;  %v590_v49 = vsel %vm5953_vm2, %v4964_v53, %v589_v46 }
  0x72   : > { %v5089_v51 = vcombine.low %v409_v60, %v419_v17  ;;  %v5099_v26 = vcombine.low %v597_v36, %v600_v29  ;;  %v591_v52 = vrot.slane %v589_v46, 4  ;;  %v786_v55 = vrot.slane %v784_v35, 4  ;;  %v6303_v60 = vld [vmem:[%s5909_s26 + $0x58] sm:$0xf]  ;;  %v6313_v29 = vld [vmem:[%s5909_s26 + $0x4c] sm:$0xf] }
  0x73   : > { %1843 = vrot.lane.b32.xlu0 %v5157_v21, %s5793_s16  ;;  %v787_v57 = vshll.u32 %v6242_v19, 16  ;;  %v797_v58 = vshrl.u32 %v4983_v47, 16  ;;  %v5109_v61 = vcombine.low %v6242_v19, %v4983_v47  ;;  %v760_v62 = vshrl.u32 %v4980_v44, 16 }
  0x74   : > { %1477 = vrot.lane.b32.xlu1 %v5089_v51, %s5790_s10  ;;  %v593_v0 = vsel %vm5953_vm2, %v591_v52, %v592_v43  ;;  %v763_v2 = vshll.u32 %v4980_v44, 16  ;;  %v773_v4 = vshrl.u32 %v6265_v50, 16  ;;  %v5108_v54 = vcombine.low %v4980_v44, %v6265_v50 }
  0x75   : > { %v5098_v5 = vcombine.low %v590_v49, %v593_v0  ;;  %v789_v38 = vrot.slane %v787_v57, 5  ;;  %v762_v6 = vrot.slane %v760_v62, 4  ;;  %v793_v8 = vshll.u32 %v4983_v47, 16 }
  0x76   : > { %v765_v12 = vrot.slane %v763_v2, 5  ;;  %v799_v56 = vrot.slane %v797_v58, 4  ;;  %v803_v14 = vshll.u32 %v4997_v63, 16  ;;  %v769_v15 = vshll.u32 %v6265_v50, 16 }
  0x77   : > { %1525 = vrot.lane.b32.xlu0 %v5098_v5, %s5789_s9  ;;  %v790_v1 = vor.u32 %v789_v38, %v786_v55  ;;  %v795_v3 = vrot.slane %v793_v8, 5  ;;  %v775_v18 = vrot.slane %v773_v4, 4  ;;  %v779_v27 = vshll.u32 %v6277_v48, 16  ;;  %v6328_v4 = vld [vmem:[%s5909_s26 + $0x50] sm:$0x1] }
  0x78   : > { %1527 = vrot.lane.b32.xlu1 %v5099_v26, %s5789_s9  ;;  %v805_v20 = vrot.slane %v803_v14, 5  ;;  %v766_v13 = vor.u32 %v765_v12, %v762_v6  ;;  %v771_v7 = vrot.slane %v769_v15, 5  ;;  %v5017_v9 = vrot.slane %v5007_v10, 9  ;;  %v255_v6 = vld [vmem:[%s5909_s26 + $0x48] sm:$0xf] }
  0x79   : > { %v791_v32 = vrot.slane %v790_v1, 4  ;;  %v800_v40 = vor.u32 %v799_v56, %v795_v3  ;;  %v781_v22 = vrot.slane %v779_v27, 5  ;;  %v980_v23 = vrot.slane %v4983_v47, 5  ;;  %v5032_v47 = vld [vmem:[%s5909_s26 + $0x48] sm:$0xf] }
  0x7a   : > { %v767_v24 = vrot.slane %v766_v13, 4  ;;  %v776_v30 = vor.u32 %v775_v18, %v771_v7  ;;  %v983_v59 = vrot.slane %v4997_v63, 5  ;;  %v5016_v28 = vrot.slane %v5006_v16, 9  ;;  %v6337_v18 = vld [vmem:[%s5909_s26 + $0x4c] sm:$0xf] }
  0x7b   : > { %1585 = vrot.lane.b32.xlu0 %v5108_v54, %s5786_s27  ;;  %v796_v45 = vsel %vm6000_vm5, %v791_v32, %v795_v3  ;;  %v801_v19 = vrot.slane %v800_v40, 4  ;;  %v981_v33 = vsel %vm5953_vm2, %v5017_v9, %v980_v23  ;;  %v982_v25 = vrot.slane %v980_v23, 4  ;;  %v5058_v23 = vld [vmem:[%s5909_s26 + $0x48] sm:$0xe] }
  0x7c   : > { %1587 = vrot.lane.b32.xlu1 %v5109_v61, %s5786_s27  ;;  %v772_v34 = vsel %vm6000_vm5, %v767_v24, %v771_v7  ;;  %v777_v53 = vrot.slane %v776_v30, 4  ;;  %v973_v11 = vrot.slane %v6265_v50, 5  ;;  %v976_v36 = vrot.slane %v6277_v48, 5  ;;  %v6320_v61 = vld [vmem:[%s5909_s26 + $0x5c] sm:$0x1] }
  0x7d   : > { %v806_v41 = vsel %vm6000_vm5, %v801_v19, %v805_v20  ;;  %v984_v46 = vsel %vm5953_vm2, %v982_v25, %v983_v59  ;;  %v1168_v42 = vshrl.u32 %v6286_v31, 16  ;;  %v1171_v43 = vshll.u32 %v6286_v31, 16  ;;  %v6341_v20 = vld [vmem:[%s5909_s26 + $0x50] sm:$0x1] }
  0x7e   : > { %v5119_v35 = vcombine.low %v796_v45, %v806_v41  ;;  %v782_v44 = vsel %vm6000_vm5, %v777_v53, %v781_v22  ;;  %v5129_v17 = vcombine.low %v981_v33, %v984_v46  ;;  %v974_v21 = vsel %vm5953_vm2, %v5016_v28, %v973_v11 }
  0x7f   : > { %v5118_v49 = vcombine.low %v772_v34, %v782_v44  ;;  %v975_v50 = vrot.slane %v973_v11, 4  ;;  %v1170_v51 = vrot.slane %v1168_v42, 4  ;;  %v1173_v26 = vrot.slane %v1171_v43, 5 }
  0x80   : > { %1637 = vrot.lane.b32.xlu1 %v5119_v35, %s5791_s13  ;;  %v1181_v52 = vshrl.u32 %v6303_v60, 16  ;;  %v5139_v55 = vcombine.low %v6286_v31, %v6303_v60  ;;  %v1144_v57 = vshrl.u32 %v5032_v47, 16  ;;  %v1147_v58 = vshll.u32 %v5032_v47, 16 }
  0x81   : > { %1635 = vrot.lane.b32.xlu0 %v5118_v49, %s5791_s13  ;;  %v977_v62 = vsel %vm5953_vm2, %v975_v50, %v976_v36  ;;  %v1157_v63 = vshrl.u32 %v6313_v29, 16  ;;  %v5138_v0 = vcombine.low %v5032_v47, %v6313_v29  ;;  %v1174_v2 = vor.u32 %v1173_v26, %v1170_v51  ;;  %v257_v36 = vld [vmem:[%s5909_s26 + $0x54] sm:$0xf]  ;;  %v258_v47 = vld [vmem:[%s5909_s26 + $0x58] sm:$0xf] }
  0x82   : > { %v5128_v54 = vcombine.low %v974_v21, %v977_v62  ;;  %v1146_v48 = vrot.slane %v1144_v57, 4  ;;  %v1149_v5 = vrot.slane %v1147_v58, 5  ;;  %v1177_v38 = vshll.u32 %v6303_v60, 16  ;;  %v270_v49 = vld [vmem:[%s5909_s26 + $0x5c] sm:$0x1] }
  0x83   : > { %v1175_v8 = vrot.slane %v1174_v2, 4  ;;  %v1183_v10 = vrot.slane %v1181_v52, 4  ;;  %v1187_v12 = vshll.u32 %v6320_v61, 16  ;;  %v1153_v56 = vshll.u32 %v6313_v29, 16  ;;  %v5059_v62 = vld [vmem:[%s5909_s26 + $0x54] sm:$0xe] }
  0x84   : > { %1687 = vrot.lane.b32.xlu1 %v5129_v17, %s5788_s8  ;;  %v1179_v14 = vrot.slane %v1177_v38, 5  ;;  %v1150_v15 = vor.u32 %v1149_v5, %v1146_v48  ;;  %v1159_v1 = vrot.slane %v1157_v63, 4  ;;  %v1163_v3 = vshll.u32 %v6328_v4, 16 }
  0x85   : > { %1685 = vrot.lane.b32.xlu0 %v5128_v54, %s5788_s8  ;;  %v1189_v27 = vrot.slane %v1187_v12, 5  ;;  %v1155_v16 = vrot.slane %v1153_v56, 5  ;;  %v421_v13 = vshrl.u32 %v255_v6, 16  ;;  %v424_v7 = vshll.u32 %v255_v6, 16  ;;  %v523_v6 = vld [vmem:[%s5909_s26 + $0x54] sm:$0xe] }
  0x86   : > { %v1180_v9 = vsel %vm6000_vm5, %v1175_v8, %v1179_v14  ;;  %v1184_v32 = vor.u32 %v1183_v10, %v1179_v14  ;;  %v1151_v40 = vrot.slane %v1150_v15, 4  ;;  %v1165_v22 = vrot.slane %v1163_v3, 5  ;;  %v522_v14 = vld [vmem:[%s5909_s26 + $0x48] sm:$0xe] }
  0x87   : > { %v1160_v24 = vor.u32 %v1159_v1, %v1155_v16  ;;  %v423_v30 = vrot.slane %v421_v13, 4  ;;  %v426_v59 = vrot.slane %v424_v7, 5  ;;  %v430_v28 = vshll.u32 %v6337_v18, 16 }
  0x88   : > { %1747 = vrot.lane.b32.xlu1 %v5139_v55, %s5787_s30  ;;  %v1185_v31 = vrot.slane %v1184_v32, 4  ;;  %v1156_v45 = vsel %vm6000_vm5, %v1151_v40, %v1155_v16  ;;  %v434_v19 = vshrl.u32 %v6337_v18, 16  ;;  %v440_v33 = vshll.u32 %v6341_v20, 16  ;;  %v6379_v32 = vld [vmem:[%s5909_s26 + $0x60] sm:$0xf] }
  0x89   : > { %1745 = vrot.lane.b32.xlu0 %v5138_v0, %s5787_s30  ;;  %v1161_v25 = vrot.slane %v1160_v24, 4  ;;  %v427_v34 = vor.u32 %v426_v59, %v423_v30  ;;  %v432_v53 = vrot.slane %v430_v28, 5  ;;  %v5068_v11 = vrot.slane %v5058_v23, 9 }
  0x8a   : > { %v1190_v41 = vsel %vm6000_vm5, %v1185_v31, %v1189_v27  ;;  %v436_v46 = vrot.slane %v434_v19, 4  ;;  %v442_v42 = vrot.slane %v440_v33, 5  ;;  %v1357_v43 = vrot.slane %v6313_v29, 5  ;;  %v4987_v33 = vld [vmem:[%s5909_s26 + $0x64] sm:$0xf] }
  0x8b   : > { %v5149_v35 = vcombine.low %v1180_v9, %v1190_v41  ;;  %v1166_v44 = vsel %vm6000_vm5, %v1161_v25, %v1165_v22  ;;  %v428_v17 = vrot.slane %v427_v34, 4  ;;  %v1360_v21 = vrot.slane %v6328_v4, 5  ;;  %v4984_v34 = vld [vmem:[%s5909_s26 + $0x54] sm:$0xf]  ;;  %v6404_v41 = vld [vmem:[%s5909_s26 + $0x58] sm:$0xf] }
  0x8c   : > { %v5148_v50 = vcombine.low %v1156_v45, %v1166_v44  ;;  %v437_v51 = vor.u32 %v436_v46, %v432_v53  ;;  %v1358_v26 = vsel %vm5953_vm2, %v5068_v11, %v1357_v43  ;;  %v1359_v52 = vrot.slane %v1357_v43, 4 }
  0x8d   : > { %1797 = vrot.lane.b32.xlu1 %v5149_v35, %s5792_s15  ;;  %v433_v29 = vsel %vm6000_vm5, %v428_v17, %v432_v53  ;;  %v445_v55 = vshrl.u32 %v257_v36, 16  ;;  %v448_v57 = vshll.u32 %v257_v36, 16  ;;  %v454_v58 = vshll.u32 %v258_v47, 16 }
  0x8e   : > { %1795 = vrot.lane.b32.xlu0 %v5148_v50, %s5792_s15  ;;  %v438_v63 = vrot.slane %v437_v51, 4  ;;  %v1361_v0 = vsel %vm5953_vm2, %v1359_v52, %v1360_v21  ;;  %v458_v2 = vshrl.u32 %v258_v47, 16  ;;  %v464_v4 = vshll.u32 %v270_v49, 16 }
  0x8f   : > { %v5158_v54 = vcombine.low %v1358_v26, %v1361_v0  ;;  %v447_v48 = vrot.slane %v445_v55, 4  ;;  %v450_v5 = vrot.slane %v448_v57, 5  ;;  %v456_v38 = vrot.slane %v454_v58, 5  ;;  %v6420_v55 = vld [vmem:[%s5909_s26 + $0x5c] sm:$0x1] }
  0x90   : > { %v443_v8 = vsel %vm6000_vm5, %v438_v63, %v442_v42  ;;  %v460_v10 = vrot.slane %v458_v2, 4  ;;  %v466_v12 = vrot.slane %v464_v4, 5  ;;  %v5069_v56 = vrot.slane %v5059_v62, 9  ;;  %v5009_v0 = vld [vmem:[%s5909_s26 + $0x60] sm:$0xe] }
  0x91   : > { %v5090_v15 = vcombine.low %v433_v29, %v443_v8  ;;  %v451_v1 = vor.u32 %v450_v5, %v447_v48  ;;  %v1364_v3 = vrot.slane %v6303_v60, 5  ;;  %v1367_v27 = vrot.slane %v6320_v61, 5  ;;  %v6381_v40 = vpop.permute.xlu1 %1579 }
  0x92   : > { %1845 = vrot.lane.b32.xlu0 %v5158_v54, %s5793_s16  ;;  %v461_v16 = vor.u32 %v460_v10, %v456_v38  ;;  %v4967_v13 = vrot.slane %v523_v6, 9  ;;  %v610_v7 = vrot.slane %v258_v47, 5  ;;  %v613_v9 = vrot.slane %v270_v49, 5  ;;  %v6406_v46 = vpop.permute.xlu0 %1577  ;;  %v4999_v49 = vld [vmem:[%s5909_s26 + $0x68] sm:$0x1] }
  0x93   : > { %1479 = vrot.lane.b32.xlu1 %v5090_v15, %s5790_s10  ;;  %v452_v22 = vrot.slane %v451_v1, 4  ;;  %v1365_v60 = vsel %vm5953_vm2, %v5069_v56, %v1364_v3  ;;  %v1366_v23 = vrot.slane %v1364_v3, 4  ;;  %v4966_v61 = vrot.slane %v522_v14, 9  ;;  %v5008_v10 = vld [vmem:[%s5909_s26 + $0x54] sm:$0xe] }
  0x94   : > { %v462_v24 = vrot.slane %v461_v16, 4  ;;  %v611_v30 = vsel %vm5953_vm2, %v4967_v13, %v610_v7  ;;  %v612_v59 = vrot.slane %v610_v7, 4  ;;  %v603_v28 = vrot.slane %v6337_v18, 5 }
  0x95   : > { %v457_v31 = vsel %vm6000_vm5, %v452_v22, %v456_v38  ;;  %v1368_v45 = vsel %vm5953_vm2, %v1366_v23, %v1367_v27  ;;  %v606_v19 = vrot.slane %v6341_v20, 5  ;;  %v832_v25 = vshrl.u32 %v6379_v32, 16  ;;  %v6412_v50 = vpop.permute.xlu1 %1739  ;;  %v6433_v23 = vld [vmem:[%s5909_s26 + $0x6c] sm:$0xf] }
  0x96   : > { %v467_v53 = vsel %vm6000_vm5, %v462_v24, %v466_v12  ;;  %v5159_v11 = vcombine.low %v1365_v60, %v1368_v45  ;;  %v614_v18 = vsel %vm5953_vm2, %v612_v59, %v613_v9  ;;  %v604_v36 = vsel %vm5953_vm2, %v4966_v61, %v603_v28 }
  0x97   : > { %v5091_v20 = vcombine.low %v457_v31, %v467_v53  ;;  %v5101_v42 = vcombine.low %v611_v30, %v614_v18  ;;  %v605_v43 = vrot.slane %v603_v28, 4  ;;  %v834_v47 = vrot.slane %v832_v25, 4  ;;  %v6427_v12 = vpop.permute.xlu0 %1737  ;;  %v5036_v18 = vld [vmem:[%s5909_s26 + $0x60] sm:$0xf] }
  0x98   : > { %1847 = vrot.lane.b32.xlu0 %v5159_v11, %s5793_s16  ;;  %v835_v35 = vshll.u32 %v6379_v32, 16  ;;  %v845_v44 = vshrl.u32 %v4987_v33, 16  ;;  %v5111_v17 = vcombine.low %v6379_v32, %v4987_v33  ;;  %v808_v21 = vshrl.u32 %v4984_v34, 16 }
  0x99   : > { %1481 = vrot.lane.b32.xlu1 %v5091_v20, %s5790_s10  ;;  %v607_v51 = vsel %vm5953_vm2, %v605_v43, %v606_v19  ;;  %v811_v26 = vshll.u32 %v4984_v34, 16  ;;  %v821_v52 = vshrl.u32 %v6404_v41, 16  ;;  %v5110_v29 = vcombine.low %v4984_v34, %v6404_v41  ;;  %v6450_v34 = vld [vmem:[%s5909_s26 + $0x70] sm:$0xf] }
  0x9a   : > { %v5100_v57 = vcombine.low %v604_v36, %v607_v51  ;;  %v837_v58 = vrot.slane %v835_v35, 5  ;;  %v810_v62 = vrot.slane %v808_v21, 4  ;;  %v841_v63 = vshll.u32 %v4987_v33, 16 }
  0x9b   : > { %v813_v2 = vrot.slane %v811_v26, 5  ;;  %v847_v4 = vrot.slane %v845_v44, 4  ;;  %v851_v54 = vshll.u32 %v4999_v49, 16  ;;  %v817_v48 = vshll.u32 %v6404_v41, 16 }
  0x9c   : > { %1529 = vrot.lane.b32.xlu0 %v5100_v57, %s5789_s9  ;;  %v838_v5 = vor.u32 %v837_v58, %v834_v47  ;;  %v843_v38 = vrot.slane %v841_v63, 5  ;;  %v823_v6 = vrot.slane %v821_v52, 4  ;;  %v827_v8 = vshll.u32 %v6420_v55, 16  ;;  %v6462_v47 = vld [vmem:[%s5909_s26 + $0x64] sm:$0xf] }
  0x9d   : > { %1531 = vrot.lane.b32.xlu1 %v5101_v42, %s5789_s9  ;;  %v853_v56 = vrot.slane %v851_v54, 5  ;;  %v814_v14 = vor.u32 %v813_v2, %v810_v62  ;;  %v819_v15 = vrot.slane %v817_v48, 5  ;;  %v5019_v1 = vrot.slane %v5009_v0, 9  ;;  %v6455_v36 = vpop.permute.xlu0 %1677  ;;  %v6479_v0 = vld [vmem:[%s5909_s26 + $0x68] sm:$0x1] }
  0x9e   : > { %v839_v3 = vrot.slane %v838_v5, 4  ;;  %v848_v27 = vor.u32 %v847_v4, %v843_v38  ;;  %v829_v16 = vrot.slane %v827_v8, 5  ;;  %v994_v13 = vrot.slane %v4987_v33, 5  ;;  %v6430_v7 = vpop.permute.xlu1 %1517  ;;  %v6483_v5 = vld [vmem:[%s5909_s26 + $0x60] sm:$0xf] }
  0x9f   : > { %v815_v9 = vrot.slane %v814_v14, 4  ;;  %v824_v32 = vor.u32 %v823_v6, %v819_v15  ;;  %v997_v22 = vrot.slane %v4999_v49, 5  ;;  %v5018_v60 = vrot.slane %v5008_v10, 9 }
  0xa0   : > { %1589 = vrot.lane.b32.xlu0 %v5110_v29, %s5786_s27  ;;  %v844_v61 = vsel %vm6000_vm5, %v839_v3, %v843_v38  ;;  %v849_v24 = vrot.slane %v848_v27, 4  ;;  %v995_v30 = vsel %vm5953_vm2, %v5019_v1, %v994_v13  ;;  %v996_v59 = vrot.slane %v994_v13, 4  ;;  %v6492_v27 = vld [vmem:[%s5909_s26 + $0x64] sm:$0xf] }
  0xa1   : > { %1591 = vrot.lane.b32.xlu1 %v5111_v17, %s5786_s27  ;;  %v820_v28 = vsel %vm6000_vm5, %v815_v9, %v819_v15  ;;  %v825_v31 = vrot.slane %v824_v32, 4  ;;  %v987_v45 = vrot.slane %v6404_v41, 5  ;;  %v990_v19 = vrot.slane %v6420_v55, 5  ;;  %v6471_v55 = vld [vmem:[%s5909_s26 + $0x74] sm:$0x1] }
  0xa2   : > { %v854_v33 = vsel %vm6000_vm5, %v849_v24, %v853_v56  ;;  %v998_v25 = vsel %vm5953_vm2, %v996_v59, %v997_v22  ;;  %v1216_v53 = vshrl.u32 %v6433_v23, 16  ;;  %v1219_v11 = vshll.u32 %v6433_v23, 16  ;;  %v6464_v35 = vpop.permute.xlu1 %1519  ;;  %v6498_v32 = vld [vmem:[%s5909_s26 + $0x68] sm:$0x1]  ;;  %v5060_v59 = vld [vmem:[%s5909_s26 + $0x60] sm:$0xe] }
  0xa3   : > { %v5121_v20 = vcombine.low %v844_v61, %v854_v33  ;;  %v830_v41 = vsel %vm6000_vm5, %v825_v31, %v829_v16  ;;  %v5131_v42 = vcombine.low %v995_v30, %v998_v25  ;;  %v988_v43 = vsel %vm5953_vm2, %v5018_v60, %v987_v45 }
  0xa4   : > { %v5120_v44 = vcombine.low %v820_v28, %v830_v41  ;;  %v989_v17 = vrot.slane %v987_v45, 4  ;;  %v1218_v21 = vrot.slane %v1216_v53, 4  ;;  %v1221_v49 = vrot.slane %v1219_v11, 5 }
  0xa5   : > { %1641 = vrot.lane.b32.xlu1 %v5121_v20, %s5791_s13  ;;  %v1229_v51 = vshrl.u32 %v6450_v34, 16  ;;  %v5141_v26 = vcombine.low %v6433_v23, %v6450_v34  ;;  %v1192_v52 = vshrl.u32 %v5036_v18, 16  ;;  %v1195_v29 = vshll.u32 %v5036_v18, 16 }
  0xa6   : > { %1639 = vrot.lane.b32.xlu0 %v5120_v44, %s5791_s13  ;;  %v991_v57 = vsel %vm5953_vm2, %v989_v17, %v990_v19  ;;  %v1205_v58 = vshrl.u32 %v6462_v47, 16  ;;  %v5140_v62 = vcombine.low %v5036_v18, %v6462_v47  ;;  %v1222_v63 = vor.u32 %v1221_v49, %v1218_v21  ;;  %v6494_v16 = vpop.permute.xlu1 %1679 }
  0xa7   : > { %v5130_v2 = vcombine.low %v988_v43, %v991_v57  ;;  %v1194_v4 = vrot.slane %v1192_v52, 4  ;;  %v1197_v54 = vrot.slane %v1195_v29, 5  ;;  %v1225_v48 = vshll.u32 %v6450_v34, 16 }
  0xa8   : > { %v1223_v38 = vrot.slane %v1222_v63, 4  ;;  %v1231_v6 = vrot.slane %v1229_v51, 4  ;;  %v1235_v8 = vshll.u32 %v6471_v55, 16  ;;  %v1201_v10 = vshll.u32 %v6462_v47, 16  ;;  %v6487_v56 = vpop.permute.xlu0 %1467 }
  0xa9   : > { %1691 = vrot.lane.b32.xlu1 %v5131_v42, %s5788_s8  ;;  %v1227_v14 = vrot.slane %v1225_v48, 5  ;;  %v1198_v15 = vor.u32 %v1197_v54, %v1194_v4  ;;  %v1207_v1 = vrot.slane %v1205_v58, 4  ;;  %v1211_v3 = vshll.u32 %v6479_v0, 16  ;;  %v5599_v58 = vld [vmem:[%s7834_s1 + $0x20] ss:$0 sps:$4 sm:$0xff]  }
  0xaa   : > { %1689 = vrot.lane.b32.xlu0 %v5130_v2, %s5788_s8  ;;  %v1237_v13 = vrot.slane %v1235_v8, 5  ;;  %v1203_v9 = vrot.slane %v1201_v10, 5  ;;  %v469_v22 = vshrl.u32 %v6483_v5, 16  ;;  %v472_v60 = vshll.u32 %v6483_v5, 16  ;;  %v6531_v54 = vld [vmem:[%s5909_s26 + $0x70] sm:$0xf]  ;;  %5493 = vmatprep.subr.msk.bf16.mxu0 %vm2092_vm8, %v5599_v58 }
  0xab   : > { %v1228_v23 = vsel %vm6000_vm5, %v1223_v38, %v1227_v14  ;;  %v1232_v61 = vor.u32 %v1231_v6, %v1227_v14  ;;  %v1199_v24 = vrot.slane %v1198_v15, 4  ;;  %v1213_v30 = vrot.slane %v1211_v3, 5  ;;  %v5617_v38 = vld [vmem:[%s5909_s26 + $0x4] sm:$0xf]  ;;  %v5618_v6 = vld [vmem:[%s5909_s26] sm:$0xf] }
  0xac   : > { %v1208_v28 = vor.u32 %v1207_v1, %v1203_v9  ;;  %v471_v31 = vrot.slane %v469_v22, 4  ;;  %v474_v45 = vrot.slane %v472_v60, 5  ;;  %v478_v19 = vshll.u32 %v6492_v27, 16  ;;  %v6506_v33 = vpop.permute.xlu0 %1469  ;;  %v6544_v15 = vld [vmem:[%s5909_s26 + $0x74] sm:$0x1] }
  0xad   : > { %1751 = vrot.lane.b32.xlu1 %v5141_v26, %s5787_s30  ;;  %v1233_v25 = vrot.slane %v1232_v61, 4  ;;  %v1204_v53 = vsel %vm6000_vm5, %v1199_v24, %v1203_v9  ;;  %v482_v11 = vshrl.u32 %v6492_v27, 16  ;;  %v488_v18 = vshll.u32 %v6498_v32, 16  ;;  %v6517_v51 = vpop.permute.xlu1 %1629  ;;  %v5061_v60 = vld [vmem:[%s5909_s26 + $0x6c] sm:$0xe] }
  0xae   : > { %1749 = vrot.lane.b32.xlu0 %v5140_v62, %s5787_s30  ;;  %v1209_v20 = vrot.slane %v1208_v28, 4  ;;  %v475_v41 = vor.u32 %v474_v45, %v471_v31  ;;  %v480_v42 = vrot.slane %v478_v19, 5  ;;  %v5070_v43 = vrot.slane %v5060_v59, 9  ;;  %v6526_v62 = vld [vmem:[%s5909_s26 + $0x6c] sm:$0xf]  ;;  %v5601_v19 = vld [vmem:[%s7834_s1 + $0x18] sm:$0xff]  }
  0xaf   : > { %v1238_v44 = vsel %vm6000_vm5, %v1233_v25, %v1237_v13  ;;  %v484_v17 = vrot.slane %v482_v11, 4  ;;  %v490_v21 = vrot.slane %v488_v18, 5  ;;  %v1371_v49 = vrot.slane %v6462_v47, 5  ;;  %v525_v25 = vld [vmem:[%s5909_s26 + $0x6c] sm:$0xe] }
  0xb0   : > { %v5151_v26 = vcombine.low %v1228_v23, %v1238_v44  ;;  %v1214_v52 = vsel %vm6000_vm5, %v1209_v20, %v1213_v30  ;;  %v476_v29 = vrot.slane %v475_v41, 4  ;;  %v1374_v57 = vrot.slane %v6479_v0, 5  ;;  %v6533_v48 = vpop.permute.xlu0 %1627  ;;  %v5619_v44 = vld [vmem:[%s5909_s26 + $0x10] sm:$0xf] }
  0xb1   : > { %v5150_v63 = vcombine.low %v1204_v53, %v1214_v52  ;;  %v485_v2 = vor.u32 %v484_v17, %v480_v42  ;;  %v1372_v47 = vsel %vm5953_vm2, %v5070_v43, %v1371_v49  ;;  %v1373_v4 = vrot.slane %v1371_v49, 4  ;;  %v5620_v17 = vld [vmem:[%s5909_s26 + $0xc] sm:$0xf]  ;;  %v524_v49 = vld [vmem:[%s5909_s26 + $0x60] sm:$0xe] }
  0xb2   : > { %1801 = vrot.lane.b32.xlu1 %v5151_v26, %s5792_s15  ;;  %v481_v0 = vsel %vm6000_vm5, %v476_v29, %v480_v42  ;;  %v5074_v8 = vcombine.low %v5618_v6, %v5617_v38  ;;  %v493_v1 = vshrl.u32 %v6526_v62, 16  ;;  %v496_v9 = vshll.u32 %v6526_v62, 16 }
  0xb3   : > { %1799 = vrot.lane.b32.xlu0 %v5150_v63, %s5792_s15  ;;  %v486_v10 = vrot.slane %v485_v2, 4  ;;  %v1375_v14 = vsel %vm5953_vm2, %v1373_v4, %v1374_v57  ;;  %v502_v22 = vshll.u32 %v6531_v54, 16  ;;  %v506_v30 = vshrl.u32 %v6531_v54, 16  ;;  %v6560_v59 = vpop.permute.xlu1 %1789  ;;  %v5602_v2 = vld [vmem:[%s7834_s1 + $0x10] sm:$0xff]  }
  0xb4   : > { %v5160_v3 = vcombine.low %v1372_v47, %v1375_v14  ;;  %v1860_v13 = vsel %vm1857_vm6, %v5074_v8, %v6487_v56  ;;  %v495_v24 = vrot.slane %v493_v1, 4  ;;  %v498_v28 = vrot.slane %v496_v9, 5 }
  0xb5   : > { %v491_v23 = vsel %vm6000_vm5, %v486_v10, %v490_v21  ;;  %v6557_v61 = vsel %vm1888_vm7, %v1860_v13, %v6430_v7  ;;  %v504_v31 = vrot.slane %v502_v22, 5  ;;  %v512_v45 = vshll.u32 %v6544_v15, 16  ;;  %v4990_v13 = vld [vmem:[%s5909_s26 + $0x78] sm:$0xf] }
  0xb6   : > { %v5092_v56 = vcombine.low %v481_v0, %v491_v23  ;;  %v508_v7 = vrot.slane %v506_v30, 4  ;;  %v5071_v53 = vrot.slane %v5061_v60, 9  ;;  %v1378_v11 = vrot.slane %v6450_v34, 5  ;;  %v5605_v60 = vld [vmem:[%s7834_s1 + $0x8] sm:$0xff]   ;;  %v6614_v30 = vld [vmem:[%s5909_s26 + $0x7c] sm:$0xf] }
  0xb7   : > { %1849 = vrot.lane.b32.xlu0 %v5160_v3, %s5793_s16  ;;  %v1381_v18 = vrot.slane %v6471_v55, 5  ;;  %v6570_v20 = vpop.permute.xlu0 %1787  ;;  %v499_v41 = vor.u32 %v498_v28, %v495_v24  ;;  %v514_v42 = vrot.slane %v512_v45, 5  ;;  %v2094_v43 = vsel %vm2092_vm8, %v5599_v58, 0 }
  0xb8   : > { %1483 = vrot.lane.b32.xlu1 %v5092_v56, %s5790_s10  ;;  %v5075_v21 = vcombine.low %v5620_v17, %v5619_v44  ;;  %v509_v26 = vor.u32 %v508_v7, %v504_v31  ;;  %v1379_v52 = vsel %vm5953_vm2, %v5071_v53, %v1378_v11  ;;  %v1380_v29 = vrot.slane %v1378_v11, 4  ;;  %5446 = vmatpush3.bf16.msra.mxu0 %v2094_v43  ;;  %v6630_v11 = vld [vmem:[%s5909_s26 + $0x70] sm:$0xf]  ;;  %v5607_v43 = vld [vmem:[%s7834_s1] sm:$0xff]  }
  0xb9   : > { %v4969_v34 = vrot.slane %v525_v25, 9  ;;  %v500_v55 = vrot.slane %v499_v41, 4  ;;  %5447 = vmatprep.subr.bf16.mxu0 %v5601_v19  ;;  %v624_v63 = vrot.slane %v6531_v54, 5  ;;  %v627_v58 = vrot.slane %v6544_v15, 5 }
  0xba   : > { %v1863_v57 = vsel %vm1857_vm6, %v5075_v21, %v6506_v33  ;;  %v510_v47 = vrot.slane %v509_v26, 4  ;;  %v1382_v4 = vsel %vm5953_vm2, %v1380_v29, %v1381_v18  ;;  %v4968_v38 = vrot.slane %v524_v49, 9  ;;  %v6590_v6 = vpop.permute.xlu1 %1471  ;;  %v5001_v26 = vld [vmem:[%s5909_s26 + $0x80] sm:$0x1] }
  0xbb   : > { %v1892_v0 = vsel %vm1888_vm7, %v1863_v57, %v6464_v35  ;;  %v6592_v33 = vpop.permute.xlu0 %1837  ;;  %v505_v8 = vsel %vm6000_vm5, %v500_v55, %v504_v31  ;;  %v5161_v10 = vcombine.low %v1379_v52, %v1382_v4  ;;  %v625_v14 = vsel %vm5953_vm2, %v4969_v34, %v624_v63  ;;  %v5000_v57 = vld [vmem:[%s5909_s26 + $0x74] sm:$0x1]  ;;  %v5011_v4 = vld [vmem:[%s5909_s26 + $0x78] sm:$0xe] }
  0xbc   : > { %v626_v15 = vrot.slane %v624_v63, 4  ;;  %v515_v1 = vsel %vm6000_vm5, %v510_v47, %v514_v42  ;;  %v617_v3 = vrot.slane %v6492_v27, 5  ;;  %v620_v35 = vrot.slane %v6498_v32, 5  ;;  %5448 = vmatpush3.bf16.msra.mxu0 %v5601_v19  ;;  %v4988_v19 = vld [vmem:[%s5909_s26 + $0x6c] sm:$0xf] }
  0xbd   : > { %v5093_v9 = vcombine.low %v505_v8, %v515_v1  ;;  %1851 = vrot.lane.b32.xlu0 %v5161_v10, %s5793_s16  ;;  %5449 = vmatprep.subr.bf16.mxu0 %v5602_v2  ;;  %v1913_v24 = vsel %vm1909_vm9, %v1892_v0, %v6381_v40  ;;  %v1911_v28 = vsel %vm1909_vm9, %v6557_v61, %v6406_v46  ;;  %v880_v31 = vshrl.u32 %v4990_v13, 16 }
  0xbe   : > { %v628_v22 = vsel %vm5953_vm2, %v626_v15, %v627_v58  ;;  %v618_v32 = vsel %vm5953_vm2, %v4968_v38, %v617_v3  ;;  %v619_v23 = vrot.slane %v617_v3, 4  ;;  %v883_v45 = vshll.u32 %v4990_v13, 16 }
  0xbf   : > { %1485 = vrot.lane.b32.xlu1 %v5093_v9, %s5790_s10  ;;  %v5103_v56 = vcombine.low %v625_v14, %v628_v22  ;;  %v1934_v40 = vsel %vm1930_vm10, %v1913_v24, %v6517_v51  ;;  %v1932_v53 = vsel %vm1930_vm10, %v1911_v28, %v6533_v48  ;;  %v882_v61 = vrot.slane %v880_v31, 4  ;;  %v5010_v22 = vld [vmem:[%s5909_s26 + $0x6c] sm:$0xe]  ;;  %s7040_s10 = scalar_lea.vmem [#allocation3], %s6067_s14 }
  0xc0   : > { %v6621_v25 = vpop.permute.xlu0 %1839  ;;  %v621_v7 = vsel %vm5953_vm2, %v619_v23, %v620_v35  ;;  %5450 = vmatpush3.bf16.msra.mxu0 %v5602_v2  ;;  %v885_v41 = vrot.slane %v883_v45, 5  ;;  %v893_v42 = vshrl.u32 %v6614_v30, 16  ;;  %v1953_v51 = vsel %vm1951_vm11, %v1932_v53, %v6455_v36 }
  0xc1   : > { %v6632_v18 = vpop.permute.xlu1 %1473  ;;  %v5102_v46 = vcombine.low %v618_v32, %v621_v7  ;;  %5451 = vmatprep.subr.bf16.mxu0 %v5605_v60  ;;  %v5113_v48 = vcombine.low %v4990_v13, %v6614_v30  ;;  %v856_v44 = vshrl.u32 %v4988_v19, 16  ;;  %v859_v17 = vshll.u32 %v4988_v19, 16 }
  0xc2   : > { %v869_v21 = vshrl.u32 %v6630_v11, 16  ;;  %v5112_v49 = vcombine.low %v4988_v19, %v6630_v11  ;;  %v886_v52 = vor.u32 %v885_v41, %v882_v61  ;;  %v1955_v36 = vsel %vm1951_vm11, %v1934_v40, %v6494_v16 }
  0xc3   : > { %1535 = vrot.lane.b32.xlu1 %v5103_v56, %s5789_s9  ;;  %1533 = vrot.lane.b32.xlu0 %v5102_v46, %s5789_s9  ;;  %v858_v34 = vrot.slane %v856_v44, 4  ;;  %v861_v55 = vrot.slane %v859_v17, 5  ;;  %v1974_v58 = vsel %vm1972_vm12, %v1953_v51, %v6427_v12  ;;  %v889_v47 = vshll.u32 %v6614_v30, 16  ;;  %v5042_v51 = vld [vmem:[%s5909_s26 + $0x84] sm:$0xf] }
  0xc4   : > { %v6646_v29 = vpop.permute.xlu0 %1521  ;;  %5452 = vmatpush3.bf16.msra.mxu0 %v5605_v60  ;;  %v887_v2 = vrot.slane %v886_v52, 4  ;;  %v895_v0 = vrot.slane %v893_v42, 4  ;;  %v899_v38 = vshll.u32 %v5001_v26, 16  ;;  %v865_v16 = vshll.u32 %v6630_v11, 16 }
  0xc5   : > { %v6651_v63 = vpop.permute.xlu1 %1523  ;;  %5453 = vmatprep.subr.bf16.mxu0 %v5607_v43  ;;  %v862_v8 = vor.u32 %v861_v55, %v858_v34  ;;  %v1976_v10 = vsel %vm1972_vm12, %v1955_v36, %v6412_v50  ;;  %v891_v14 = vrot.slane %v889_v47, 5  ;;  %v871_v12 = vrot.slane %v869_v21, 4  ;;  %v6702_v34 = vld [vmem:[%s5909_s26 + $0x7c] sm:$0xf] }
  0xc6   : > { %v875_v15 = vshll.u32 %v5000_v57, 16  ;;  %v1995_v3 = vsel %vm1993_vm13, %v1974_v58, %v6570_v20  ;;  %v867_v13 = vrot.slane %v865_v16, 5  ;;  %v5021_v9 = vrot.slane %v5011_v4, 9  ;;  %v5622_v4 = vld [vmem:[%s5909_s26 + $0x1c] sm:$0xf] }
  0xc7   : > { %1595 = vrot.lane.b32.xlu1 %v5113_v48, %s5786_s27  ;;  %1593 = vrot.lane.b32.xlu0 %v5112_v49, %s5786_s27  ;;  %v863_v35 = vrot.slane %v862_v8, 4  ;;  %v892_v32 = vsel %vm6000_vm5, %v887_v2, %v891_v14  ;;  %v896_v23 = vor.u32 %v895_v0, %v891_v14  ;;  %v901_v50 = vrot.slane %v899_v38, 5  ;;  %v6693_v49 = vld [vmem:[%s5909_s26 + $0x88] sm:$0xf] }
  0xc8   : > { %v6662_v1 = vpop.permute.xlu0 %1581  ;;  %5454 = vmatpush3.bf16.msra.mxu0 %v5607_v43  ;;  %v877_v24 = vrot.slane %v875_v15, 5  ;;  %v872_v28 = vor.u32 %v871_v12, %v867_v13  ;;  %v1008_v20 = vrot.slane %v6614_v30, 5  ;;  %v1011_v31 = vrot.slane %v5001_v26, 5  ;;  %v5040_v26 = vld [vmem:[%s5909_s26 + $0x78] sm:$0xf] }
  0xc9   : > { %v6667_v60 = vpop.permute.xlu1 %1583  ;;  %v868_v56 = vsel %vm6000_vm5, %v863_v35, %v867_v13  ;;  %v897_v45 = vrot.slane %v896_v23, 4  ;;  %v5020_v19 = vrot.slane %v5010_v22, 9  ;;  %v1001_v7 = vrot.slane %v6630_v11, 5  ;;  %v5052_v35 = vld [vmem:[%s5909_s26 + $0x80] sm:$0x1] }
  0xca   : > { %v1004_v40 = vrot.slane %v5000_v57, 5  ;;  %v873_v53 = vrot.slane %v872_v28, 4  ;;  %v1009_v46 = vsel %vm5953_vm2, %v5021_v9, %v1008_v20  ;;  %v1010_v61 = vrot.slane %v1008_v20, 4 }
  0xcb   : > { %v902_v42 = vsel %vm6000_vm5, %v897_v45, %v901_v50  ;;  %v1002_v30 = vsel %vm5953_vm2, %v5020_v19, %v1001_v7  ;;  %v1003_v43 = vrot.slane %v1001_v7, 4  ;;  %v2016_v11 = vsel %vm2014_vm14, %v1995_v3, %v6592_v33  ;;  %v5063_v19 = vld [vmem:[%s5909_s26 + $0x84] sm:$0xe] }
  0xcc   : > { %v5123_v44 = vcombine.low %v892_v32, %v902_v42  ;;  %v878_v17 = vsel %vm6000_vm5, %v873_v53, %v877_v24  ;;  %v1012_v21 = vsel %vm5953_vm2, %v1010_v61, %v1011_v31  ;;  %v1997_v52 = vsel %vm1993_vm13, %v1976_v10, %v6560_v59  ;;  %5455 = vmatprep.mubr.msk.bf16.mxu0 %vm2071_vm15, %v2016_v11  ;;  %v5621_v59 = vld [vmem:[%s5909_s26 + $0x18] sm:$0xf]  ;;  %v5053_v10 = vld [vmem:[%s5909_s26 + $0x8c] sm:$0x1] }
  0xcd   : > { %v6677_v41 = vpop.permute.xlu1 %1633  ;;  %v5122_v33 = vcombine.low %v868_v56, %v878_v17  ;;  %v1005_v36 = vsel %vm5953_vm2, %v1003_v43, %v1004_v40  ;;  %v5133_v55 = vcombine.low %v1009_v46, %v1012_v21  ;;  %v2018_v57 = vsel %vm2014_vm14, %v1997_v52, %v6621_v25  ;;  %v5062_v42 = vld [vmem:[%s5909_s26 + $0x78] sm:$0xe]  ;;  %v5624_v43 = vld [vmem:[%s5909_s26 + $0x28] sm:$0xf] }
  0xce   : > { %v6686_v48 = vpop.permute.xlu0 %1631  ;;  %1645 = vrot.lane.b32.xlu1 %v5123_v44, %s5791_s13  ;;  %v1264_v58 = vshrl.u32 %v5042_v51, 16  ;;  %v1267_v2 = vshll.u32 %v5042_v51, 16  ;;  %v5076_v0 = vcombine.low %v5621_v59, %v5622_v4  ;;  %v5132_v38 = vcombine.low %v1002_v30, %v1005_v36  ;;  %5456 = vmatmul.mubr.msk.bf16.vlgmr.msra.gmra.mxu0 %vm2071_vm15, %v2018_v57  ;;  %v5623_v30 = vld [vmem:[%s5909_s26 + $0x24] sm:$0xf] }
  0xcf   : > { %1643 = vrot.lane.b32.xlu0 %v5122_v33, %s5791_s13  ;;  %v1277_v8 = vshrl.u32 %v6693_v49, 16  ;;  %v1240_v16 = vshrl.u32 %v5040_v26, 16  ;;  %v1243_v15 = vshll.u32 %v5040_v26, 16  ;;  %v1253_v3 = vshrl.u32 %v6702_v34, 16 }
  0xd0   : > { %v1266_v25 = vrot.slane %v1264_v58, 4  ;;  %v1269_v12 = vrot.slane %v1267_v2, 5  ;;  %v5143_v13 = vcombine.low %v5042_v51, %v6693_v49  ;;  %v5142_v22 = vcombine.low %v5040_v26, %v6702_v34 }
  0xd1   : > { %v6707_v47 = vpop.permute.xlu1 %1683  ;;  %v1242_v9 = vrot.slane %v1240_v16, 4  ;;  %v1245_v32 = vrot.slane %v1243_v15, 5  ;;  %v1273_v50 = vshll.u32 %v6693_v49, 16  ;;  %v1279_v24 = vrot.slane %v1277_v8, 4 }
  0xd2   : > { %v6715_v14 = vpop.permute.xlu0 %1681  ;;  %1695 = vrot.lane.b32.xlu1 %v5133_v55, %s5788_s8  ;;  %v1270_v23 = vor.u32 %v1269_v12, %v1266_v25  ;;  %v1283_v28 = vshll.u32 %v5053_v10, 16  ;;  %v1249_v20 = vshll.u32 %v6702_v34, 16  ;;  %v1255_v31 = vrot.slane %v1253_v3, 4 }
  0xd3   : > { %1693 = vrot.lane.b32.xlu0 %v5132_v38, %s5788_s8  ;;  %v1259_v45 = vshll.u32 %v5052_v35, 16  ;;  %v1866_v40 = vsel %vm1857_vm6, %v5076_v0, %v6590_v6  ;;  %v1275_v46 = vrot.slane %v1273_v50, 5  ;;  %v1246_v61 = vor.u32 %v1245_v32, %v1242_v9 }
  0xd4   : > { %v1271_v53 = vrot.slane %v1270_v23, 4  ;;  %v5077_v11 = vcombine.low %v5623_v30, %v5624_v43  ;;  %v1894_v51 = vsel %vm1888_vm7, %v1866_v40, %v6646_v29  ;;  %v1285_v44 = vrot.slane %v1283_v28, 5 }
  0xd5   : > { %v6723_v56 = vpop.permute.xlu1 %1743  ;;  %v1251_v17 = vrot.slane %v1249_v20, 5  ;;  %v1280_v21 = vor.u32 %v1279_v24, %v1275_v46  ;;  %v1247_v26 = vrot.slane %v1246_v61, 4  ;;  %v1261_v52 = vrot.slane %v1259_v45, 5 }
  0xd6   : > { %v1742_v7 = vpop.permute.xlu0 %1741  ;;  %1755 = vrot.lane.b32.xlu1 %v5143_v13, %s5787_s30  ;;  %v5073_v33 = vrot.slane %v5063_v19, 9  ;;  %v1392_v36 = vrot.slane %v6693_v49, 5  ;;  %v1395_v55 = vrot.slane %v5053_v10, 5  ;;  %v5072_v57 = vrot.slane %v5062_v42, 9 }
  0xd7   : > { %1753 = vrot.lane.b32.xlu0 %v5142_v22, %s5787_s30  ;;  %v1256_v6 = vor.u32 %v1255_v31, %v1251_v17  ;;  %v1276_v2 = vsel %vm6000_vm5, %v1271_v53, %v1275_v46  ;;  %v1281_v29 = vrot.slane %v1280_v21, 4  ;;  %v1385_v59 = vrot.slane %v6702_v34, 5 }
  0xd8   : > { %v1388_v4 = vrot.slane %v5052_v35, 5  ;;  %v1252_v38 = vsel %vm6000_vm5, %v1247_v26, %v1251_v17  ;;  %v1915_v16 = vsel %vm1909_vm9, %v1894_v51, %v6662_v1  ;;  %v1394_v25 = vrot.slane %v1392_v36, 4  ;;  %v5626_v17 = vld [vmem:[%s5909_s26 + $0x34] sm:$0xf] }
  0xd9   : > { %v1257_v8 = vrot.slane %v1256_v6, 4  ;;  %v1286_v49 = vsel %vm6000_vm5, %v1281_v29, %v1285_v44  ;;  %v1393_v10 = vsel %vm5953_vm2, %v5073_v33, %v1392_v36  ;;  %v1386_v12 = vsel %vm5953_vm2, %v5072_v57, %v1385_v59  ;;  %v5625_v44 = vld [vmem:[%s5909_s26 + $0x30] sm:$0xf]  ;;  %v5628_v57 = vld [vmem:[%s5909_s26 + $0x40] sm:$0xf] }
  0xda   : > { %v1794_v58 = vpop.permute.xlu1 %1793  ;;  %v1387_v34 = vrot.slane %v1385_v59, 4  ;;  %v5153_v15 = vcombine.low %v1276_v2, %v1286_v49  ;;  %v1396_v35 = vsel %vm5953_vm2, %v1394_v25, %v1395_v55  ;;  %v1936_v1 = vsel %vm1930_vm10, %v1915_v16, %v6686_v48  ;;  %v5627_v55 = vld [vmem:[%s5909_s26 + $0x3c] sm:$0xf] }
  0xdb   : > { %v1792_v0 = vpop.permute.xlu0 %1791  ;;  %v1262_v3 = vsel %vm6000_vm5, %v1257_v8, %v1261_v52  ;;  %v1869_v13 = vsel %vm1857_vm6, %v5077_v11, %v6632_v18  ;;  %v1957_v32 = vsel %vm1951_vm11, %v1936_v1, %v6715_v14  ;;  %v5163_v24 = vcombine.low %v1393_v10, %v1396_v35 }
  0xdc   : > { %v5152_v9 = vcombine.low %v1252_v38, %v1262_v3  ;;  %v1389_v22 = vsel %vm5953_vm2, %v1387_v34, %v1388_v4  ;;  %v1896_v50 = vsel %vm1888_vm7, %v1869_v13, %v6651_v63  ;;  %1805 = vrot.lane.b32.xlu1 %v5153_v15, %s5792_s15  ;;  %v1978_v28 = vsel %vm1972_vm12, %v1957_v32, %v1742_v7 }
  0xdd   : > { %v1917_v18 = vsel %vm1909_vm9, %v1896_v50, %v6667_v60  ;;  %v5162_v20 = vcombine.low %v1386_v12, %v1389_v22  ;;  %v1999_v31 = vsel %vm1993_vm13, %v1978_v28, %v1792_v0  ;;  %v5082_v63 = vcombine.low %v6483_v5, %v6492_v27 }
  0xde   : > { %1803 = vrot.lane.b32.xlu0 %v5152_v9, %s5792_s15  ;;  %v1938_v14 = vsel %vm1930_vm10, %v1917_v18, %v6677_v41  ;;  %v5083_v7 = vcombine.low %v6526_v62, %v6531_v54  ;;  %v5078_v21 = vcombine.low %v5625_v44, %v5626_v17 }
  0xdf   : > { %v1842_v23 = vpop.permute.xlu0 %1841  ;;  %v1959_v19 = vsel %vm1951_vm11, %v1938_v14, %v6707_v47 }
  0xe0   : > { %v1476_v48 = vpop.permute.xlu1 %1475  ;;  %v2020_v45 = vsel %vm2014_vm14, %v1999_v31, %v1842_v23  ;;  %1855 = vrot.lane.b32.xlu1 %v5163_v24, %s5793_s16  ;;  %v1980_v60 = vsel %vm1972_vm12, %v1959_v19, %v6723_v56  ;;  %v5630_v31 = vld [vmem:[%s5909_s26 + $0x4c] sm:$0xf] }
  0xe1   : > { %5459 = vmatprep.mubr.msk.bf16.mxu0 %vm2071_vm15, %v2020_v45  ;;  %v2001_v41 = vsel %vm1993_vm13, %v1980_v60, %v1794_v58  ;;  %v1872_v33 = vsel %vm1857_vm6, %v5078_v21, %v1476_v48  ;;  %v5079_v58 = vcombine.low %v5627_v55, %v5628_v57 }
  0xe2   : > { %1853 = vrot.lane.b32.xlu0 %v5162_v20, %s5793_s16  ;;  %v5629_v20 = vld [vmem:[%s5909_s26 + $0x48] sm:$0xf] }
  0xe3   : > { %v5080_v14 = vcombine.low %v5629_v20, %v5630_v31  ;;  %v6864_v20 = vld [vmem:[%s7837_s4 + $0x1] ss:$0 sm:$0xff] }
  0xe5   : > { %v1844_v40 = vpop.permute.xlu0 %1843 }
  0xe6   : > { %v1478_v53 = vpop.permute.xlu1 %1477  ;;  %v2022_v47 = vsel %vm2014_vm14, %v2001_v41, %v1844_v40 }
  0xe7   : > { %5460 = vmatmul.mubr.msk.bf16.gmra.mxu0 %vm2071_vm15, %v2022_v47  ;;  %v1875_v38 = vsel %vm1857_vm6, %v5079_v58, %v1478_v53  ;;  %v5631_v47 = vld [vmem:[%s5909_s26 + $0x54] sm:$0xf] }
  0xe9   : > { %v1526_v46 = vpop.permute.xlu0 %1525 }
  0xea   : > { %v1528_v61 = vpop.permute.xlu1 %1527  ;;  %v1898_v6 = vsel %vm1888_vm7, %v1872_v33, %v1526_v46  ;;  %v5632_v46 = vld [vmem:[%s5909_s26 + $0x58] sm:$0xf] }
  0xeb   : > { %v1900_v25 = vsel %vm1888_vm7, %v1875_v38, %v1528_v61  ;;  %v5081_v61 = vcombine.low %v5631_v47, %v5632_v46 }
  0xed   : > { %v1586_v42 = vpop.permute.xlu0 %1585 }
  0xee   : > { %v1588_v30 = vpop.permute.xlu1 %1587  ;;  %v1919_v2 = vsel %vm1909_vm9, %v1898_v6, %v1586_v42 }
  0xef   : > { %v1921_v12 = vsel %vm1909_vm9, %v1900_v25, %v1588_v30 }
  0xf2   : > { %v1638_v43 = vpop.permute.xlu1 %1637 }
  0xf3   : > { %v1636_v11 = vpop.permute.xlu0 %1635  ;;  %v1942_v34 = vsel %vm1930_vm10, %v1921_v12, %v1638_v43 }
  0xf4   : > { %v1940_v59 = vsel %vm1930_vm10, %v1919_v2, %v1636_v11 }
  0xf6   : > { %v1688_v56 = vpop.permute.xlu1 %1687 }
  0xf7   : > { %v1686_v51 = vpop.permute.xlu0 %1685  ;;  %v1963_v15 = vsel %vm1951_vm11, %v1942_v34, %v1688_v56 }
  0xf8   : > { %v1961_v4 = vsel %vm1951_vm11, %v1940_v59, %v1686_v51 }
  0xfa   : > { %v1748_v26 = vpop.permute.xlu1 %1747 }
  0xfb   : > { %v1746_v52 = vpop.permute.xlu0 %1745  ;;  %v1984_v3 = vsel %vm1972_vm12, %v1963_v15, %v1748_v26 }
  0xfc   : > { %v1982_v0 = vsel %vm1972_vm12, %v1961_v4, %v1746_v52 }
  0xff   : > { %v1798_v36 = vpop.permute.xlu1 %1797 }
 0x100   : > { %v1796_v29 = vpop.permute.xlu0 %1795  ;;  %v2005_v35 = vsel %vm1993_vm13, %v1984_v3, %v1798_v36 }
 0x101   : > { %v2003_v8 = vsel %vm1993_vm13, %v1982_v0, %v1796_v29 }
 0x104   : > { %v1846_v16 = vpop.permute.xlu0 %1845 }
 0x105   : > { %v1480_v49 = vpop.permute.xlu1 %1479  ;;  %v2024_v10 = vsel %vm2014_vm14, %v2003_v8, %v1846_v16 }
 0x106   : > { %5463 = vmatprep.mubr.msk.bf16.mxu0 %vm2071_vm15, %v2024_v10  ;;  %v1878_v60 = vsel %vm1857_vm6, %v5080_v14, %v1480_v49 }
 0x10a   : > { %v1848_v1 = vpop.permute.xlu0 %1847 }
 0x10b   : > { %v1482_v13 = vpop.permute.xlu1 %1481  ;;  %v2026_v9 = vsel %vm2014_vm14, %v2005_v35, %v1848_v1 }
 0x10c   : > { %5464 = vmatmul.mubr.msk.bf16.gmra.mxu0 %vm2071_vm15, %v2026_v9  ;;  %v1881_v44 = vsel %vm1857_vm6, %v5081_v61, %v1482_v13 }
 0x10e   : > { %v1530_v22 = vpop.permute.xlu0 %1529 }
 0x10f   : > { %v1532_v32 = vpop.permute.xlu1 %1531  ;;  %v1902_v41 = vsel %vm1888_vm7, %v1878_v60, %v1530_v22 }
 0x110   : > { %v1904_v21 = vsel %vm1888_vm7, %v1881_v44, %v1532_v32 }
 0x112   : > { %v1590_v23 = vpop.permute.xlu0 %1589 }
 0x113   : > { %v1592_v50 = vpop.permute.xlu1 %1591  ;;  %v1923_v40 = vsel %vm1909_vm9, %v1902_v41, %v1590_v23 }
 0x114   : > { %v1925_v26 = vsel %vm1909_vm9, %v1904_v21, %v1592_v50 }
 0x117   : > { %v1642_v24 = vpop.permute.xlu1 %1641 }
 0x118   : > { %v1640_v28 = vpop.permute.xlu0 %1639  ;;  %v1946_v33 = vsel %vm1930_vm10, %v1925_v26, %v1642_v24 }
 0x119   : > { %v1944_v42 = vsel %vm1930_vm10, %v1923_v40, %v1640_v28 }
 0x11b   : > { %v1692_v48 = vpop.permute.xlu1 %1691 }
 0x11c   : > { %v1690_v18 = vpop.permute.xlu0 %1689  ;;  %v1967_v6 = vsel %vm1951_vm11, %v1946_v33, %v1692_v48  ;;  %v6859_v48 = vld [vmem:[%s7837_s4] ss:$0 sm:$0xff]  ;;  %v2555_v33 = vld [vmem:[#allocation2 + $0xc] sm:$0xf] }
 0x11d   : > { %v1965_v43 = vsel %vm1951_vm11, %v1944_v42, %v1690_v18 }
 0x11f   : > { %v1752_v45 = vpop.permute.xlu1 %1751 }
 0x120   : > { %v1750_v19 = vpop.permute.xlu0 %1749  ;;  %v1988_v36 = vsel %vm1972_vm12, %v1967_v6, %v1752_v45 }
 0x121   : > { %v1986_v11 = vsel %vm1972_vm12, %v1965_v43, %v1750_v19 }
 0x124   : > { %v1802_v30 = vpop.permute.xlu1 %1801 }
 0x125   : > { %v1800_v53 = vpop.permute.xlu0 %1799  ;;  %v2009_v55 = vsel %vm1993_vm13, %v1988_v36, %v1802_v30 }
 0x126   : > { %v2007_v56 = vsel %vm1993_vm13, %v1986_v11, %v1800_v53 }
 0x129   : > { %v1850_v51 = vpop.permute.xlu0 %1849 }
 0x12a   : > { %v2028_v17 = vsel %vm2014_vm14, %v2007_v56, %v1850_v51  ;;  %v1484_v52 = vpop.permute.xlu1 %1483 }
 0x12b   : > { %5467 = vmatprep.mubr.msk.bf16.mxu0 %vm2071_vm15, %v2028_v17  ;;  %v1884_v34 = vsel %vm1857_vm6, %v5082_v63, %v1484_v52 }
 0x12f   : > { %v1852_v57 = vpop.permute.xlu0 %1851 }
 0x130   : > { %v2030_v58 = vsel %vm2014_vm14, %v2009_v55, %v1852_v57 }
 0x131   : > { %v1486_v2 = vpop.permute.xlu1 %1485  ;;  %5468 = vmatmul.mubr.msk.bf16.gmra.mxu0 %vm2071_vm15, %v2030_v58 }
 0x132   : > { %v1887_v12 = vsel %vm1857_vm6, %v5083_v7, %v1486_v2  ;;  %v2545_v2 = vld [vmem:[#allocation2] sm:$0xf] }
 0x135   : > { %v1536_v29 = vpop.permute.xlu1 %1535  ;;  %v1534_v59 = vpop.permute.xlu0 %1533 }
 0x136   : > { %v1908_v15 = vsel %vm1888_vm7, %v1887_v12, %v1536_v29  ;;  %v1906_v3 = vsel %vm1888_vm7, %v1884_v34, %v1534_v59 }
 0x139   : > { %v1596_v4 = vpop.permute.xlu1 %1595  ;;  %v1594_v0 = vpop.permute.xlu0 %1593 }
 0x13a   : > { %v1929_v35 = vsel %vm1909_vm9, %v1908_v15, %v1596_v4  ;;  %v1927_v13 = vsel %vm1909_vm9, %v1906_v3, %v1594_v0  ;;  %vm2550_vm9 = vcmask 122880  }
 0x140   : > { %v1646_v38 = vpop.permute.xlu1 %1645 }
 0x141   : > { %v1644_v8 = vpop.permute.xlu0 %1643  ;;  %v1950_v9 = vsel %vm1930_vm10, %v1929_v35, %v1646_v38 }
 0x142   : > { %v1948_v62 = vsel %vm1930_vm10, %v1927_v13, %v1644_v8 }
 0x144   : > { %v1696_v16 = vpop.permute.xlu1 %1695 }
 0x145   : > { %v1694_v25 = vpop.permute.xlu0 %1693  ;;  %v1971_v54 = vsel %vm1951_vm11, %v1950_v9, %v1696_v16  ;;  %v2552_v9 = vld [vmem:[#allocation2 + $0x8] sm:$0x1] }
 0x146   : > { %v1969_v5 = vsel %vm1951_vm11, %v1948_v62, %v1694_v25  ;;  %vm2340_vm11 = vsmask.f32 4368  ;;  %v2559_v25 = vld [vmem:[#allocation2 + $0x14] sm:$0x1] }
 0x148   : > { %v1756_v49 = vpop.permute.xlu1 %1755 }
 0x149   : > { %v1754_v10 = vpop.permute.xlu0 %1753  ;;  %v1992_v27 = vsel %vm1972_vm12, %v1971_v54, %v1756_v49 }
 0x14a   : > { %v1990_v63 = vsel %vm1972_vm12, %v1969_v5, %v1754_v10 }
 0x14e   : > { %v1806_v1 = vpop.permute.xlu1 %1805 }
 0x14f   : > { %v2013_v7 = vsel %vm1993_vm13, %v1992_v27, %v1806_v1 }
 0x150   : > { %v1804_v22 = vpop.permute.xlu0 %1803 }
 0x151   : > { %v2011_v23 = vsel %vm1993_vm13, %v1990_v63, %v1804_v22  ;;  %vm6882_vm13 = vmand %vm2550_vm9, %vm2339_vm3 }
 0x152   : > { %v1856_v32 = vpop.permute.xlu1 %1855 }
 0x153   : > { %v2034_v50 = vsel %vm2014_vm14, %v2013_v7, %v1856_v32 }
 0x154   : > { %v1854_v24 = vpop.permute.xlu0 %1853 }
 0x155   : > { %v2032_v28 = vsel %vm2014_vm14, %v2011_v23, %v1854_v24 }
 0x156   : > { %5471 = vmatprep.mubr.msk.bf16.mxu0 %vm2071_vm15, %v2032_v28 }
 0x157   : > { %5472 = vmatmul.mubr.msk.bf16.gmra.mxu0 %vm2071_vm15, %v2034_v50  ;;  %vm6889_vm15 = vmor %vm2339_vm3, %vm2340_vm11 }
 0x158   : > { %vm6912_vm3 = vmand %vm2550_vm9, %vm2543_vm1 }
 0x18e   : > { %v5457_v18 = vpop.f32.mrf.mxu0 }
 0x18f   : > { %v2216_v31 = vmul.f32 %v5457_v18, %v6859_v48 }
 0x190   : > { %v2130_v14 = vpop.f32.mrf.mxu0 }
 0x191   : > { %v2241_v45 = vadd.f32 %v6864_v20, %v2216_v31  ;;  %v2214_v19 = vmul.f32 %v6859_v48, %v2130_v14 }
 0x192   : > { %v5458_v60 = vpop.f32.mrf.mxu0 }
 0x193   : > { %v2261_v41 = vmax.f32 %v2241_v45, 0.0  ;;  %v2239_v40 = vadd.f32 %v6864_v20, %v2214_v19  ;;  %v2217_v53 = vmul.f32 %v5458_v60, %v6859_v48 }
 0x194   : > { %v2133_v47 = vpop.f32.mrf.mxu0 }
 0x195   : > { %v5386_v46 = vpack.c.bf16 %v2261_v41, %v2261_v41  ;;  %v2259_v61 = vmax.f32 %v2239_v40, 0.0  ;;  %v2242_v42 = vadd.f32 %v6864_v20, %v2217_v53  ;;  %v2215_v30 = vmul.f32 %v6859_v48, %v2133_v47 }
 0x197   : > { %v2360_v43 = vshrl.u32 %v5386_v46, 16  ;;  %v5384_v11 = vpack.c.bf16 %v2259_v61, %v2259_v61  ;;  %v2262_v56 = vmax.f32 %v2242_v42, 0.0  ;;  %v2240_v51 = vadd.f32 %v6864_v20, %v2215_v30 }
 0x198   : > { %v2363_v17 = vshll.u32 %v5386_v46, 16 }
 0x199   : > { %v2362_v44 = vrot.slane %v2360_v43, 7  ;;  %v2343_v21 = vshrl.u32 %v5384_v11, 16  ;;  %v5387_v26 = vpack.c.bf16 %v2262_v56, %v2262_v56  ;;  %v2260_v6 = vmax.f32 %v2240_v51, 0.0 }
 0x19a   : > { %v2346_v57 = vshll.u32 %v5384_v11, 16 }
 0x19b   : > { %v2365_v36 = vor.u32 %v2363_v17, %v2362_v44  ;;  %v2345_v55 = vrot.slane %v2343_v21, 7  ;;  %v2368_v58 = vshrl.u32 %v5387_v26, 16  ;;  %v5385_v29 = vpack.c.bf16 %v2260_v6, %v2260_v6 }
 0x19c   : > { %v2371_v8 = vshll.u32 %v5387_v26, 16  ;;  %v2366_v10 = vrot.slane %v2362_v44, 4 }
 0x19d   : > { %v2556_v4 = vsel %vm6876_vm4, %v2365_v36, %v2555_v33  ;;  %v2348_v0 = vor.u32 %v2346_v57, %v2345_v55  ;;  %v2370_v38 = vrot.slane %v2368_v58, 7  ;;  %v2351_v49 = vshrl.u32 %v5385_v29, 16  ;;  %v2569_v36 = vld [vmem:[#allocation2 + $0x24] sm:$0xf] }
 0x19e   : > { %2557 = vst [vmem:[#allocation2 + $0xc] sm:$0xf] %v2556_v4  ;;  %v2354_v35 = vshll.u32 %v5385_v29, 16  ;;  %v2349_v22 = vrot.slane %v2345_v55, 4  ;;  %v2562_v4 = vld [vmem:[#allocation2 + $0x18] sm:$0xf] }
 0x19f   : > { %v2546_v12 = vsel %vm6876_vm4, %v2348_v0, %v2545_v2  ;;  %v2373_v34 = vor.u32 %v2371_v8, %v2370_v38  ;;  %v2375_v15 = vrot.slane %v2370_v38, 4  ;;  %v2353_v3 = vrot.slane %v2351_v49, 7 }
 0x1a0   : > { %2547 = vst [vmem:[#allocation2] sm:$0xf] %v2546_v12 }
 0x1a1   : > { %v2374_v1 = vsel %vm6889_vm15, %v2366_v10, %v2373_v34  ;;  %v2560_v13 = vsel %vm6882_vm13, %v2375_v15, %v2559_v25  ;;  %v2356_v62 = vor.u32 %v2354_v35, %v2353_v3  ;;  %v2358_v54 = vrot.slane %v2353_v3, 4  ;;  %v2573_v10 = vld [vmem:[#allocation2 + $0x2c] sm:$0x1] }
 0x1a2   : > { %2558 = vst.msk [vmem:[#allocation2 + $0x10] sm:$0xf] %vm2542_vm0, %v2374_v1  ;;  %2561 = vst [vmem:[#allocation2 + $0x14] sm:$0x1] %v2560_v13 }
 0x1a3   : > { %v2357_v27 = vsel %vm6889_vm15, %v2349_v22, %v2356_v62  ;;  %v2553_v63 = vsel %vm6882_vm13, %v2358_v54, %v2552_v9  ;;  %v2566_v62 = vld [vmem:[#allocation2 + $0x20] sm:$0x1] }
 0x1a4   : > { %2549 = vst.msk [vmem:[#allocation2 + $0x4] sm:$0xf] %vm2542_vm0, %v2357_v27  ;;  %2554 = vst [vmem:[#allocation2 + $0x8] sm:$0x1] %v2553_v63 }
 0x1a5   : > { %v2621_v32 = vld [vmem:[#allocation2 + $0xc] sm:$0x1] }
 0x1a6   : > { %v2622_v50 = vsel %vm6882_vm13, 0, %v2621_v32 }
 0x1a7   : > { %v5461_v5 = vpop.f32.mrf.mxu0  ;;  %2623 = vst [vmem:[#allocation2 + $0xc] sm:$0x1] %v2622_v50  ;;  %v2618_v31 = vld [vmem:[#allocation2] sm:$0x1] }
 0x1a8   : > { %v2220_v7 = vmul.f32 %v5461_v5, %v6859_v48  ;;  %v2619_v45 = vsel %vm6882_vm13, 0, %v2618_v31 }
 0x1a9   : > { %v2146_v23 = vpop.f32.mrf.mxu0  ;;  %2620 = vst [vmem:[#allocation2] sm:$0x1] %v2619_v45  ;;  %v2652_v40 = vld [vmem:[#allocation2 + $0x14] sm:$0x1] }
 0x1aa   : > { %v2245_v24 = vadd.f32 %v6864_v20, %v2220_v7  ;;  %v2218_v28 = vmul.f32 %v6859_v48, %v2146_v23  ;;  %v2653_v47 = vsel %vm6912_vm3, 0, %v2652_v40 }
 0x1ab   : > { %v5462_v14 = vpop.f32.mrf.mxu0  ;;  %2654 = vst [vmem:[#allocation2 + $0x14] sm:$0x1] %v2653_v47  ;;  %v2649_v43 = vld [vmem:[#allocation2 + $0x8] sm:$0x1] }
 0x1ac   : > { %v2265_v19 = vmax.f32 %v2245_v24, 0.0  ;;  %v2243_v60 = vadd.f32 %v6864_v20, %v2218_v28  ;;  %v2221_v41 = vmul.f32 %v5462_v14, %v6859_v48  ;;  %v2650_v44 = vsel %vm6912_vm3, 0, %v2649_v43 }
 0x1ad   : > { %v2149_v53 = vpop.f32.mrf.mxu0  ;;  %2651 = vst [vmem:[#allocation2 + $0x8] sm:$0x1] %v2650_v44 }
 0x1ae   : > { %v5390_v46 = vpack.c.bf16 %v2265_v19, %v2265_v19  ;;  %v2263_v61 = vmax.f32 %v2243_v60, 0.0  ;;  %v2246_v42 = vadd.f32 %v6864_v20, %v2221_v41  ;;  %v2219_v30 = vmul.f32 %v6859_v48, %v2149_v53 }
 0x1b0   : > { %v2394_v11 = vshrl.u32 %v5390_v46, 16  ;;  %v5388_v56 = vpack.c.bf16 %v2263_v61, %v2263_v61  ;;  %v2266_v51 = vmax.f32 %v2246_v42, 0.0  ;;  %v2244_v17 = vadd.f32 %v6864_v20, %v2219_v30 }
 0x1b1   : > { %v2397_v26 = vshll.u32 %v5390_v46, 16 }
 0x1b2   : > { %v2396_v21 = vrot.slane %v2394_v11, 7  ;;  %v2377_v33 = vshrl.u32 %v5388_v56, 16  ;;  %v5391_v6 = vpack.c.bf16 %v2266_v51, %v2266_v51  ;;  %v2264_v55 = vmax.f32 %v2244_v17, 0.0 }
 0x1b3   : > { %v2380_v2 = vshll.u32 %v5388_v56, 16 }
 0x1b4   : > { %v2399_v57 = vor.u32 %v2397_v26, %v2396_v21  ;;  %v2379_v58 = vrot.slane %v2377_v33, 7  ;;  %v2402_v29 = vshrl.u32 %v5391_v6, 16  ;;  %v5389_v0 = vpack.c.bf16 %v2264_v55, %v2264_v55 }
 0x1b5   : > { %v2405_v49 = vshll.u32 %v5391_v6, 16  ;;  %v2400_v34 = vrot.slane %v2396_v21, 4 }
 0x1b6   : > { %v2570_v38 = vsel %vm6876_vm4, %v2399_v57, %v2569_v36  ;;  %v2382_v8 = vor.u32 %v2380_v2, %v2379_v58  ;;  %v2404_v25 = vrot.slane %v2402_v29, 7  ;;  %v2385_v12 = vshrl.u32 %v5389_v0, 16  ;;  %v2583_v57 = vld [vmem:[#allocation2 + $0x3c] sm:$0xf] }
 0x1b7   : > { %2571 = vst [vmem:[#allocation2 + $0x24] sm:$0xf] %v2570_v38  ;;  %v2388_v13 = vshll.u32 %v5389_v0, 16  ;;  %v2383_v54 = vrot.slane %v2379_v58, 4  ;;  %v2576_v38 = vld [vmem:[#allocation2 + $0x30] sm:$0xf] }
 0x1b8   : > { %v2563_v15 = vsel %vm6876_vm4, %v2382_v8, %v2562_v4  ;;  %v2407_v3 = vor.u32 %v2405_v49, %v2404_v25  ;;  %v2409_v35 = vrot.slane %v2404_v25, 4  ;;  %v2387_v1 = vrot.slane %v2385_v12, 7 }
 0x1b9   : > { %2564 = vst [vmem:[#allocation2 + $0x18] sm:$0xf] %v2563_v15 }
 0x1ba   : > { %v2408_v9 = vsel %vm6889_vm15, %v2400_v34, %v2407_v3  ;;  %v2574_v22 = vsel %vm6882_vm13, %v2409_v35, %v2573_v10  ;;  %v2390_v5 = vor.u32 %v2388_v13, %v2387_v1  ;;  %v2392_v27 = vrot.slane %v2387_v1, 4  ;;  %v2587_v34 = vld [vmem:[#allocation2 + $0x44] sm:$0x1] }
 0x1bb   : > { %2572 = vst.msk [vmem:[#allocation2 + $0x28] sm:$0xf] %vm2542_vm0, %v2408_v9  ;;  %2575 = vst [vmem:[#allocation2 + $0x2c] sm:$0x1] %v2574_v22 }
 0x1bc   : > { %v2391_v63 = vsel %vm6889_vm15, %v2383_v54, %v2390_v5  ;;  %v2567_v7 = vsel %vm6882_vm13, %v2392_v27, %v2566_v62  ;;  %v2580_v5 = vld [vmem:[#allocation2 + $0x38] sm:$0x1] }
 0x1bd   : > { %2565 = vst.msk [vmem:[#allocation2 + $0x1c] sm:$0xf] %vm2542_vm0, %v2391_v63  ;;  %2568 = vst [vmem:[#allocation2 + $0x20] sm:$0x1] %v2567_v7 }
 0x1be   : > { %v2627_v32 = vld [vmem:[#allocation2 + $0x24] sm:$0x1] }
 0x1bf   : > { %v2628_v23 = vsel %vm6882_vm13, 0, %v2627_v32 }
 0x1c0   : > { %2629 = vst [vmem:[#allocation2 + $0x24] sm:$0x1] %v2628_v23  ;;  %v2624_v50 = vld [vmem:[#allocation2 + $0x18] sm:$0x1] }
 0x1c1   : > { %v2625_v24 = vsel %vm6882_vm13, 0, %v2624_v50 }
 0x1c2   : > { %2626 = vst [vmem:[#allocation2 + $0x18] sm:$0x1] %v2625_v24  ;;  %v2658_v28 = vld [vmem:[#allocation2 + $0x2c] sm:$0x1] }
 0x1c3   : > { %v2659_v31 = vsel %vm6912_vm3, 0, %v2658_v28 }
 0x1c4   : > { %2660 = vst [vmem:[#allocation2 + $0x2c] sm:$0x1] %v2659_v31  ;;  %v2655_v14 = vld [vmem:[#allocation2 + $0x20] sm:$0x1] }
 0x1c5   : > { %v2656_v45 = vsel %vm6912_vm3, 0, %v2655_v14 }
 0x1c6   : > { %2657 = vst [vmem:[#allocation2 + $0x20] sm:$0x1] %v2656_v45 }
 0x1cc   : > { %v5465_v19 = vpop.f32.mrf.mxu0 }
 0x1cd   : > { %v2224_v60 = vmul.f32 %v5465_v19, %v6859_v48 }
 0x1ce   : > { %v2162_v41 = vpop.f32.mrf.mxu0 }
 0x1cf   : > { %v2249_v40 = vadd.f32 %v6864_v20, %v2224_v60  ;;  %v2222_v53 = vmul.f32 %v6859_v48, %v2162_v41 }
 0x1d0   : > { %v5466_v47 = vpop.f32.mrf.mxu0 }
 0x1d1   : > { %v2269_v46 = vmax.f32 %v2249_v40, 0.0  ;;  %v2247_v61 = vadd.f32 %v6864_v20, %v2222_v53  ;;  %v2225_v42 = vmul.f32 %v5466_v47, %v6859_v48 }
 0x1d2   : > { %v2165_v30 = vpop.f32.mrf.mxu0 }
 0x1d3   : > { %v5394_v43 = vpack.c.bf16 %v2269_v46, %v2269_v46  ;;  %v2267_v11 = vmax.f32 %v2247_v61, 0.0  ;;  %v2250_v56 = vadd.f32 %v6864_v20, %v2225_v42  ;;  %v2223_v51 = vmul.f32 %v6859_v48, %v2165_v30 }
 0x1d5   : > { %v2428_v44 = vshrl.u32 %v5394_v43, 16  ;;  %v5392_v17 = vpack.c.bf16 %v2267_v11, %v2267_v11  ;;  %v2270_v21 = vmax.f32 %v2250_v56, 0.0  ;;  %v2248_v26 = vadd.f32 %v6864_v20, %v2223_v51 }
 0x1d6   : > { %v2431_v6 = vshll.u32 %v5394_v43, 16 }
 0x1d7   : > { %v2430_v33 = vrot.slane %v2428_v44, 7  ;;  %v2411_v36 = vshrl.u32 %v5392_v17, 16  ;;  %v5395_v55 = vpack.c.bf16 %v2270_v21, %v2270_v21  ;;  %v2268_v58 = vmax.f32 %v2248_v26, 0.0 }
 0x1d8   : > { %v2414_v4 = vshll.u32 %v5392_v17, 16 }
 0x1d9   : > { %v2433_v2 = vor.u32 %v2431_v6, %v2430_v33  ;;  %v2413_v29 = vrot.slane %v2411_v36, 7  ;;  %v2436_v0 = vshrl.u32 %v5395_v55, 16  ;;  %v5393_v8 = vpack.c.bf16 %v2268_v58, %v2268_v58 }
 0x1da   : > { %v2439_v12 = vshll.u32 %v5395_v55, 16  ;;  %v2434_v3 = vrot.slane %v2430_v33, 4 }
 0x1db   : > { %v2584_v25 = vsel %vm6876_vm4, %v2433_v2, %v2583_v57  ;;  %v2416_v49 = vor.u32 %v2414_v4, %v2413_v29  ;;  %v2438_v10 = vrot.slane %v2436_v0, 7  ;;  %v2419_v15 = vshrl.u32 %v5393_v8, 16  ;;  %v2597_v2 = vld [vmem:[#allocation2 + $0x54] sm:$0xf] }
 0x1dc   : > { %2585 = vst [vmem:[#allocation2 + $0x3c] sm:$0xf] %v2584_v25  ;;  %v2422_v22 = vshll.u32 %v5393_v8, 16  ;;  %v2417_v27 = vrot.slane %v2413_v29, 4  ;;  %v2590_v25 = vld [vmem:[#allocation2 + $0x48] sm:$0xf] }
 0x1dd   : > { %v2577_v35 = vsel %vm6876_vm4, %v2416_v49, %v2576_v38  ;;  %v2441_v1 = vor.u32 %v2439_v12, %v2438_v10  ;;  %v2443_v13 = vrot.slane %v2438_v10, 4  ;;  %v2421_v9 = vrot.slane %v2419_v15, 7 }
 0x1de   : > { %2578 = vst [vmem:[#allocation2 + $0x30] sm:$0xf] %v2577_v35 }
 0x1df   : > { %v2442_v62 = vsel %vm6889_vm15, %v2434_v3, %v2441_v1  ;;  %v2588_v54 = vsel %vm6882_vm13, %v2443_v13, %v2587_v34  ;;  %v2424_v63 = vor.u32 %v2422_v22, %v2421_v9  ;;  %v2426_v7 = vrot.slane %v2421_v9, 4  ;;  %v2601_v3 = vld [vmem:[#allocation2 + $0x5c] sm:$0x1] }
 0x1e0   : > { %2586 = vst.msk [vmem:[#allocation2 + $0x40] sm:$0xf] %vm2542_vm0, %v2442_v62  ;;  %2589 = vst [vmem:[#allocation2 + $0x44] sm:$0x1] %v2588_v54 }
 0x1e1   : > { %v2425_v32 = vsel %vm6889_vm15, %v2417_v27, %v2424_v63  ;;  %v2581_v23 = vsel %vm6882_vm13, %v2426_v7, %v2580_v5  ;;  %v2594_v63 = vld [vmem:[#allocation2 + $0x50] sm:$0x1] }
 0x1e2   : > { %2579 = vst.msk [vmem:[#allocation2 + $0x34] sm:$0xf] %vm2542_vm0, %v2425_v32  ;;  %2582 = vst [vmem:[#allocation2 + $0x38] sm:$0x1] %v2581_v23 }
 0x1e3   : > { %v2633_v50 = vld [vmem:[#allocation2 + $0x3c] sm:$0x1] }
 0x1e4   : > { %v2634_v24 = vsel %vm6882_vm13, 0, %v2633_v50 }
 0x1e5   : > { %2635 = vst [vmem:[#allocation2 + $0x3c] sm:$0x1] %v2634_v24  ;;  %v2630_v28 = vld [vmem:[#allocation2 + $0x30] sm:$0x1] }
 0x1e6   : > { %v2631_v31 = vsel %vm6882_vm13, 0, %v2630_v28 }
 0x1e7   : > { %2632 = vst [vmem:[#allocation2 + $0x30] sm:$0x1] %v2631_v31  ;;  %v2664_v14 = vld [vmem:[#allocation2 + $0x44] sm:$0x1] }
 0x1e8   : > { %v2665_v45 = vsel %vm6912_vm3, 0, %v2664_v14 }
 0x1e9   : > { %2666 = vst [vmem:[#allocation2 + $0x44] sm:$0x1] %v2665_v45  ;;  %v2661_v19 = vld [vmem:[#allocation2 + $0x38] sm:$0x1] }
 0x1ea   : > { %v2662_v60 = vsel %vm6912_vm3, 0, %v2661_v19 }
 0x1eb   : > { %2663 = vst [vmem:[#allocation2 + $0x38] sm:$0x1] %v2662_v60 }
 0x1f1   : > { %v5469_v41 = vpop.f32.mrf.mxu0 }
 0x1f2   : > { %v2228_v40 = vmul.f32 %v5469_v41, %v6859_v48 }
 0x1f3   : > { %v2178_v53 = vpop.f32.mrf.mxu0 }
 0x1f4   : > { %v2253_v47 = vadd.f32 %v6864_v20, %v2228_v40  ;;  %v2226_v46 = vmul.f32 %v6859_v48, %v2178_v53 }
 0x1f5   : > { %v5470_v61 = vpop.f32.mrf.mxu0 }
 0x1f6   : > { %v2273_v42 = vmax.f32 %v2253_v47, 0.0  ;;  %v2251_v30 = vadd.f32 %v6864_v20, %v2226_v46  ;;  %v2229_v43 = vmul.f32 %v5470_v61, %v6859_v48 }
 0x1f7   : > { %v2181_v11 = vpop.f32.mrf.mxu0 }
 0x1f8   : > { %v5398_v56 = vpack.c.bf16 %v2273_v42, %v2273_v42  ;;  %v2271_v51 = vmax.f32 %v2251_v30, 0.0  ;;  %v2254_v44 = vadd.f32 %v6864_v20, %v2229_v43  ;;  %v2227_v17 = vmul.f32 %v6859_v48, %v2181_v11 }
 0x1fa   : > { %v2462_v21 = vshrl.u32 %v5398_v56, 16  ;;  %v5396_v26 = vpack.c.bf16 %v2271_v51, %v2271_v51  ;;  %v2274_v33 = vmax.f32 %v2254_v44, 0.0  ;;  %v2252_v6 = vadd.f32 %v6864_v20, %v2227_v17 }
 0x1fb   : > { %v2465_v55 = vshll.u32 %v5398_v56, 16 }
 0x1fc   : > { %v2464_v36 = vrot.slane %v2462_v21, 7  ;;  %v2445_v57 = vshrl.u32 %v5396_v26, 16  ;;  %v5399_v58 = vpack.c.bf16 %v2274_v33, %v2274_v33  ;;  %v2272_v29 = vmax.f32 %v2252_v6, 0.0 }
 0x1fd   : > { %v2448_v38 = vshll.u32 %v5396_v26, 16 }
 0x1fe   : > { %v2467_v4 = vor.u32 %v2465_v55, %v2464_v36  ;;  %v2447_v0 = vrot.slane %v2445_v57, 7  ;;  %v2470_v8 = vshrl.u32 %v5399_v58, 16  ;;  %v5397_v49 = vpack.c.bf16 %v2272_v29, %v2272_v29 }
 0x1ff   : > { %v2473_v15 = vshll.u32 %v5399_v58, 16  ;;  %v2468_v1 = vrot.slane %v2464_v36, 4 }
 0x200   : > { %v2598_v10 = vsel %vm6876_vm4, %v2467_v4, %v2597_v2  ;;  %v2450_v12 = vor.u32 %v2448_v38, %v2447_v0  ;;  %v2472_v34 = vrot.slane %v2470_v8, 7  ;;  %v2453_v35 = vshrl.u32 %v5397_v49, 16  ;;  %v2611_v4 = vld [vmem:[#allocation2 + $0x6c] sm:$0xf] }
 0x201   : > { %2599 = vst [vmem:[#allocation2 + $0x54] sm:$0xf] %v2598_v10  ;;  %v2456_v54 = vshll.u32 %v5397_v49, 16  ;;  %v2451_v7 = vrot.slane %v2447_v0, 4  ;;  %v2604_v10 = vld [vmem:[#allocation2 + $0x60] sm:$0xf] }
 0x202   : > { %v2591_v13 = vsel %vm6876_vm4, %v2450_v12, %v2590_v25  ;;  %v2475_v9 = vor.u32 %v2473_v15, %v2472_v34  ;;  %v2477_v22 = vrot.slane %v2472_v34, 4  ;;  %v2455_v62 = vrot.slane %v2453_v35, 7 }
 0x203   : > { %2592 = vst [vmem:[#allocation2 + $0x48] sm:$0xf] %v2591_v13 }
 0x204   : > { %v2476_v5 = vsel %vm6889_vm15, %v2468_v1, %v2475_v9  ;;  %v2602_v27 = vsel %vm6882_vm13, %v2477_v22, %v2601_v3  ;;  %v2458_v32 = vor.u32 %v2456_v54, %v2455_v62  ;;  %v2460_v23 = vrot.slane %v2455_v62, 4 }
 0x205   : > { %2600 = vst.msk [vmem:[#allocation2 + $0x58] sm:$0xf] %vm2542_vm0, %v2476_v5  ;;  %2603 = vst [vmem:[#allocation2 + $0x5c] sm:$0x1] %v2602_v27 }
 0x206   : > { %v2459_v50 = vsel %vm6889_vm15, %v2451_v7, %v2458_v32  ;;  %v2595_v24 = vsel %vm6882_vm13, %v2460_v23, %v2594_v63  ;;  %v2608_v63 = vld [vmem:[#allocation2 + $0x68] sm:$0x1] }
 0x207   : > { %2593 = vst.msk [vmem:[#allocation2 + $0x4c] sm:$0xf] %vm2542_vm0, %v2459_v50  ;;  %2596 = vst [vmem:[#allocation2 + $0x50] sm:$0x1] %v2595_v24 }
 0x208   : > { %v2639_v28 = vld [vmem:[#allocation2 + $0x54] sm:$0x1] }
 0x209   : > { %v2640_v31 = vsel %vm6882_vm13, 0, %v2639_v28 }
 0x20a   : > { %2641 = vst [vmem:[#allocation2 + $0x54] sm:$0x1] %v2640_v31  ;;  %v2636_v14 = vld [vmem:[#allocation2 + $0x48] sm:$0x1] }
 0x20b   : > { %v2637_v45 = vsel %vm6882_vm13, 0, %v2636_v14 }
 0x20c   : > { %2638 = vst [vmem:[#allocation2 + $0x48] sm:$0x1] %v2637_v45  ;;  %v2670_v19 = vld [vmem:[#allocation2 + $0x5c] sm:$0x1] }
 0x20d   : > { %v2671_v60 = vsel %vm6912_vm3, 0, %v2670_v19 }
 0x20e   : > { %2672 = vst [vmem:[#allocation2 + $0x5c] sm:$0x1] %v2671_v60  ;;  %v2667_v41 = vld [vmem:[#allocation2 + $0x50] sm:$0x1] }
 0x20f   : > { %v2668_v40 = vsel %vm6912_vm3, 0, %v2667_v41 }
 0x210   : > { %2669 = vst [vmem:[#allocation2 + $0x50] sm:$0x1] %v2668_v40 }
 0x217   : > { %v5473_v53 = vpop.f32.mrf.mxu0 }
 0x218   : > { %v2232_v47 = vmul.f32 %v5473_v53, %v6859_v48 }
 0x219   : > { %v2194_v46 = vpop.f32.mrf.mxu0 }
 0x21a   : > { %v2257_v61 = vadd.f32 %v6864_v20, %v2232_v47  ;;  %v2230_v42 = vmul.f32 %v6859_v48, %v2194_v46 }
 0x21b   : > { %v5474_v30 = vpop.f32.mrf.mxu0 }
 0x21c   : > { %v2277_v43 = vmax.f32 %v2257_v61, 0.0  ;;  %v2255_v11 = vadd.f32 %v6864_v20, %v2230_v42  ;;  %v2233_v56 = vmul.f32 %v5474_v30, %v6859_v48 }
 0x21d   : > { %v2197_v51 = vpop.f32.mrf.mxu0 }
 0x21e   : > { %v5402_v44 = vpack.c.bf16 %v2277_v43, %v2277_v43  ;;  %v2275_v17 = vmax.f32 %v2255_v11, 0.0  ;;  %v2258_v21 = vadd.f32 %v6864_v20, %v2233_v56  ;;  %v2231_v26 = vmul.f32 %v6859_v48, %v2197_v51 }
 0x220   : > { %v2496_v33 = vshrl.u32 %v5402_v44, 16  ;;  %v5400_v6 = vpack.c.bf16 %v2275_v17, %v2275_v17  ;;  %v2278_v36 = vmax.f32 %v2258_v21, 0.0  ;;  %v2256_v55 = vadd.f32 %v6864_v20, %v2231_v26  ;;  %v2615_v20 = vld [vmem:[#allocation2 + $0x74] sm:$0x1] }
 0x221   : > { %v2499_v58 = vshll.u32 %v5402_v44, 16 }
 0x222   : > { %v2498_v57 = vrot.slane %v2496_v33, 7  ;;  %v2479_v2 = vshrl.u32 %v5400_v6, 16  ;;  %v5403_v29 = vpack.c.bf16 %v2278_v36, %v2278_v36  ;;  %v2276_v0 = vmax.f32 %v2256_v55, 0.0 }
 0x223   : > { %v2482_v25 = vshll.u32 %v5400_v6, 16 }
 0x224   : > { %v2501_v38 = vor.u32 %v2499_v58, %v2498_v57  ;;  %v2481_v8 = vrot.slane %v2479_v2, 7  ;;  %v2504_v49 = vshrl.u32 %v5403_v29, 16  ;;  %v5401_v12 = vpack.c.bf16 %v2276_v0, %v2276_v0 }
 0x225   : > { %v2507_v3 = vshll.u32 %v5403_v29, 16  ;;  %v2502_v1 = vrot.slane %v2498_v57, 4 }
 0x226   : > { %v2612_v48 = vsel %vm6876_vm4, %v2501_v38, %v2611_v4  ;;  %v2484_v34 = vor.u32 %v2482_v25, %v2481_v8  ;;  %v2506_v15 = vrot.slane %v2504_v49, 7  ;;  %v2487_v35 = vshrl.u32 %v5401_v12, 16 }
 0x227   : > { %2613 = vst [vmem:[#allocation2 + $0x6c] sm:$0xf] %v2612_v48  ;;  %v2490_v54 = vshll.u32 %v5401_v12, 16  ;;  %v2485_v7 = vrot.slane %v2481_v8, 4 }
 0x228   : > { %v2605_v13 = vsel %vm6876_vm4, %v2484_v34, %v2604_v10  ;;  %v2509_v9 = vor.u32 %v2507_v3, %v2506_v15  ;;  %v2511_v22 = vrot.slane %v2506_v15, 4  ;;  %v2489_v62 = vrot.slane %v2487_v35, 7 }
 0x229   : > { %2606 = vst [vmem:[#allocation2 + $0x60] sm:$0xf] %v2605_v13 }
 0x22a   : > { %v2510_v5 = vsel %vm6889_vm15, %v2502_v1, %v2509_v9  ;;  %v2616_v27 = vsel %vm6882_vm13, %v2511_v22, %v2615_v20  ;;  %v2492_v32 = vor.u32 %v2490_v54, %v2489_v62  ;;  %v2494_v23 = vrot.slane %v2489_v62, 4 }
 0x22b   : > { %2614 = vst.msk [vmem:[#allocation2 + $0x70] sm:$0xf] %vm2542_vm0, %v2510_v5  ;;  %2617 = vst [vmem:[#allocation2 + $0x74] sm:$0x1] %v2616_v27 }
 0x22c   : > { %v2493_v52 = vsel %vm6889_vm15, %v2485_v7, %v2492_v32  ;;  %v2609_v50 = vsel %vm6882_vm13, %v2494_v23, %v2608_v63 }
 0x22d   : > { %2607 = vst.msk [vmem:[#allocation2 + $0x64] sm:$0xf] %vm2542_vm0, %v2493_v52  ;;  %2610 = vst [vmem:[#allocation2 + $0x68] sm:$0x1] %v2609_v50 }
 0x22e   : > { %v2645_v24 = vld [vmem:[#allocation2 + $0x6c] sm:$0x1] }
 0x22f   : > { %v2646_v28 = vsel %vm6882_vm13, 0, %v2645_v24 }
 0x230   : > { %2647 = vst [vmem:[#allocation2 + $0x6c] sm:$0x1] %v2646_v28  ;;  %v2642_v31 = vld [vmem:[#allocation2 + $0x60] sm:$0x1] }
 0x231   : > { %v2643_v14 = vsel %vm6882_vm13, 0, %v2642_v31 }
 0x232   : > { %2644 = vst [vmem:[#allocation2 + $0x60] sm:$0x1] %v2643_v14  ;;  %v2676_v45 = vld [vmem:[#allocation2 + $0x74] sm:$0x1]  ;;  %2682 = sbr.rel (%p5201_p13) target bundleno = 570 (0x23a), region = 44 }
 0x233   : > { %v2677_v16 = vsel %vm6912_vm3, 0, %v2676_v45 }
 0x234   : > { %2678 = vst [vmem:[#allocation2 + $0x74] sm:$0x1] %v2677_v16  ;;  %v2673_v19 = vld [vmem:[#allocation2 + $0x68] sm:$0x1] }
 0x235   : > { %v2674_v60 = vsel %vm6912_vm3, 0, %v2673_v19 }
 0x236   : > { %2675 = vst [vmem:[#allocation2 + $0x68] sm:$0x1] %v2674_v60 }
 0x237   : > { %v5794_v41 = vmov 0  }
 0x238   : > { %2683 = vst.msk [vmem:[#allocation2] sm:$0xf] %vm2542_vm0, %v5794_v41  ;;  %2684 = vst.msk [vmem:[#allocation2 + $0x4] sm:$0xf] %vm2542_vm0, %v5794_v41 }
 0x239   : > { %2686 = vst.msk [vmem:[#allocation2 + $0x8] sm:$0x1] %vm2550_vm9, %v5794_v41 }
 0x23a PF: > { %p5202_p0 = scmp.ne.s32.totalorder %s5768_s21, 1 }
 0x23c   : > { %2690 = sbr.rel (%p5202_p0) target bundleno = 580 (0x244), region = 48 }
 0x241   : > { %v5795_v59 = vmov 0  }
 0x242   : > { %2692 = vst.msk [vmem:[#allocation2 + $0x6c] sm:$0xf] %vm2542_vm0, %v5795_v59  ;;  %2693 = vst.msk [vmem:[#allocation2 + $0x70] sm:$0xf] %vm2542_vm0, %v5795_v59 }
 0x243   : > { %2695 = vst.msk [vmem:[#allocation2 + $0x74] sm:$0x1] %vm2550_vm9, %v5795_v59 }
 0x244 PF: > { %v2697_v18 = vld [vmem:[#allocation2 + $0x4] sm:$0xf]  ;;  %v2712_v40 = vld [vmem:[#allocation2 + $0x8] sm:$0x1]  ;;  %v2912_v53 = vld [vmem:[#allocation2] sm:$0xe] }
 0x245   : > { %v5203_v47 = vrot.slane %v2912_v53, 9  ;;  %v2946_v46 = vrot.slane %v2697_v18, 5  ;;  %v2949_v61 = vrot.slane %v2712_v40, 5  ;;  %v3001_v42 = vld [vmem:[#allocation2 + $0xc] sm:$0xf]  ;;  %v2730_v35 = vshll.u32 %v2697_v18, 16 }
 0x246   : > { %v3002_v30 = vld [vmem:[#allocation2 + $0x10] sm:$0xf]  ;;  %v3026_v43 = vshrl.u32 %v3001_v42, 16  ;;  %v3029_v11 = vshll.u32 %v3001_v42, 16  ;;  %v3017_v56 = vld [vmem:[#allocation2 + $0x14] sm:$0x1] }
 0x247   : > { %v2947_v51 = vsel %vm5953_vm2, %v5203_v47, %v2946_v46  ;;  %v2948_v44 = vrot.slane %v2946_v46, 4  ;;  %v5251_v17 = vcombine.low %v3001_v42, %v3002_v30  ;;  %v3217_v21 = vld [vmem:[#allocation2 + $0xc] sm:$0xe]  ;;  %v3251_v26 = vrot.slane %v3002_v30, 5  ;;  %v3306_v33 = vld [vmem:[#allocation2 + $0x18] sm:$0xf] }
 0x248   : > { %v3028_v6 = vrot.slane %v3026_v43, 4  ;;  %v3031_v36 = vrot.slane %v3029_v11, 5  ;;  %v5211_v55 = vrot.slane %v3217_v21, 9  ;;  %v3254_v57 = vrot.slane %v3017_v56, 5  ;;  %v3307_v58 = vld [vmem:[#allocation2 + $0x1c] sm:$0xf] }
 0x249   : > { %v2950_v2 = vsel %vm5953_vm2, %v2948_v44, %v2949_v61  ;;  %3754 = vrot.lane.b32.xlu1 %v5251_v17, %s5787_s30  ;;  %v3253_v29 = vrot.slane %v3251_v26, 4  ;;  %v3331_v4 = vshrl.u32 %v3306_v33, 16  ;;  %v3334_v0 = vshll.u32 %v3306_v33, 16  ;;  %v2696_v38 = vld [vmem:[#allocation2] sm:$0xf]  ;;  %s5796_s14 = smov 96  }
 0x24a   : > { %v5243_v8 = vcombine.low %v2947_v51, %v2950_v2  ;;  %v3252_v25 = vsel %vm5953_vm2, %v5211_v55, %v3251_v26  ;;  %v5275_v49 = vcombine.low %v3306_v33, %v3307_v58  ;;  %v2721_v10 = vshrl.u32 %v2696_v38, 16  ;;  %v3322_v50 = vld [vmem:[#allocation2 + $0x20] sm:$0x1]  ;;  %s5797_s12 = smov 80   ;;  %v2698_v45 = vld [vmem:[#allocation2 + $0xc] sm:$0xf] }
 0x24b   : > { %v3255_v12 = vsel %vm5953_vm2, %v3253_v29, %v3254_v57  ;;  %v3333_v48 = vrot.slane %v3331_v4, 4  ;;  %v3336_v34 = vrot.slane %v3334_v0, 5  ;;  %v2724_v15 = vshll.u32 %v2696_v38, 16  ;;  %v2699_v47 = vld [vmem:[#allocation2 + $0x10] sm:$0xf]  ;;  %s5798_s27 = smov 112  }
 0x24c   : > { %3706 = vrot.lane.b32.xlu0 %v5243_v8, %s5791_s13  ;;  %v5267_v3 = vcombine.low %v3252_v25, %v3255_v12  ;;  %v2723_v20 = vrot.slane %v2721_v10, 4  ;;  %v2734_v1 = vshrl.u32 %v2697_v18, 16  ;;  %v2740_v9 = vshll.u32 %v2712_v40, 16  ;;  %v2913_v17 = vld [vmem:[#allocation2 + $0xc] sm:$0xe]  ;;  %s5379_s17 = sshll.u32 %s5772_s22, 5 }
 0x24d   : > { %3882 = vrot.lane.b32.xlu1 %v5275_v49, %s5796_s14  ;;  %v2726_v13 = vrot.slane %v2724_v15, 5  ;;  %v3032_v22 = vor.u32 %v3031_v36, %v3028_v6  ;;  %v3035_v62 = vshll.u32 %v3002_v30, 16  ;;  %v2732_v54 = vrot.slane %v2730_v35, 5  ;;  %v7072_v2 = vld [vmem:[#allocation2 + $0x18] sm:$0xf]  ;;  %s7854_s8 = sand.u32 1, %s5760_s19  }
 0x24e   : > { %v2736_v5 = vrot.slane %v2734_v1, 4  ;;  %v3039_v27 = vshrl.u32 %v3002_v30, 16  ;;  %v3045_v63 = vshll.u32 %v3017_v56, 16  ;;  %v2742_v32 = vrot.slane %v2740_v9, 5  ;;  %v2713_v30 = vld [vmem:[#allocation2 + $0x14] sm:$0x1] }
 0x24f   : > { %v2727_v7 = vor.u32 %v2726_v13, %v2723_v20  ;;  %v3033_v23 = vrot.slane %v3032_v22, 4  ;;  %v3037_v52 = vrot.slane %v3035_v62, 5  ;;  %v3337_v14 = vor.u32 %v3336_v34, %v3333_v48  ;;  %v3004_v15 = vld [vmem:[#allocation2 + $0x1c] sm:$0xf]  ;;  %v3018_v9 = vld [vmem:[#allocation2 + $0x20] sm:$0x1] }
 0x250   : > { %3834 = vrot.lane.b32.xlu0 %v5267_v3, %s5797_s12  ;;  %v2737_v24 = vor.u32 %v2736_v5, %v2732_v54  ;;  %v3041_v28 = vrot.slane %v3039_v27, 4  ;;  %v3047_v31 = vrot.slane %v3045_v63, 5  ;;  %v3340_v60 = vshll.u32 %v3307_v58, 16  ;;  %v3218_v22 = vld [vmem:[#allocation2 + $0x18] sm:$0xe]  ;;  %s5800_s15 = smov [#allocation3]  }
 0x251   : > { %v2728_v16 = vrot.slane %v2727_v7, 4  ;;  %v3038_v19 = vsel %vm6000_vm5, %v3033_v23, %v3037_v52  ;;  %v3344_v41 = vshrl.u32 %v3307_v58, 16  ;;  %v3338_v40 = vrot.slane %v3337_v14, 4 }
 0x252   : > { %v2738_v59 = vrot.slane %v2737_v24, 4  ;;  %v3042_v18 = vor.u32 %v3041_v28, %v3037_v52  ;;  %v3350_v53 = vshll.u32 %v3322_v50, 16  ;;  %v3342_v61 = vrot.slane %v3340_v60, 5 }
 0x253   : > { %v2733_v46 = vsel %vm6000_vm5, %v2728_v16, %v2732_v54  ;;  %v3346_v42 = vrot.slane %v3344_v41, 4  ;;  %v2745_v43 = vshrl.u32 %v2698_v45, 16  ;;  %v2748_v44 = vshll.u32 %v2698_v45, 16 }
 0x254   : > { %v2743_v11 = vsel %vm6000_vm5, %v2738_v59, %v2742_v32  ;;  %v3043_v56 = vrot.slane %v3042_v18, 4  ;;  %v3352_v51 = vrot.slane %v3350_v53, 5  ;;  %v3343_v26 = vsel %vm6000_vm5, %v3338_v40, %v3342_v61  ;;  %v3309_v40 = vld [vmem:[#allocation2 + $0x28] sm:$0xf] }
 0x255   : > { %v5235_v21 = vcombine.low %v2733_v46, %v2743_v11  ;;  %v3347_v33 = vor.u32 %v3346_v42, %v3342_v61  ;;  %v2747_v6 = vrot.slane %v2745_v43, 4  ;;  %v2750_v55 = vrot.slane %v2748_v44, 5  ;;  %v3323_v42 = vld [vmem:[#allocation2 + $0x2c] sm:$0x1] }
 0x256   : > { %v3048_v36 = vsel %vm6000_vm5, %v3043_v56, %v3047_v31  ;;  %v2754_v57 = vshll.u32 %v2699_v47, 16  ;;  %v2758_v58 = vshrl.u32 %v2699_v47, 16  ;;  %v2764_v0 = vshll.u32 %v2713_v30, 16  ;;  %v7088_v31 = vld [vmem:[#allocation2 + $0x24] sm:$0xf] }
 0x257   : > { %3666 = vrot.lane.b32.xlu0 %v5235_v21, %s5789_s9  ;;  %v5259_v29 = vcombine.low %v3038_v19, %v3048_v36  ;;  %v3348_v4 = vrot.slane %v3347_v33, 4  ;;  %v5204_v38 = vrot.slane %v2913_v17, 9  ;;  %v2751_v8 = vor.u32 %v2750_v55, %v2747_v6 }
 0x258   : > { %v2756_v25 = vrot.slane %v2754_v57, 5  ;;  %v2760_v49 = vrot.slane %v2758_v58, 4  ;;  %v2953_v10 = vrot.slane %v2699_v47, 5  ;;  %v2766_v48 = vrot.slane %v2764_v0, 5  ;;  %v2701_v57 = vld [vmem:[#allocation2 + $0x1c] sm:$0xf] }
 0x259   : > { %3794 = vrot.lane.b32.xlu1 %v5259_v29, %s5793_s16  ;;  %v3353_v12 = vsel %vm6000_vm5, %v3348_v4, %v3352_v51  ;;  %v2956_v34 = vrot.slane %v2713_v30, 5  ;;  %v3050_v3 = vshrl.u32 %v7072_v2, 16  ;;  %v2752_v35 = vrot.slane %v2751_v8, 4  ;;  %v2714_v0 = vld [vmem:[#allocation2 + $0x20] sm:$0x1] }
 0x25a   : > { %v5283_v20 = vcombine.low %v3343_v26, %v3353_v12  ;;  %v2761_v1 = vor.u32 %v2760_v49, %v2756_v25  ;;  %v2954_v13 = vsel %vm5953_vm2, %v5204_v38, %v2953_v10  ;;  %v2955_v62 = vrot.slane %v2953_v10, 4  ;;  %v2700_v26 = vld [vmem:[#allocation2 + $0x18] sm:$0xf] }
 0x25b   : > { %v3052_v54 = vrot.slane %v3050_v3, 4  ;;  %v3053_v5 = vshll.u32 %v7072_v2, 16  ;;  %v5252_v27 = vcombine.low %v7072_v2, %v3004_v15  ;;  %v2757_v63 = vsel %vm6000_vm5, %v2752_v35, %v2756_v25  ;;  %v2914_v38 = vld [vmem:[#allocation2 + $0x18] sm:$0xe] }
 0x25c   : > { %3922 = vrot.lane.b32.xlu0 %v5283_v20, %s5798_s27  ;;  %v2762_v7 = vrot.slane %v2761_v1, 4  ;;  %v3059_v32 = vshll.u32 %v3004_v15, 16  ;;  %v3063_v23 = vshrl.u32 %v3004_v15, 16  ;;  %v2957_v52 = vsel %vm5953_vm2, %v2955_v62, %v2956_v34 }
 0x25d   : > { %v3055_v50 = vrot.slane %v3053_v5, 5  ;;  %v3069_v24 = vshll.u32 %v3018_v9, 16  ;;  %v5212_v28 = vrot.slane %v3218_v22, 9  ;;  %v5244_v45 = vcombine.low %v2954_v13, %v2957_v52  ;;  %v7107_v13 = vld [vmem:[#allocation2 + $0x24] sm:$0xf] }
 0x25e   : > { %v2767_v14 = vsel %vm6000_vm5, %v2762_v7, %v2766_v48  ;;  %v3061_v16 = vrot.slane %v3059_v32, 5  ;;  %v3065_v19 = vrot.slane %v3063_v23, 4  ;;  %v3258_v18 = vrot.slane %v3004_v15, 5  ;;  %v3006_v52 = vld [vmem:[#allocation2 + $0x28] sm:$0xf] }
 0x25f   : > { %v5236_v60 = vcombine.low %v2757_v63, %v2767_v14  ;;  %v3056_v41 = vor.u32 %v3055_v50, %v3052_v54  ;;  %v3071_v59 = vrot.slane %v3069_v24, 5  ;;  %v3261_v47 = vrot.slane %v3018_v9, 5 }
 0x260   : > { %3708 = vrot.lane.b32.xlu0 %v5244_v45, %s5791_s13  ;;  %v3066_v53 = vor.u32 %v3065_v19, %v3061_v16  ;;  %v3355_v46 = vshrl.u32 %v7088_v31, 16  ;;  %v3358_v61 = vshll.u32 %v7088_v31, 16  ;;  %v3259_v43 = vsel %vm5953_vm2, %v5212_v28, %v3258_v18 }
 0x261   : > { %3668 = vrot.lane.b32.xlu1 %v5236_v60, %s5789_s9  ;;  %v3057_v30 = vrot.slane %v3056_v41, 4  ;;  %v3260_v11 = vrot.slane %v3258_v18, 4  ;;  %v5276_v56 = vcombine.low %v7088_v31, %v3309_v40  ;;  %v3364_v21 = vshll.u32 %v3309_v40, 16 }
 0x262   : > { %v3067_v51 = vrot.slane %v3066_v53, 4  ;;  %v3357_v44 = vrot.slane %v3355_v46, 4  ;;  %v3360_v17 = vrot.slane %v3358_v61, 5  ;;  %v3368_v36 = vshrl.u32 %v3309_v40, 16  ;;  %v3219_v46 = vld [vmem:[#allocation2 + $0x24] sm:$0xe] }
 0x263   : > { %v3062_v33 = vsel %vm6000_vm5, %v3057_v30, %v3061_v16  ;;  %v3262_v6 = vsel %vm5953_vm2, %v3260_v11, %v3261_v47  ;;  %v3374_v55 = vshll.u32 %v3323_v42, 16  ;;  %v3366_v4 = vrot.slane %v3364_v21, 5  ;;  %v3019_v16 = vld [vmem:[#allocation2 + $0x2c] sm:$0x1]  ;;  %v7127_v11 = vld [vmem:[#allocation2 + $0x30] sm:$0xf] }
 0x264   : > { %v3072_v58 = vsel %vm6000_vm5, %v3067_v51, %v3071_v59  ;;  %v5268_v2 = vcombine.low %v3259_v43, %v3262_v6  ;;  %v3361_v29 = vor.u32 %v3360_v17, %v3357_v44  ;;  %v3370_v25 = vrot.slane %v3368_v36, 4  ;;  %v7129_v21 = vld [vmem:[#allocation2 + $0x34] sm:$0xf] }
 0x265   : > { %3756 = vrot.lane.b32.xlu1 %v5252_v27, %s5787_s30  ;;  %v5260_v8 = vcombine.low %v3062_v33, %v3072_v58  ;;  %v3376_v49 = vrot.slane %v3374_v55, 5  ;;  %v2769_v10 = vshrl.u32 %v2700_v26, 16  ;;  %v2772_v48 = vshll.u32 %v2700_v26, 16 }
 0x266   : > { %v3362_v12 = vrot.slane %v3361_v29, 4  ;;  %v2778_v34 = vshll.u32 %v2701_v57, 16  ;;  %v2782_v15 = vshrl.u32 %v2701_v57, 16  ;;  %v3371_v3 = vor.u32 %v3370_v25, %v3366_v4  ;;  %v3324_v29 = vld [vmem:[#allocation2 + $0x38] sm:$0x1] }
 0x267   : > { %3796 = vrot.lane.b32.xlu0 %v5260_v8, %s5793_s16  ;;  %v2771_v20 = vrot.slane %v2769_v10, 4  ;;  %v2788_v35 = vshll.u32 %v2714_v0, 16  ;;  %v5205_v1 = vrot.slane %v2914_v38, 9  ;;  %v2774_v22 = vrot.slane %v2772_v48, 5  ;;  %v2702_v25 = vld [vmem:[#allocation2 + $0x24] sm:$0xf] }
 0x268   : > { %v3367_v9 = vsel %vm6000_vm5, %v3362_v12, %v3366_v4  ;;  %v2780_v62 = vrot.slane %v2778_v34, 5  ;;  %v2784_v54 = vrot.slane %v2782_v15, 4  ;;  %v3372_v5 = vrot.slane %v3371_v3, 4 }
 0x269   : > { %3836 = vrot.lane.b32.xlu1 %v5268_v2, %s5797_s12  ;;  %v2790_v27 = vrot.slane %v2788_v35, 5  ;;  %v2960_v63 = vrot.slane %v2701_v57, 5  ;;  %v2963_v7 = vrot.slane %v2714_v0, 5  ;;  %v2775_v32 = vor.u32 %v2774_v22, %v2771_v20  ;;  %v2703_v35 = vld [vmem:[#allocation2 + $0x28] sm:$0xf] }
 0x26a   : > { %v2785_v23 = vor.u32 %v2784_v54, %v2780_v62  ;;  %v3074_v50 = vshrl.u32 %v7107_v13, 16  ;;  %v3077_v24 = vshll.u32 %v7107_v13, 16  ;;  %v3377_v28 = vsel %vm6000_vm5, %v3372_v5, %v3376_v49  ;;  %v2715_v22 = vld [vmem:[#allocation2 + $0x2c] sm:$0x1]  ;;  %v2915_v54 = vld [vmem:[#allocation2 + $0x24] sm:$0xe] }
 0x26b   : > { %3884 = vrot.lane.b32.xlu0 %v5276_v56, %s5796_s14  ;;  %v2961_v31 = vsel %vm5953_vm2, %v5205_v1, %v2960_v63  ;;  %v2962_v14 = vrot.slane %v2960_v63, 4  ;;  %v5253_v45 = vcombine.low %v7107_v13, %v3006_v52  ;;  %v5284_v19 = vcombine.low %v3367_v9, %v3377_v28 }
 0x26c   : > { %v2776_v60 = vrot.slane %v2775_v32, 4  ;;  %v2786_v41 = vrot.slane %v2785_v23, 4  ;;  %v3076_v59 = vrot.slane %v3074_v50, 4  ;;  %v3079_v40 = vrot.slane %v3077_v24, 5 }
 0x26d   : > { %v2964_v18 = vsel %vm5953_vm2, %v2962_v14, %v2963_v7  ;;  %v3083_v53 = vshll.u32 %v3006_v52, 16  ;;  %v3087_v47 = vshrl.u32 %v3006_v52, 16  ;;  %3924 = vrot.lane.b32.xlu1 %v5284_v19, %s5798_s27  ;;  %v3093_v43 = vshll.u32 %v3019_v16, 16 }
 0x26e   : > { %v2781_v61 = vsel %vm6000_vm5, %v2776_v60, %v2780_v62  ;;  %v2791_v42 = vsel %vm6000_vm5, %v2786_v41, %v2790_v27  ;;  %v5245_v30 = vcombine.low %v2961_v31, %v2964_v18  ;;  %v3080_v51 = vor.u32 %v3079_v40, %v3076_v59 }
 0x26f   : > { %v5237_v56 = vcombine.low %v2781_v61, %v2791_v42  ;;  %v3085_v44 = vrot.slane %v3083_v53, 5  ;;  %v3089_v17 = vrot.slane %v3087_v47, 4  ;;  %v3095_v26 = vrot.slane %v3093_v43, 5  ;;  %v3008_v47 = vld [vmem:[#allocation2 + $0x34] sm:$0xf] }
 0x270   : > { %v5213_v33 = vrot.slane %v3219_v46, 9  ;;  %v3265_v6 = vrot.slane %v3006_v52, 5  ;;  %v3268_v36 = vrot.slane %v3019_v16, 5  ;;  %v3081_v55 = vrot.slane %v3080_v51, 4  ;;  %v3020_v43 = vld [vmem:[#allocation2 + $0x38] sm:$0x1] }
 0x271   : > { %3670 = vrot.lane.b32.xlu0 %v5237_v56, %s5789_s9  ;;  %v3090_v57 = vor.u32 %v3089_v17, %v3085_v44  ;;  %v3379_v58 = vshrl.u32 %v7127_v11, 16  ;;  %v3382_v2 = vshll.u32 %v7127_v11, 16  ;;  %3710 = vrot.lane.b32.xlu1 %v5245_v30, %s5791_s13  ;;  %v5277_v38 = vcombine.low %v7127_v11, %v7129_v21  ;;  %v3220_v11 = vld [vmem:[#allocation2 + $0x30] sm:$0xe] }
 0x272   : > { %v3266_v4 = vsel %vm5953_vm2, %v5213_v33, %v3265_v6  ;;  %v3267_v0 = vrot.slane %v3265_v6, 4  ;;  %v3388_v8 = vshll.u32 %v7129_v21, 16  ;;  %v3086_v49 = vsel %vm6000_vm5, %v3081_v55, %v3085_v44 }
 0x273   : > { %v3091_v10 = vrot.slane %v3090_v57, 4  ;;  %v3381_v12 = vrot.slane %v3379_v58, 4  ;;  %v3384_v48 = vrot.slane %v3382_v2, 5  ;;  %v3392_v3 = vshrl.u32 %v7129_v21, 16  ;;  %v7166_v2 = vld [vmem:[#allocation2 + $0x3c] sm:$0xf] }
 0x274   : > { %v3269_v34 = vsel %vm5953_vm2, %v3267_v0, %v3268_v36  ;;  %v3390_v15 = vrot.slane %v3388_v8, 5  ;;  %v3398_v20 = vshll.u32 %v3324_v29, 16  ;;  %v2793_v62 = vshrl.u32 %v2702_v25, 16 }
 0x275   : > { %3758 = vrot.lane.b32.xlu0 %v5253_v45, %s5787_s30  ;;  %v3096_v1 = vsel %vm6000_vm5, %v3091_v10, %v3095_v26  ;;  %v5269_v13 = vcombine.low %v3266_v4, %v3269_v34  ;;  %v3385_v9 = vor.u32 %v3384_v48, %v3381_v12  ;;  %v3394_v27 = vrot.slane %v3392_v3, 4  ;;  %v7149_v45 = vld [vmem:[#allocation2 + $0x30] sm:$0xf]  ;;  %v7171_v12 = vld [vmem:[#allocation2 + $0x40] sm:$0xf] }
 0x276   : > { %v5261_v5 = vcombine.low %v3086_v49, %v3096_v1  ;;  %v3400_v63 = vrot.slane %v3398_v20, 5  ;;  %v2796_v7 = vshll.u32 %v2702_v25, 16  ;;  %v2795_v23 = vrot.slane %v2793_v62, 4  ;;  %v3325_v20 = vld [vmem:[#allocation2 + $0x44] sm:$0x1] }
 0x277   : > { %v3386_v32 = vrot.slane %v3385_v9, 4  ;;  %v2802_v52 = vshll.u32 %v2703_v35, 16  ;;  %v2806_v50 = vshrl.u32 %v2703_v35, 16  ;;  %v3395_v24 = vor.u32 %v3394_v27, %v3390_v15 }
 0x278   : > { %3798 = vrot.lane.b32.xlu1 %v5261_v5, %s5793_s16  ;;  %v2798_v28 = vrot.slane %v2796_v7, 5  ;;  %v2812_v31 = vshll.u32 %v2715_v22, 16  ;;  %v5206_v14 = vrot.slane %v2915_v54, 9  ;;  %v2967_v41 = vrot.slane %v2703_v35, 5 }
 0x279   : > { %3838 = vrot.lane.b32.xlu0 %v5269_v13, %s5797_s12  ;;  %v3391_v16 = vsel %vm6000_vm5, %v3386_v32, %v3390_v15  ;;  %v2804_v19 = vrot.slane %v2802_v52, 5  ;;  %v2808_v60 = vrot.slane %v2806_v50, 4  ;;  %v3396_v59 = vrot.slane %v3395_v24, 4  ;;  %v2705_v52 = vld [vmem:[#allocation2 + $0x34] sm:$0xf] }
 0x27a   : > { %v2799_v18 = vor.u32 %v2798_v28, %v2795_v23  ;;  %v2814_v40 = vrot.slane %v2812_v31, 5  ;;  %v2970_v53 = vrot.slane %v2715_v22, 5  ;;  %v2968_v61 = vsel %vm5953_vm2, %v5206_v14, %v2967_v41  ;;  %v2704_v22 = vld [vmem:[#allocation2 + $0x30] sm:$0xf]  ;;  %v2716_v50 = vld [vmem:[#allocation2 + $0x38] sm:$0x1] }
 0x27b   : > { %v2809_v46 = vor.u32 %v2808_v60, %v2804_v19  ;;  %v2969_v42 = vrot.slane %v2967_v41, 4  ;;  %v3098_v30 = vshrl.u32 %v7149_v45, 16  ;;  %v3401_v56 = vsel %vm6000_vm5, %v3396_v59, %v3400_v63 }
 0x27c   : > { %3886 = vrot.lane.b32.xlu1 %v5277_v38, %s5796_s14  ;;  %v2800_v51 = vrot.slane %v2799_v18, 4  ;;  %v3101_v44 = vshll.u32 %v7149_v45, 16  ;;  %v5254_v17 = vcombine.low %v7149_v45, %v3008_v47  ;;  %v5285_v21 = vcombine.low %v3391_v16, %v3401_v56 }
 0x27d   : > { %v2810_v26 = vrot.slane %v2809_v46, 4  ;;  %v2971_v33 = vsel %vm5953_vm2, %v2969_v42, %v2970_v53  ;;  %v3100_v6 = vrot.slane %v3098_v30, 4  ;;  %v3107_v58 = vshll.u32 %v3008_v47, 16  ;;  %v2916_v53 = vld [vmem:[#allocation2 + $0x30] sm:$0xe] }
 0x27e   : > { %v2805_v36 = vsel %vm6000_vm5, %v2800_v51, %v2804_v19  ;;  %v5246_v55 = vcombine.low %v2968_v61, %v2971_v33  ;;  %v3103_v57 = vrot.slane %v3101_v44, 5  ;;  %3926 = vrot.lane.b32.xlu0 %v5285_v21, %s5798_s27  ;;  %v3111_v4 = vshrl.u32 %v3008_v47, 16  ;;  %v7190_v30 = vld [vmem:[#allocation2 + $0x3c] sm:$0xf]  ;;  %v7192_v44 = vld [vmem:[#allocation2 + $0x40] sm:$0xf] }
 0x27f   : > { %v2815_v29 = vsel %vm6000_vm5, %v2810_v26, %v2814_v40  ;;  %v3117_v0 = vshll.u32 %v3020_v43, 16  ;;  %v5214_v38 = vrot.slane %v3220_v11, 9  ;;  %v3109_v49 = vrot.slane %v3107_v58, 5  ;;  %v3021_v58 = vld [vmem:[#allocation2 + $0x44] sm:$0x1] }
 0x280   : > { %v5238_v8 = vcombine.low %v2805_v36, %v2815_v29  ;;  %v3104_v25 = vor.u32 %v3103_v57, %v3100_v6  ;;  %v3272_v10 = vrot.slane %v3008_v47, 5  ;;  %v3113_v48 = vrot.slane %v3111_v4, 4 }
 0x281   : > { %v3119_v34 = vrot.slane %v3117_v0, 5  ;;  %v3275_v15 = vrot.slane %v3020_v43, 5  ;;  %v3403_v3 = vshrl.u32 %v7166_v2, 16  ;;  %v3406_v9 = vshll.u32 %v7166_v2, 16 }
 0x282   : > { %3672 = vrot.lane.b32.xlu1 %v5238_v8, %s5789_s9  ;;  %v3105_v35 = vrot.slane %v3104_v25, 4  ;;  %v3273_v1 = vsel %vm5953_vm2, %v5214_v38, %v3272_v10  ;;  %v3274_v13 = vrot.slane %v3272_v10, 4  ;;  %3712 = vrot.lane.b32.xlu0 %v5246_v55, %s5791_s13  ;;  %v3114_v62 = vor.u32 %v3113_v48, %v3109_v49  ;;  %v3221_v38 = vld [vmem:[#allocation2 + $0x3c] sm:$0xe] }
 0x283   : > { %v3405_v54 = vrot.slane %v3403_v3, 4  ;;  %v5278_v5 = vcombine.low %v7166_v2, %v7171_v12  ;;  %v3412_v27 = vshll.u32 %v7171_v12, 16  ;;  %v3408_v32 = vrot.slane %v3406_v9, 5 }
 0x284   : > { %v3110_v63 = vsel %vm6000_vm5, %v3105_v35, %v3109_v49  ;;  %v3276_v7 = vsel %vm5953_vm2, %v3274_v13, %v3275_v15  ;;  %v3416_v23 = vshrl.u32 %v7171_v12, 16  ;;  %v3115_v24 = vrot.slane %v3114_v62, 4  ;;  %v7204_v12 = vld [vmem:[#allocation2 + $0x48] sm:$0xf] }
 0x285   : > { %v5270_v28 = vcombine.low %v3273_v1, %v3276_v7  ;;  %v3414_v31 = vrot.slane %v3412_v27, 5  ;;  %v3422_v14 = vshll.u32 %v3325_v20, 16  ;;  %v3409_v45 = vor.u32 %v3408_v32, %v3405_v54  ;;  %v7215_v20 = vld [vmem:[%s7836_s3] sm:$0xf] }
 0x286   : > { %3760 = vrot.lane.b32.xlu1 %v5254_v17, %s5787_s30  ;;  %v3418_v16 = vrot.slane %v3416_v23, 4  ;;  %v2817_v19 = vshrl.u32 %v2704_v22, 16  ;;  %v2820_v60 = vshll.u32 %v2704_v22, 16  ;;  %v3120_v41 = vsel %vm6000_vm5, %v3115_v24, %v3119_v34  ;;  %5494 = vmatprep.subr.msk.bf16.mxu0 %vm2092_vm8, %v7215_v20  ;;  %v7226_v23 = vld [vmem:[#allocation2 + $0x4c] sm:$0xf] }
 0x287   : > { %v3424_v59 = vrot.slane %v3422_v14, 5  ;;  %v2826_v18 = vshll.u32 %v2705_v52, 16  ;;  %v2830_v40 = vshrl.u32 %v2705_v52, 16  ;;  %v5262_v47 = vcombine.low %v3110_v63, %v3120_v41 }
 0x288   : > { %v3410_v46 = vrot.slane %v3409_v45, 4  ;;  %v3419_v61 = vor.u32 %v3418_v16, %v3414_v31  ;;  %v2819_v42 = vrot.slane %v2817_v19, 4  ;;  %v2822_v43 = vrot.slane %v2820_v60, 5 }
 0x289   : > { %v2828_v11 = vrot.slane %v2826_v18, 5  ;;  %v2832_v56 = vrot.slane %v2830_v40, 4  ;;  %v2836_v51 = vshll.u32 %v2716_v50, 16  ;;  %3800 = vrot.lane.b32.xlu0 %v5262_v47, %s5793_s16  ;;  %v5207_v26 = vrot.slane %v2916_v53, 9  ;;  %v2706_v40 = vld [vmem:[#allocation2 + $0x3c] sm:$0xf] }
 0x28a   : > { %3840 = vrot.lane.b32.xlu1 %v5270_v28, %s5797_s12  ;;  %v3415_v17 = vsel %vm6000_vm5, %v3410_v46, %v3414_v31  ;;  %v3420_v21 = vrot.slane %v3419_v61, 4  ;;  %v2974_v33 = vrot.slane %v2705_v52, 5  ;;  %v2823_v6 = vor.u32 %v2822_v43, %v2819_v42  ;;  %v3326_v31 = vld [vmem:[#allocation2 + $0x50] sm:$0x1]  ;;  %v2707_v42 = vld [vmem:[#allocation2 + $0x40] sm:$0xf] }
 0x28b   : > { %v2833_v36 = vor.u32 %v2832_v56, %v2828_v11  ;;  %v2838_v55 = vrot.slane %v2836_v51, 5  ;;  %v2977_v57 = vrot.slane %v2716_v50, 5  ;;  %v3122_v0 = vshrl.u32 %v7190_v30, 16 }
 0x28c   : > { %v3425_v2 = vsel %vm6000_vm5, %v3420_v21, %v3424_v59  ;;  %v2975_v29 = vsel %vm5953_vm2, %v5207_v26, %v2974_v33  ;;  %v2976_v4 = vrot.slane %v2974_v33, 4  ;;  %v2824_v25 = vrot.slane %v2823_v6, 4 }
 0x28d   : > { %v5286_v8 = vcombine.low %v3415_v17, %v3425_v2  ;;  %v2834_v49 = vrot.slane %v2833_v36, 4  ;;  %v3125_v10 = vshll.u32 %v7190_v30, 16  ;;  %3888 = vrot.lane.b32.xlu0 %v5278_v5, %s5796_s14  ;;  %v3124_v34 = vrot.slane %v3122_v0, 4  ;;  %v2717_v17 = vld [vmem:[#allocation2 + $0x44] sm:$0x1] }
 0x28e   : > { %v2978_v48 = vsel %vm5953_vm2, %v2976_v4, %v2977_v57  ;;  %v5255_v15 = vcombine.low %v7190_v30, %v7192_v44  ;;  %v3131_v3 = vshll.u32 %v7192_v44, 16  ;;  %v2829_v35 = vsel %vm6000_vm5, %v2824_v25, %v2828_v11  ;;  %v2917_v57 = vld [vmem:[#allocation2 + $0x3c] sm:$0xe]  ;;  %v7245_v0 = vld [vmem:[#allocation2 + $0x48] sm:$0xf] }
 0x28f   : > { %3928 = vrot.lane.b32.xlu1 %v5286_v8, %s5798_s27  ;;  %v2839_v1 = vsel %vm6000_vm5, %v2834_v49, %v2838_v55  ;;  %v5247_v13 = vcombine.low %v2975_v29, %v2978_v48  ;;  %v3127_v9 = vrot.slane %v3125_v10, 5  ;;  %v3135_v54 = vshrl.u32 %v7192_v44, 16 }
 0x290   : > { %v5239_v22 = vcombine.low %v2829_v35, %v2839_v1  ;;  %v3133_v62 = vrot.slane %v3131_v3, 5  ;;  %v3141_v5 = vshll.u32 %v3021_v58, 16  ;;  %v5215_v63 = vrot.slane %v3221_v38, 9  ;;  %v3012_v1 = vld [vmem:[#allocation2 + $0x4c] sm:$0xf] }
 0x291   : > { %v3128_v27 = vor.u32 %v3127_v9, %v3124_v34  ;;  %v3279_v7 = vrot.slane %v7192_v44, 5  ;;  %v3282_v32 = vrot.slane %v3021_v58, 5  ;;  %v3137_v52 = vrot.slane %v3135_v54, 4 }
 0x292   : > { %3674 = vrot.lane.b32.xlu0 %v5239_v22, %s5789_s9  ;;  %v3143_v50 = vrot.slane %v3141_v5, 5  ;;  %v3427_v24 = vshrl.u32 %v7204_v12, 16  ;;  %v3430_v28 = vshll.u32 %v7204_v12, 16  ;;  %v5279_v19 = vcombine.low %v7204_v12, %v7226_v23  ;;  %v3022_v5 = vld [vmem:[#allocation2 + $0x50] sm:$0x1] }
 0x293   : > { %3714 = vrot.lane.b32.xlu1 %v5247_v13, %s5791_s13  ;;  %v3129_v14 = vrot.slane %v3128_v27, 4  ;;  %v3280_v45 = vsel %vm5953_vm2, %v5215_v63, %v3279_v7  ;;  %v3281_v16 = vrot.slane %v3279_v7, 4  ;;  %v3138_v60 = vor.u32 %v3137_v52, %v3133_v62 }
 0x294   : > { %v3429_v41 = vrot.slane %v3427_v24, 4  ;;  %v3432_v59 = vrot.slane %v3430_v28, 5  ;;  %v3436_v18 = vshll.u32 %v7226_v23, 16  ;;  %v3440_v46 = vshrl.u32 %v7226_v23, 16  ;;  %v3222_v23 = vld [vmem:[#allocation2 + $0x48] sm:$0xe] }
 0x295   : > { %v3134_v53 = vsel %vm6000_vm5, %v3129_v14, %v3133_v62  ;;  %v3283_v47 = vsel %vm5953_vm2, %v3281_v16, %v3282_v32  ;;  %v3446_v61 = vshll.u32 %v3326_v31, 16  ;;  %v3139_v30 = vrot.slane %v3138_v60, 4  ;;  %v7266_v60 = vld [vmem:[#allocation2 + $0x54] sm:$0xf] }
 0x296   : > { %3762 = vrot.lane.b32.xlu0 %v5255_v15, %s5787_s30  ;;  %v5271_v43 = vcombine.low %v3280_v45, %v3283_v47  ;;  %v3433_v11 = vor.u32 %v3432_v59, %v3429_v41  ;;  %v3438_v56 = vrot.slane %v3436_v18, 5  ;;  %v3442_v51 = vrot.slane %v3440_v46, 4 }
 0x297   : > { %v3448_v44 = vrot.slane %v3446_v61, 5  ;;  %v2841_v21 = vshrl.u32 %v2706_v40, 16  ;;  %v2844_v26 = vshll.u32 %v2706_v40, 16  ;;  %v3144_v33 = vsel %vm6000_vm5, %v3139_v30, %v3143_v50  ;;  %v7268_v61 = vld [vmem:[#allocation2 + $0x58] sm:$0xf] }
 0x298   : > { %v3434_v6 = vrot.slane %v3433_v11, 4  ;;  %v2850_v36 = vshll.u32 %v2707_v42, 16  ;;  %v2854_v55 = vshrl.u32 %v2707_v42, 16  ;;  %v5263_v58 = vcombine.low %v3134_v53, %v3144_v33 }
 0x299   : > { %v3443_v2 = vor.u32 %v3442_v51, %v3438_v56  ;;  %v2843_v29 = vrot.slane %v2841_v21, 4  ;;  %v2846_v4 = vrot.slane %v2844_v26, 5  ;;  %v2860_v49 = vshll.u32 %v2717_v17, 16 }
 0x29a   : > { %3842 = vrot.lane.b32.xlu0 %v5271_v43, %s5797_s12  ;;  %v3439_v38 = vsel %vm6000_vm5, %v3434_v6, %v3438_v56  ;;  %v2852_v8 = vrot.slane %v2850_v36, 5  ;;  %v2856_v25 = vrot.slane %v2854_v55, 4  ;;  %3802 = vrot.lane.b32.xlu1 %v5263_v58, %s5793_s16  ;;  %v5208_v48 = vrot.slane %v2917_v57, 9  ;;  %v3327_v56 = vld [vmem:[#allocation2 + $0x5c] sm:$0x1] }
 0x29b   : > { %v3444_v10 = vrot.slane %v3443_v2, 4  ;;  %v2847_v12 = vor.u32 %v2846_v4, %v2843_v29  ;;  %v2981_v34 = vrot.slane %v2707_v42, 5  ;;  %v2862_v3 = vrot.slane %v2860_v49, 5  ;;  %v2708_v55 = vld [vmem:[#allocation2 + $0x48] sm:$0xf] }
 0x29c   : > { %v2857_v15 = vor.u32 %v2856_v25, %v2852_v8  ;;  %v2984_v35 = vrot.slane %v2717_v17, 5  ;;  %v3146_v13 = vshrl.u32 %v7245_v0, 16  ;;  %v3149_v32 = vshll.u32 %v7245_v0, 16  ;;  %v2709_v4 = vld [vmem:[#allocation2 + $0x4c] sm:$0xf] }
 0x29d   : > { %v3449_v9 = vsel %vm6000_vm5, %v3444_v10, %v3448_v44  ;;  %v2848_v22 = vrot.slane %v2847_v12, 4  ;;  %v2982_v62 = vsel %vm5953_vm2, %v5208_v48, %v2981_v34  ;;  %v2983_v54 = vrot.slane %v2981_v34, 4  ;;  %v2718_v49 = vld [vmem:[#allocation2 + $0x50] sm:$0x1] }
 0x29e   : > { %v5287_v27 = vcombine.low %v3439_v38, %v3449_v9  ;;  %v2858_v63 = vrot.slane %v2857_v15, 4  ;;  %v3148_v7 = vrot.slane %v3146_v13, 4  ;;  %3890 = vrot.lane.b32.xlu1 %v5279_v19, %s5796_s14  ;;  %v5256_v24 = vcombine.low %v7245_v0, %v3012_v1  ;;  %v2918_v15 = vld [vmem:[#allocation2 + $0x48] sm:$0xe] }
 0x29f   : > { %v2853_v52 = vsel %vm6000_vm5, %v2848_v22, %v2852_v8  ;;  %v2985_v50 = vsel %vm5953_vm2, %v2983_v54, %v2984_v35  ;;  %v3155_v28 = vshll.u32 %v3012_v1, 16  ;;  %v3151_v45 = vrot.slane %v3149_v32, 5 }
 0x2a0   : > { %3930 = vrot.lane.b32.xlu0 %v5287_v27, %s5798_s27  ;;  %v2863_v31 = vsel %vm6000_vm5, %v2858_v63, %v2862_v3  ;;  %v5248_v14 = vcombine.low %v2982_v62, %v2985_v50  ;;  %v3159_v16 = vshrl.u32 %v3012_v1, 16  ;;  %v3165_v59 = vshll.u32 %v3022_v5, 16 }
 0x2a1   : > { %v5240_v19 = vcombine.low %v2853_v52, %v2863_v31  ;;  %v3157_v41 = vrot.slane %v3155_v28, 5  ;;  %v5216_v18 = vrot.slane %v3222_v23, 9  ;;  %v3152_v40 = vor.u32 %v3151_v45, %v3148_v7 }
 0x2a2   : > { %v3161_v53 = vrot.slane %v3159_v16, 4  ;;  %v3286_v47 = vrot.slane %v3012_v1, 5  ;;  %v3289_v46 = vrot.slane %v3022_v5, 5  ;;  %v3167_v42 = vrot.slane %v3165_v59, 5  ;;  %v7287_v5 = vld [vmem:[#allocation2 + $0x54] sm:$0xf] }
 0x2a3   : > { %3676 = vrot.lane.b32.xlu1 %v5240_v19, %s5789_s9  ;;  %v3451_v30 = vshrl.u32 %v7266_v60, 16  ;;  %v3454_v43 = vshll.u32 %v7266_v60, 16  ;;  %v5280_v11 = vcombine.low %v7266_v60, %v7268_v61  ;;  %v3153_v51 = vrot.slane %v3152_v40, 4  ;;  %v3223_v40 = vld [vmem:[#allocation2 + $0x54] sm:$0xe] }
 0x2a4   : > { %3716 = vrot.lane.b32.xlu0 %v5248_v14, %s5791_s13  ;;  %v3162_v44 = vor.u32 %v3161_v53, %v3157_v41  ;;  %v3287_v17 = vsel %vm5953_vm2, %v5216_v18, %v3286_v47  ;;  %v3288_v21 = vrot.slane %v3286_v47, 4  ;;  %v3460_v6 = vshll.u32 %v7268_v61, 16  ;;  %v7295_v14 = vld [vmem:[#allocation2 + $0x58] sm:$0xf]  ;;  %v3023_v18 = vld [vmem:[#allocation2 + $0x5c] sm:$0x1] }
 0x2a5   : > { %v3453_v26 = vrot.slane %v3451_v30, 4  ;;  %v3456_v33 = vrot.slane %v3454_v43, 5  ;;  %v3464_v36 = vshrl.u32 %v7268_v61, 16  ;;  %v3158_v57 = vsel %vm6000_vm5, %v3153_v51, %v3157_v41 }
 0x2a6   : > { %v3163_v58 = vrot.slane %v3162_v44, 4  ;;  %v3290_v2 = vsel %vm5953_vm2, %v3288_v21, %v3289_v46  ;;  %v3470_v29 = vshll.u32 %v3327_v56, 16  ;;  %v3462_v8 = vrot.slane %v3460_v6, 5  ;;  %v7311_v21 = vld [vmem:[#allocation2 + $0x60] sm:$0xf] }
 0x2a7   : > { %3764 = vrot.lane.b32.xlu1 %v5256_v24, %s5787_s30  ;;  %v5272_v0 = vcombine.low %v3287_v17, %v3290_v2  ;;  %v3457_v38 = vor.u32 %v3456_v33, %v3453_v26  ;;  %v3466_v25 = vrot.slane %v3464_v36, 4  ;;  %v2865_v48 = vshrl.u32 %v2708_v55, 16 }
 0x2a8   : > { %v3168_v10 = vsel %vm6000_vm5, %v3163_v58, %v3167_v42  ;;  %v3472_v12 = vrot.slane %v3470_v29, 5  ;;  %v2868_v34 = vshll.u32 %v2708_v55, 16  ;;  %v2874_v13 = vshll.u32 %v2709_v4, 16  ;;  %v7316_v29 = vld [vmem:[#allocation2 + $0x64] sm:$0xf] }
 0x2a9   : > { %v5264_v3 = vcombine.low %v3158_v57, %v3168_v10  ;;  %v3458_v35 = vrot.slane %v3457_v38, 4  ;;  %v3467_v1 = vor.u32 %v3466_v25, %v3462_v8  ;;  %v2867_v9 = vrot.slane %v2865_v48, 4  ;;  %v5647_v25 = vld [vmem:[%s7835_s2 + $0x38] sm:$0xff]  }
 0x2aa   : > { %v2870_v22 = vrot.slane %v2868_v34, 5  ;;  %v2878_v62 = vshrl.u32 %v2709_v4, 16  ;;  %v2884_v54 = vshll.u32 %v2718_v49, 16  ;;  %v2876_v7 = vrot.slane %v2874_v13, 5 }
 0x2ab   : > { %3804 = vrot.lane.b32.xlu0 %v5264_v3, %s5793_s16  ;;  %3844 = vrot.lane.b32.xlu1 %v5272_v0, %s5797_s12  ;;  %v3463_v27 = vsel %vm6000_vm5, %v3458_v35, %v3462_v8  ;;  %v3468_v63 = vrot.slane %v3467_v1, 4  ;;  %v5209_v32 = vrot.slane %v2918_v15, 9  ;;  %v2988_v24 = vrot.slane %v2709_v4, 5  ;;  %v7333_v15 = vld [vmem:[#allocation2 + $0x54] sm:$0xf] }
 0x2ac   : > { %v2871_v23 = vor.u32 %v2870_v22, %v2867_v9  ;;  %v2880_v52 = vrot.slane %v2878_v62, 4  ;;  %v2886_v50 = vrot.slane %v2884_v54, 5  ;;  %v2991_v31 = vrot.slane %v2718_v49, 5  ;;  %v7324_v49 = vld [vmem:[#allocation2 + $0x68] sm:$0x1] }
 0x2ad   : > { %v3473_v28 = vsel %vm6000_vm5, %v3468_v63, %v3472_v12  ;;  %v3170_v45 = vshrl.u32 %v7287_v5, 16  ;;  %v3173_v16 = vshll.u32 %v7287_v5, 16  ;;  %v2989_v59 = vsel %vm5953_vm2, %v5209_v32, %v2988_v24  ;;  %v2719_v32 = vld [vmem:[#allocation2 + $0x5c] sm:$0x1] }
 0x2ae   : > { %v5288_v60 = vcombine.low %v3463_v27, %v3473_v28  ;;  %v2872_v19 = vrot.slane %v2871_v23, 4  ;;  %v2881_v41 = vor.u32 %v2880_v52, %v2876_v7  ;;  %v2990_v53 = vrot.slane %v2988_v24, 4  ;;  %v5648_v52 = vld [vmem:[%s7835_s2 + $0x30] sm:$0xff]  }
 0x2af   : > { %3892 = vrot.lane.b32.xlu0 %v5280_v11, %s5796_s14  ;;  %v3172_v47 = vrot.slane %v3170_v45, 4  ;;  %v3175_v46 = vrot.slane %v3173_v16, 5  ;;  %v5257_v61 = vcombine.low %v7287_v5, %v7295_v14  ;;  %v3179_v43 = vshll.u32 %v7295_v14, 16  ;;  %v7341_v5 = vld [vmem:[#allocation2 + $0x58] sm:$0xf] }
 0x2b0   : > { %3932 = vrot.lane.b32.xlu1 %v5288_v60, %s5798_s27  ;;  %v2877_v42 = vsel %vm6000_vm5, %v2872_v19, %v2876_v7  ;;  %v2882_v30 = vrot.slane %v2881_v41, 4  ;;  %v3183_v56 = vshrl.u32 %v7295_v14, 16  ;;  %v2992_v51 = vsel %vm5953_vm2, %v2990_v53, %v2991_v31  ;;  %v7355_v53 = vld [vmem:[#allocation2 + $0x60] sm:$0xf] }
 0x2b1   : > { %v3176_v11 = vor.u32 %v3175_v46, %v3172_v47  ;;  %v3189_v44 = vshll.u32 %v3023_v18, 16  ;;  %v5217_v17 = vrot.slane %v3223_v40, 9  ;;  %v5249_v33 = vcombine.low %v2989_v59, %v2992_v51 }
 0x2b2   : > { %v2887_v26 = vsel %vm6000_vm5, %v2882_v30, %v2886_v50  ;;  %v3181_v6 = vrot.slane %v3179_v43, 5  ;;  %v3185_v36 = vrot.slane %v3183_v56, 4  ;;  %v3293_v2 = vrot.slane %v7295_v14, 5  ;;  %v2919_v50 = vld [vmem:[#allocation2 + $0x54] sm:$0xe]  ;;  %v5650_v30 = vld [vmem:[%s7835_s2 + $0x28] sm:$0xff]  }
 0x2b3   : > { %v5241_v55 = vcombine.low %v2877_v42, %v2887_v26  ;;  %v3177_v57 = vrot.slane %v3176_v11, 4  ;;  %v3191_v58 = vrot.slane %v3189_v44, 5  ;;  %v3296_v0 = vrot.slane %v3023_v18, 5  ;;  %v7367_v26 = vld [vmem:[#allocation2 + $0x64] sm:$0xf] }
 0x2b4   : > { %3718 = vrot.lane.b32.xlu1 %v5249_v33, %s5791_s13  ;;  %v3186_v4 = vor.u32 %v3185_v36, %v3181_v6  ;;  %v3475_v38 = vshrl.u32 %v7311_v21, 16  ;;  %v3478_v8 = vshll.u32 %v7311_v21, 16  ;;  %v3294_v12 = vsel %vm5953_vm2, %v5217_v17, %v3293_v2 }
 0x2b5   : > { %3678 = vrot.lane.b32.xlu0 %v5241_v55, %s5789_s9  ;;  %v3182_v10 = vsel %vm6000_vm5, %v3177_v57, %v3181_v6  ;;  %v3295_v48 = vrot.slane %v3293_v2, 4  ;;  %v5281_v34 = vcombine.low %v7311_v21, %v7316_v29  ;;  %v5799_v9 = vmov 0   ;;  %v3024_v2 = vld [vmem:[#allocation2 + $0x68] sm:$0x1] }
 0x2b6   : > { %v3187_v3 = vrot.slane %v3186_v4, 4  ;;  %v3477_v35 = vrot.slane %v3475_v38, 4  ;;  %v3480_v1 = vrot.slane %v3478_v8, 5  ;;  %4189 = vmatprep.subr.bf16.mxu1 %v5799_v9  ;;  %v3484_v22 = vshll.u32 %v7316_v29, 16  ;;  %v3224_v4 = vld [vmem:[#allocation2 + $0x60] sm:$0xe] }
 0x2b7   : > { %v3297_v13 = vsel %vm5953_vm2, %v3295_v48, %v3296_v0  ;;  %v3488_v62 = vshrl.u32 %v7316_v29, 16  ;;  %v3494_v54 = vshll.u32 %v7324_v49, 16  ;;  %4190 = vmatpush1.bf16.msra.mxu1 %v5647_v25  ;;  %v2889_v23 = vshrl.u32 %v7333_v15, 16 }
 0x2b8   : > { %v3192_v27 = vsel %vm6000_vm5, %v3187_v3, %v3191_v58  ;;  %v5273_v63 = vcombine.low %v3294_v12, %v3297_v13  ;;  %v3481_v7 = vor.u32 %v3480_v1, %v3477_v35  ;;  %v3486_v28 = vrot.slane %v3484_v22, 5  ;;  %4191 = vmatprep.subr.bf16.mxu1 %v5799_v9 }
 0x2b9   : > { %3766 = vrot.lane.b32.xlu0 %v5257_v61, %s5787_s30  ;;  %v5265_v24 = vcombine.low %v3182_v10, %v3192_v27  ;;  %v3490_v31 = vrot.slane %v3488_v62, 4  ;;  %v3496_v14 = vrot.slane %v3494_v54, 5  ;;  %v2891_v16 = vrot.slane %v2889_v23, 4  ;;  %v5651_v10 = vld [vmem:[%s7835_s2 + $0x20] sm:$0xff]   ;;  %v7391_v54 = vld [vmem:[#allocation2 + $0x6c] sm:$0xf] }
 0x2ba   : > { %v3482_v45 = vrot.slane %v3481_v7, 4  ;;  %v2892_v60 = vshll.u32 %v7333_v15, 16  ;;  %v2898_v19 = vshll.u32 %v7341_v5, 16  ;;  %v2902_v59 = vshrl.u32 %v7341_v5, 16  ;;  %v7396_v23 = vld [vmem:[#allocation2 + $0x70] sm:$0xf] }
 0x2bb   : > { %3806 = vrot.lane.b32.xlu1 %v5265_v24, %s5793_s16  ;;  %v3491_v41 = vor.u32 %v3490_v31, %v3486_v28  ;;  %v2908_v18 = vshll.u32 %v2719_v32, 16  ;;  %v5210_v40 = vrot.slane %v2919_v50, 9  ;;  %4192 = vmatpush1.bf16.msra.mxu1 %v5648_v52  ;;  %v2995_v42 = vrot.slane %v7341_v5, 5  ;;  %v7385_v35 = vpop.permute.xlu1 %3754 }
 0x2bc   : > { %v3487_v47 = vsel %vm6000_vm5, %v3482_v45, %v3486_v28  ;;  %v2894_v46 = vrot.slane %v2892_v60, 5  ;;  %v2900_v61 = vrot.slane %v2898_v19, 5  ;;  %v2904_v56 = vrot.slane %v2902_v59, 4  ;;  %4193 = vmatprep.subr.bf16.mxu1 %v5799_v9 }
 0x2bd   : > { %3846 = vrot.lane.b32.xlu0 %v5273_v63, %s5797_s12  ;;  %v3492_v43 = vrot.slane %v3491_v41, 4  ;;  %v2910_v51 = vrot.slane %v2908_v18, 5  ;;  %v2998_v11 = vrot.slane %v2719_v32, 5  ;;  %v2996_v17 = vsel %vm5953_vm2, %v5210_v40, %v2995_v42  ;;  %v7412_v40 = vld [vmem:[#allocation2 + $0x74] sm:$0x1] }
 0x2be   : > { %v2895_v44 = vor.u32 %v2894_v46, %v2891_v16  ;;  %v2997_v21 = vrot.slane %v2995_v42, 4  ;;  %v3194_v33 = vshrl.u32 %v7355_v53, 16  ;;  %v7370_v6 = vpop.permute.xlu0 %3706  ;;  %v2905_v55 = vor.u32 %v2904_v56, %v2900_v61  ;;  %v5318_v56 = vld [vmem:[%s5909_s26 + $0x18] sm:$0xf] }
 0x2bf   : > { %3894 = vrot.lane.b32.xlu1 %v5281_v34, %s5796_s14  ;;  %v3497_v36 = vsel %vm6000_vm5, %v3492_v43, %v3496_v14  ;;  %v3197_v57 = vshll.u32 %v7355_v53, 16  ;;  %v5258_v58 = vcombine.low %v7355_v53, %v7367_v26  ;;  %4194 = vmatpush1.bf16.msra.mxu1 %v5650_v30  ;;  %v3203_v3 = vshll.u32 %v7367_v26, 16  ;;  %v5653_v14 = vld [vmem:[%s7835_s2 + $0x18] sm:$0xff]   ;;  %v7420_v43 = vpop.permute.xlu1 %3882  ;;  %v5655_v53 = vld [vmem:[%s7835_s2 + $0x8] sm:$0xff]  }
 0x2c0   : > { %v5289_v0 = vcombine.low %v3487_v47, %v3497_v36  ;;  %v2896_v38 = vrot.slane %v2895_v44, 4  ;;  %v2999_v8 = vsel %vm5953_vm2, %v2997_v21, %v2998_v11  ;;  %v3196_v25 = vrot.slane %v3194_v33, 4  ;;  %4195 = vmatprep.subr.bf16.mxu1 %v5799_v9  ;;  %v5654_v21 = vld [vmem:[%s7835_s2 + $0x10] sm:$0xff]  }
 0x2c1   : > { %v2906_v12 = vrot.slane %v2905_v55, 4  ;;  %v5250_v48 = vcombine.low %v2996_v17, %v2999_v8  ;;  %v3199_v34 = vrot.slane %v3197_v57, 5  ;;  %v3207_v13 = vshrl.u32 %v7367_v26, 16  ;;  %v5666_v55 = vld [vmem:[#allocation2 + $0x4] sm:$0xf] }
 0x2c2   : > { %3934 = vrot.lane.b32.xlu0 %v5289_v0, %s5798_s27  ;;  %v2901_v1 = vsel %vm6000_vm5, %v2896_v38, %v2900_v61  ;;  %v3213_v22 = vshll.u32 %v3024_v2, 16  ;;  %v5218_v62 = vrot.slane %v3224_v4, 9  ;;  %v3205_v7 = vrot.slane %v3203_v3, 5  ;;  %v7398_v52 = vpop.permute.xlu0 %3834  ;;  %v5667_v57 = vld [vmem:[#allocation2] sm:$0xf] }
 0x2c3   : > { %v2911_v27 = vsel %vm6000_vm5, %v2906_v12, %v2910_v51  ;;  %v3200_v63 = vor.u32 %v3199_v34, %v3196_v25  ;;  %v3300_v32 = vrot.slane %v7367_v26, 5  ;;  %v3209_v24 = vrot.slane %v3207_v13, 4  ;;  %4196 = vmatpush1.bf16.msra.mxu1 %v5651_v10  ;;  %v5319_v25 = vld [vmem:[%s5909_s26 + $0x1c] sm:$0xf] }
 0x2c4   : > { %v5242_v50 = vcombine.low %v2901_v1, %v2911_v27  ;;  %v3215_v28 = vrot.slane %v3213_v22, 5  ;;  %v3303_v31 = vrot.slane %v3024_v2, 5  ;;  %v3499_v19 = vshrl.u32 %v7391_v54, 16  ;;  %4197 = vmatprep.subr.bf16.mxu1 %v5799_v9  ;;  %v5320_v1 = vld [vmem:[%s5909_s26 + $0x20] sm:$0x1] }
 0x2c5   : > { %v3201_v45 = vrot.slane %v3200_v63, 4  ;;  %v3301_v16 = vsel %vm5953_vm2, %v5218_v62, %v3300_v32  ;;  %v3302_v60 = vrot.slane %v3300_v32, 4  ;;  %v3210_v41 = vor.u32 %v3209_v24, %v3205_v7 }
 0x2c6   : > { %3680 = vrot.lane.b32.xlu1 %v5242_v50, %s5789_s9  ;;  %3720 = vrot.lane.b32.xlu0 %v5250_v48, %s5791_s13  ;;  %v3502_v59 = vshll.u32 %v7391_v54, 16  ;;  %v5282_v18 = vcombine.low %v7391_v54, %v7396_v23  ;;  %v3508_v47 = vshll.u32 %v7396_v23, 16  ;;  %v3501_v42 = vrot.slane %v3499_v19, 4  ;;  %v5323_v19 = vld [vmem:[%s5909_s26 + $0x2c] sm:$0x1]  ;;  %v5658_v54 = vld [vmem:[%s7835_s2 + $0x40] sm:$0xff]  }
 0x2c7   : > { %v3206_v46 = vsel %vm6000_vm5, %v3201_v45, %v3205_v7  ;;  %v3304_v61 = vsel %vm5953_vm2, %v3302_v60, %v3303_v31  ;;  %v3512_v30 = vshrl.u32 %v7396_v23, 16  ;;  %v3211_v51 = vrot.slane %v3210_v41, 4  ;;  %4198 = vmatpush1.bf16.msra.mxu1 %v5653_v14  ;;  %v5321_v31 = vld [vmem:[%s5909_s26 + $0x24] sm:$0xf]  ;;  %v5322_v14 = vld [vmem:[%s5909_s26 + $0x28] sm:$0xf] }
 0x2c8   : > { %v5274_v11 = vcombine.low %v3301_v16, %v3304_v61  ;;  %v3504_v44 = vrot.slane %v3502_v59, 5  ;;  %v3510_v17 = vrot.slane %v3508_v47, 5  ;;  %v3518_v36 = vshll.u32 %v7412_v40, 16  ;;  %4199 = vmatprep.subr.bf16.mxu1 %v5799_v9  ;;  %v3522_v41 = vld [vmem:[#allocation2 + $0x18] sm:$0xe]  ;;  %v5657_v47 = vld [vmem:[%s7835_s2] sm:$0xff]  }
 0x2c9   : > { %v3514_v33 = vrot.slane %v3512_v30, 4  ;;  %v5227_v2 = vcombine.low %v5667_v57, %v5666_v55  ;;  %v3667_v4 = vpop.permute.xlu0 %3666  ;;  %vm4034_vm1 = vcmask 654336   ;;  %v3216_v0 = vsel %vm6000_vm5, %v3211_v51, %v3215_v28  ;;  %v5669_v30 = vld [vmem:[#allocation2 + $0x10] sm:$0xf]  ;;  %s4864_s9 = sshll.u32 %s7040_s10, 4  ;;  %s7774_s9 = int_to_ptr.vmem [resolvable:$true] %s4864_s9 }
 0x2ca   : > { %3768 = vrot.lane.b32.xlu1 %v5258_v58, %s5787_s30  ;;  %v3505_v38 = vor.u32 %v3504_v44, %v3501_v42  ;;  %v4594_v8 = vsel %vm2092_vm8, %v7215_v20, 0  ;;  %v4353_v10 = vshrl.u32 %v5318_v56, 16  ;;  %v5266_v12 = vcombine.low %v3206_v46, %v3216_v0  ;;  %v5668_v42 = vld [vmem:[#allocation2 + $0xc] sm:$0xf]  ;;  %s7780_s30 = scalar_lea.sflag [#allocation4], %s7854_s8 }
 0x2cb   : > { %v3515_v48 = vor.u32 %v3514_v33, %v3510_v17  ;;  %v3520_v34 = vrot.slane %v3518_v36, 5  ;;  %v3964_v3 = vsel %vm1888_vm7, %v5227_v2, %v3667_v4  ;;  %5476 = vmatpush3.bf16.msra.mxu0 %v4594_v8  ;;  %4200 = vmatpush1.bf16.msra.mxu1 %v5654_v21  ;;  %v4356_v58 = vshll.u32 %v5318_v56, 16  ;;  %v3795_v62 = vpop.permute.xlu1 %3794 }
 0x2cc   : > { %v3506_v13 = vrot.slane %v3505_v38, 4  ;;  %v3987_v26 = vsel %vm1930_vm10, %v3964_v3, %v7370_v6  ;;  %v4355_v20 = vrot.slane %v4353_v10, 4  ;;  %3808 = vrot.lane.b32.xlu0 %v5266_v12, %s5793_s16  ;;  %4201 = vmatprep.subr.bf16.mxu1 %v5799_v9  ;;  %v4362_v63 = vshll.u32 %v5319_v25, 16 }
 0x2cd   : > { %v3516_v22 = vrot.slane %v3515_v48, 4  ;;  %v4003_v27 = vsel %vm1972_vm12, %v3987_v26, %v7385_v35  ;;  %v4366_v7 = vshrl.u32 %v5319_v25, 16  ;;  %v4358_v24 = vrot.slane %v4356_v58, 5 }
 0x2ce   : > { %3848 = vrot.lane.b32.xlu1 %v5274_v11, %s5797_s12  ;;  %v3511_v6 = vsel %vm6000_vm5, %v3506_v13, %v3510_v17  ;;  %v4019_v32 = vsel %vm2014_vm14, %v4003_v27, %v3795_v62  ;;  %v7452_v50 = vpop.permute.xlu0 %3922  ;;  %v4372_v28 = vshll.u32 %v5320_v1, 16  ;;  %v4364_v16 = vrot.slane %v4362_v63, 5  ;;  %v5671_v1 = vld [vmem:[#allocation2 + $0x20] sm:$0x1]  ;;  %s5692_s12 = scalar_lea.vmem %s7774_s9, 1024 }
 0x2cf   : > { %v3521_v45 = vsel %vm6000_vm5, %v3516_v22, %v3520_v34  ;;  %v4036_v35 = vsel %vm4034_vm1, %v4019_v32, %v7398_v52  ;;  %v4368_v60 = vrot.slane %v4366_v7, 4  ;;  %4202 = vmatpush1.bf16.msra.mxu1 %v5655_v53  ;;  %v4359_v46 = vor.u32 %v4358_v24, %v4355_v20  ;;  %v5670_v34 = vld [vmem:[#allocation2 + $0x1c] sm:$0xf]  ;;  %v3523_v53 = vld [vmem:[#allocation2 + $0x24] sm:$0xe]  ;;  %p5693_p1 = scmp.ne.s32.totalorder %s7774_s9, %s5692_s12 }
 0x2d0   : > { %v5290_v59 = vcombine.low %v3511_v6, %v3521_v45  ;;  %v4374_v61 = vrot.slane %v4372_v28, 5  ;;  %v5228_v56 = vcombine.low %v5668_v42, %v5669_v30  ;;  %3896 = vrot.lane.b32.xlu0 %v5282_v18, %s5796_s14  ;;  %4203 = vmatprep.subr.bf16.mxu1 %v5799_v9  ;;  %v4377_v51 = vshrl.u32 %v5321_v31, 16  ;;  %s5420_s14 = sshll.u32 %s5768_s21, 4 }
 0x2d1   : > { %v4369_v52 = vor.u32 %v4368_v60, %v4364_v16  ;;  %v4380_v11 = vshll.u32 %v5321_v31, 16  ;;  %v4386_v44 = vshll.u32 %v5322_v14, 16  ;;  %v4360_v17 = vrot.slane %v4359_v46, 4  ;;  %v5327_v46 = vld [vmem:[%s5909_s26 + $0x3c] sm:$0xf]  ;;  %p5694_p2 = pnand %p5693_p1, %p5883_p3 }
 0x2d2   : > { %3936 = vrot.lane.b32.xlu1 %v5290_v59, %s5798_s27  ;;  %v4390_v21 = vshrl.u32 %v5322_v14, 16  ;;  %v4396_v33 = vshll.u32 %v5323_v19, 16  ;;  %v5219_v36 = vrot.slane %v3522_v41, 9  ;;  %v4379_v2 = vrot.slane %v4377_v51, 4  ;;  %v3709_v38 = vpop.permute.xlu0 %3708  ;;  %v5672_v14 = vld [vmem:[#allocation2 + $0x28] sm:$0xf] }
 0x2d3   : > { %v4370_v55 = vrot.slane %v4369_v52, 4  ;;  %v3669_v57 = vpop.permute.xlu1 %3668  ;;  %v4382_v4 = vrot.slane %v4380_v11, 5  ;;  %v4388_v0 = vrot.slane %v4386_v44, 5  ;;  %4204 = vmatpush1.bf16.msra.mxu1 %v5657_v47  ;;  %v4365_v18 = vsel %vm6000_vm5, %v4360_v17, %v4364_v16  ;;  %v5325_v16 = vld [vmem:[%s5909_s26 + $0x34] sm:$0xf]  ;;  %p5695_p4 = pneg %p5694_p2 }
 0x2d4   : > { %v3967_v8 = vsel %vm1888_vm7, %v5228_v56, %v3669_v57  ;;  %v4392_v25 = vrot.slane %v4390_v21, 4  ;;  %v4398_v10 = vrot.slane %v4396_v33, 5  ;;  %4219 = vmatprep.subr.bf16.mxu1 %v5799_v9  ;;  %v3556_v3 = vrot.slane %v5670_v34, 5  ;;  %v5673_v41 = vld [vmem:[#allocation2 + $0x2c] sm:$0x1] }
 0x2d5   : > { %v4375_v12 = vsel %vm6000_vm5, %v4370_v55, %v4374_v61  ;;  %v4383_v48 = vor.u32 %v4382_v4, %v4379_v2  ;;  %v3559_v13 = vrot.slane %v5671_v1, 5  ;;  %vm4051_vm8 = vcmask 785408   ;;  %v5326_v47 = vld [vmem:[%s5909_s26 + $0x38] sm:$0x1]  ;;  %v5328_v55 = vld [vmem:[%s5909_s26 + $0x40] sm:$0xf] }
 0x2d6   : > { %v5342_v26 = vcombine.low %v4365_v18, %v4375_v12  ;;  %v4393_v20 = vor.u32 %v4392_v25, %v4388_v0  ;;  %vm4068_vm4 = vcmask 916480   ;;  %v3557_v22 = vsel %vm5953_vm2, %v5219_v36, %v3556_v3  ;;  %v5674_v18 = vld [vmem:[#allocation2 + $0x18] sm:$0xf] }
 0x2d7   : > { %v4384_v58 = vrot.slane %v4383_v48, 4  ;;  %v3558_v62 = vrot.slane %v3556_v3, 4  ;;  %v4053_v9 = vsel %vm4051_vm8, %v4036_v35, %v7420_v43  ;;  %v3757_v27 = vpop.permute.xlu1 %3756  ;;  %4220 = vmatpush2.bf16.msra.mxu1 %v5658_v54  ;;  %v3989_v6 = vsel %vm1930_vm10, %v3967_v8, %v3709_v38  ;;  %v5324_v35 = vld [vmem:[%s5909_s26 + $0x30] sm:$0xf]  ;;  %v5329_v54 = vld [vmem:[%s5909_s26 + $0x44] sm:$0x1] }
 0x2d8   : > { %5477 = vmatprep.mubr.msk.bf16.mxu0 %vm1857_vm6, %v5342_v26  ;;  %v4394_v63 = vrot.slane %v4393_v20, 4  ;;  %v4070_v7 = vsel %vm4068_vm4, %v4053_v9, %v7452_v50  ;;  %v5220_v32 = vrot.slane %v3523_v53, 9  ;;  %v4005_v43 = vsel %vm1972_vm12, %v3989_v6, %v3757_v27  ;;  %v5675_v8 = vld [vmem:[#allocation2 + $0x1c] sm:$0xf]  ;;  %v3524_v26 = vld [vmem:[#allocation2 + $0x30] sm:$0xe] }
 0x2d9   : > { %v4389_v24 = vsel %vm6000_vm5, %v4384_v58, %v4388_v0  ;;  %v3560_v28 = vsel %vm5953_vm2, %v3558_v62, %v3559_v13  ;;  %v3797_v31 = vpop.permute.xlu0 %3796  ;;  %v3563_v45 = vrot.slane %v5672_v14, 5  ;;  %v3566_v59 = vrot.slane %v5673_v41, 5 }
 0x2da   : > { %v4399_v50 = vsel %vm6000_vm5, %v4394_v63, %v4398_v10  ;;  %v5291_v60 = vcombine.low %v3557_v22, %v3560_v28  ;;  %v4021_v19 = vsel %vm2014_vm14, %v4005_v43, %v3797_v31  ;;  %v4401_v51 = vshrl.u32 %v5324_v35, 16  ;;  %v5676_v43 = vld [vmem:[#allocation2 + $0x34] sm:$0xf] }
 0x2db   : > { %v5343_v61 = vcombine.low %v4389_v24, %v4399_v50  ;;  %v3837_v42 = vpop.permute.xlu1 %3836  ;;  %v3564_v30 = vsel %vm5953_vm2, %v5220_v32, %v3563_v45  ;;  %v3565_v56 = vrot.slane %v3563_v45, 4  ;;  %v4404_v11 = vshll.u32 %v5324_v35, 16 }
 0x2dc   : > { %5308 = vmatprep.mubr.msk.bf16.mxu1 %vm1888_vm7, %v5291_v60  ;;  %v4038_v52 = vsel %vm4034_vm1, %v4021_v19, %v3837_v42  ;;  %v4410_v44 = vshll.u32 %v5325_v16, 16  ;;  %v4414_v33 = vshrl.u32 %v5325_v16, 16  ;;  %v4420_v36 = vshll.u32 %v5326_v47, 16  ;;  %v3525_v60 = vld [vmem:[#allocation2 + $0x3c] sm:$0xe] }
 0x2dd   : > { %5478 = vmatmul.mubr.msk.bf16.vlgmr.msra.gmra.mxu0 %vm1857_vm6, %v5343_v61  ;;  %4222 = vmatmul.mubr.bf16.vlgmr.msra.gmra.mxu1 %v4070_v7  ;;  %v3885_v17 = vpop.permute.xlu0 %3884  ;;  %v3567_v21 = vsel %vm5953_vm2, %v3565_v56, %v3566_v59  ;;  %v4425_v57 = vshrl.u32 %v5327_v46, 16  ;;  %v4403_v0 = vrot.slane %v4401_v51, 4  ;;  %v4406_v38 = vrot.slane %v4404_v11, 5  ;;  %v5677_v42 = vld [vmem:[#allocation2 + $0x38] sm:$0x1] }
 0x2de   : > { %v4055_v2 = vsel %vm4051_vm8, %v4038_v52, %v3885_v17  ;;  %v5292_v4 = vcombine.low %v3564_v30, %v3567_v21  ;;  %v5229_v25 = vcombine.low %v5674_v18, %v5675_v8  ;;  %v4412_v10 = vrot.slane %v4410_v44, 5  ;;  %v5678_v11 = vld [vmem:[#allocation2 + $0x40] sm:$0xf]  ;;  %v5330_v17 = vld [vmem:[%s5909_s26 + $0x48] sm:$0xf] }
 0x2df   : > { %v4416_v12 = vrot.slane %v4414_v33, 4  ;;  %v4427_v48 = vrot.slane %v4425_v57, 4  ;;  %v3925_v34 = vpop.permute.xlu1 %3924  ;;  %v4407_v3 = vor.u32 %v4406_v38, %v4403_v0  ;;  %v4428_v1 = vshll.u32 %v5327_v46, 16  ;;  %v5331_v21 = vld [vmem:[%s5909_s26 + $0x4c] sm:$0xf] }
 0x2e0   : > { %5309 = vmatprep.mubr.msk.bf16.mxu1 %vm1888_vm7, %v5292_v4  ;;  %v4434_v13 = vshll.u32 %v5328_v55, 16  ;;  %v4438_v53 = vshrl.u32 %v5328_v55, 16  ;;  %v4073_v20 = vsel %vm4068_vm4, %v4055_v2, %v3925_v34  ;;  %v4422_v22 = vrot.slane %v4420_v36, 5  ;;  %v5679_v57 = vld [vmem:[#allocation2 + $0x44] sm:$0x1] }
 0x2e1   : > { %v4417_v58 = vor.u32 %v4416_v12, %v4412_v10  ;;  %v4444_v62 = vshll.u32 %v5329_v54, 16  ;;  %v4408_v9 = vrot.slane %v4407_v3, 4  ;;  %v4430_v27 = vrot.slane %v4428_v1, 5  ;;  %v5332_v4 = vld [vmem:[%s5909_s26 + $0x50] sm:$0x1] }
 0x2e2   : > { %v4436_v63 = vrot.slane %v4434_v13, 5  ;;  %v4440_v7 = vrot.slane %v4438_v53, 4  ;;  %v5221_v28 = vrot.slane %v3524_v26, 9  ;;  %v3570_v31 = vrot.slane %v5676_v43, 5  ;;  %v5333_v0 = vld [vmem:[%s5909_s26 + $0x54] sm:$0xf] }
 0x2e3   : > { %v3671_v6 = vpop.permute.xlu0 %3670  ;;  %v4418_v32 = vrot.slane %v4417_v58, 4  ;;  %v4446_v24 = vrot.slane %v4444_v62, 5  ;;  %v3711_v45 = vpop.permute.xlu1 %3710  ;;  %v4413_v35 = vsel %vm6000_vm5, %v4408_v9, %v4412_v10  ;;  %v4431_v16 = vor.u32 %v4430_v27, %v4427_v48  ;;  %v5680_v1 = vld [vmem:[#allocation2 + $0x24] sm:$0xf]  ;;  %v5681_v13 = vld [vmem:[#allocation2 + $0x28] sm:$0xf] }
 0x2e4   : > { %v3970_v14 = vsel %vm1888_vm7, %v5229_v25, %v3671_v6  ;;  %v4441_v50 = vor.u32 %v4440_v7, %v4436_v63  ;;  %v3571_v41 = vsel %vm5953_vm2, %v5221_v28, %v3570_v31  ;;  %v3572_v59 = vrot.slane %v3570_v31, 4  ;;  %v5334_v58 = vld [vmem:[%s5909_s26 + $0x58] sm:$0xf]  ;;  %v5335_v7 = vld [vmem:[%s5909_s26 + $0x5c] sm:$0x1] }
 0x2e5   : > { %4230 = vmatmul.mubr.bf16.gmra.mxu1 %v4073_v20  ;;  %v4423_v19 = vsel %vm6000_vm5, %v4418_v32, %v4422_v22  ;;  %v4432_v46 = vrot.slane %v4431_v16, 4  ;;  %v3573_v30 = vrot.slane %v5677_v42, 5  ;;  %v3991_v56 = vsel %vm1930_vm10, %v3970_v14, %v3711_v45 }
 0x2e6   : > { %v5344_v47 = vcombine.low %v4413_v35, %v4423_v19  ;;  %v4442_v61 = vrot.slane %v4441_v50, 4  ;;  %v5222_v51 = vrot.slane %v3525_v60, 9  ;;  %v3577_v44 = vrot.slane %v5678_v11, 5 }
 0x2e7   : > { %v3759_v52 = vpop.permute.xlu0 %3758  ;;  %v4437_v33 = vsel %vm6000_vm5, %v4432_v46, %v4436_v63  ;;  %v3574_v55 = vsel %vm5953_vm2, %v3572_v59, %v3573_v30  ;;  %v3580_v2 = vrot.slane %v5679_v57, 5  ;;  %v4449_v10 = vshrl.u32 %v5330_v17, 16 }
 0x2e8   : > { %5481 = vmatprep.mubr.msk.bf16.mxu0 %vm1857_vm6, %v5344_v47  ;;  %v4447_v36 = vsel %vm6000_vm5, %v4442_v61, %v4446_v24  ;;  %v4007_v38 = vsel %vm1972_vm12, %v3991_v56, %v3759_v52  ;;  %v5293_v18 = vcombine.low %v3571_v41, %v3574_v55  ;;  %v3579_v8 = vrot.slane %v3577_v44, 4  ;;  %v5682_v52 = vld [vmem:[#allocation2 + $0x4c] sm:$0xf] }
 0x2e9   : > { %v5345_v54 = vcombine.low %v4437_v33, %v4447_v36  ;;  %v4452_v12 = vshll.u32 %v5330_v17, 16  ;;  %v4458_v48 = vshll.u32 %v5331_v21, 16  ;;  %v4462_v34 = vshrl.u32 %v5331_v21, 16  ;;  %v3526_v33 = vld [vmem:[#allocation2 + $0x48] sm:$0xe] }
 0x2ea   : > { %v3799_v25 = vpop.permute.xlu1 %3798  ;;  %v5230_v53 = vcombine.low %v5680_v1, %v5681_v13  ;;  %5310 = vmatprep.mubr.msk.bf16.mxu1 %vm1888_vm7, %v5293_v18  ;;  %v3578_v26 = vsel %vm5953_vm2, %v5222_v51, %v3577_v44  ;;  %v4468_v20 = vshll.u32 %v5332_v4, 16  ;;  %v4473_v22 = vshrl.u32 %v5333_v0, 16  ;;  %v5336_v18 = vld [vmem:[%s5909_s26 + $0x60] sm:$0xf]  ;;  %v5339_v1 = vld [vmem:[%s5909_s26 + $0x6c] sm:$0xf] }
 0x2eb   : > { %v3839_v3 = vpop.permute.xlu0 %3838  ;;  %5482 = vmatmul.mubr.msk.bf16.gmra.mxu0 %vm1857_vm6, %v5345_v54  ;;  %v4023_v62 = vsel %vm2014_vm14, %v4007_v38, %v3799_v25  ;;  %v3581_v9 = vsel %vm5953_vm2, %v3579_v8, %v3580_v2  ;;  %v4451_v27 = vrot.slane %v4449_v10, 4  ;;  %v4454_v63 = vrot.slane %v4452_v12, 5  ;;  %v5337_v8 = vld [vmem:[%s5909_s26 + $0x64] sm:$0xf] }
 0x2ec   : > { %v4040_v6 = vsel %vm4034_vm1, %v4023_v62, %v3839_v3  ;;  %v4460_v32 = vrot.slane %v4458_v48, 5  ;;  %v4464_v24 = vrot.slane %v4462_v34, 4  ;;  %v4475_v28 = vrot.slane %v4473_v22, 4  ;;  %v5683_v48 = vld [vmem:[#allocation2 + $0x50] sm:$0x1] }
 0x2ed   : > { %v4455_v31 = vor.u32 %v4454_v63, %v4451_v27  ;;  %v4476_v14 = vshll.u32 %v5333_v0, 16  ;;  %v4482_v45 = vshll.u32 %v5334_v58, 16  ;;  %v4486_v35 = vshrl.u32 %v5334_v58, 16  ;;  %v5338_v3 = vld [vmem:[%s5909_s26 + $0x68] sm:$0x1] }
 0x2ee   : > { %v3887_v43 = vpop.permute.xlu1 %3886  ;;  %v5294_v16 = vcombine.low %v3578_v26, %v3581_v9  ;;  %v4465_v50 = vor.u32 %v4464_v24, %v4460_v32  ;;  %v4470_v60 = vrot.slane %v4468_v20, 5  ;;  %v4492_v19 = vshll.u32 %v5335_v7, 16  ;;  %v5340_v63 = vld [vmem:[%s5909_s26 + $0x70] sm:$0xf]  ;;  %v5341_v7 = vld [vmem:[%s5909_s26 + $0x74] sm:$0x1]  ;;  %s4861_s26 = sadd.s32 %s5420_s14, %s5379_s17 }
 0x2ef   : > { %v4456_v41 = vrot.slane %v4455_v31, 4  ;;  %v4478_v59 = vrot.slane %v4476_v14, 5  ;;  %v4484_v47 = vrot.slane %v4482_v45, 5  ;;  %v4488_v46 = vrot.slane %v4486_v35, 4  ;;  %s5380_s27 = sshll.u32 %s4861_s26, 6  ;;  %s5696_s14 = sshll.u32 %s5800_s15, 4  ;;  %s5697_s14 = int_to_ptr.vmem [resolvable:$false] %s5696_s14 }
 0x2f0   : > { %v4057_v61 = vsel %vm4051_vm8, %v4040_v6, %v3887_v43  ;;  %v3927_v42 = vpop.permute.xlu0 %3926  ;;  %v4466_v30 = vrot.slane %v4465_v50, 4  ;;  %v4494_v56 = vrot.slane %v4492_v19, 5  ;;  %v3584_v51 = vrot.slane %v5682_v52, 5  ;;  %s7772_s13 = scalar_lea.hbm %s7838_s5, %s5380_s27  ;;  %s5698_s17 = scalar_lea.vmem %s5697_s14, 2048 }
 0x2f1   : > { %v4076_v11 = vsel %vm4068_vm4, %v4057_v61, %v3927_v42  ;;  %v4461_v44 = vsel %vm6000_vm5, %v4456_v41, %v4460_v32  ;;  %v4479_v17 = vor.u32 %v4478_v59, %v4475_v28  ;;  %v4489_v21 = vor.u32 %v4488_v46, %v4484_v47  ;;  %p5699_p5 = scmp.lt.s32.totalorder %s7774_s9, %s5697_s14  ;;  %p5700_p6 = scmp.lt.s32.totalorder %s5698_s17, %s5692_s12 }
 0x2f2   : > { %4238 = vmatmul.mubr.bf16.gmra.mxu1 %v4076_v11  ;;  %v4471_v36 = vsel %vm6000_vm5, %v4466_v30, %v4470_v60  ;;  %v5223_v38 = vrot.slane %v3526_v33, 9  ;;  %v3586_v54 = vrot.slane %v3584_v51, 4  ;;  %v3587_v34 = vrot.slane %v5683_v48, 5 }
 0x2f3   : > { %5311 = vmatprep.mubr.msk.bf16.mxu1 %vm1888_vm7, %v5294_v16  ;;  %v5346_v57 = vcombine.low %v4461_v44, %v4471_v36  ;;  %v4480_v2 = vrot.slane %v4479_v17, 4  ;;  %v4490_v4 = vrot.slane %v4489_v21, 4  ;;  %v4497_v58 = vshrl.u32 %v5336_v18, 16  ;;  %v3529_v17 = vld [vmem:[#allocation2 + $0x6c] sm:$0xe]  ;;  %p5701_p7 = por %p5700_p6, %p5699_p5 }
 0x2f4   : > { %v3673_v55 = vpop.permute.xlu1 %3672  ;;  %v3713_v0 = vpop.permute.xlu0 %3712  ;;  %v4506_v22 = vshll.u32 %v5337_v8, 16  ;;  %v4510_v62 = vshrl.u32 %v5337_v8, 16  ;;  %v3585_v9 = vsel %vm5953_vm2, %v5223_v38, %v3584_v51  ;;  %v4516_v27 = vshll.u32 %v5338_v3, 16 }
 0x2f5   : > { %v3973_v25 = vsel %vm1888_vm7, %v5230_v53, %v3673_v55  ;;  %5485 = vmatprep.mubr.msk.bf16.mxu0 %vm1857_vm6, %v5346_v57  ;;  %v4485_v10 = vsel %vm6000_vm5, %v4480_v2, %v4484_v47  ;;  %v4495_v12 = vsel %vm6000_vm5, %v4490_v4, %v4494_v56  ;;  %v4500_v53 = vshll.u32 %v5336_v18, 16  ;;  %p5702_p9 = pnand %p5701_p7, %p5695_p4 }
 0x2f6   : > { %v3993_v13 = vsel %vm1930_vm10, %v3973_v25, %v3713_v0  ;;  %v5347_v26 = vcombine.low %v4485_v10, %v4495_v12  ;;  %v4521_v6 = vshrl.u32 %v5339_v1, 16  ;;  %v3588_v32 = vsel %vm5953_vm2, %v3586_v54, %v3587_v34  ;;  %v5684_v10 = vld [vmem:[#allocation2 + $0x30] sm:$0xf]  ;;  %v5685_v12 = vld [vmem:[#allocation2 + $0x34] sm:$0xf] }
 0x2f7   : > { %v4499_v24 = vrot.slane %v4497_v58, 4  ;;  %v4502_v28 = vrot.slane %v4500_v53, 5  ;;  %v4508_v43 = vrot.slane %v4506_v22, 5  ;;  %v4512_v14 = vrot.slane %v4510_v62, 4  ;;  %v5686_v58 = vld [vmem:[#allocation2 + $0x58] sm:$0xf] }
 0x2f8   : > { %v3761_v20 = vpop.permute.xlu1 %3760  ;;  %5486 = vmatmul.mubr.msk.bf16.gmra.mxu0 %vm1857_vm6, %v5347_v26  ;;  %v4523_v45 = vrot.slane %v4521_v6, 4  ;;  %v4524_v35 = vshll.u32 %v5339_v1, 16  ;;  %v4530_v19 = vshll.u32 %v5340_v63, 16  ;;  %v4534_v41 = vshrl.u32 %v5340_v63, 16 }
 0x2f9   : > { %v4009_v31 = vsel %vm1972_vm12, %v3993_v13, %v3761_v20  ;;  %v4503_v60 = vor.u32 %v4502_v28, %v4499_v24  ;;  %v4540_v59 = vshll.u32 %v5341_v7, 16  ;;  %v4513_v46 = vor.u32 %v4512_v14, %v4508_v43  ;;  %v5687_v24 = vld [vmem:[#allocation2 + $0x5c] sm:$0x1] }
 0x2fa   : > { %v4518_v61 = vrot.slane %v4516_v27, 5  ;;  %v4526_v42 = vrot.slane %v4524_v35, 5  ;;  %v4532_v56 = vrot.slane %v4530_v19, 5  ;;  %v4536_v52 = vrot.slane %v4534_v41, 4  ;;  %v3527_v27 = vld [vmem:[#allocation2 + $0x54] sm:$0xe] }
 0x2fb   : > { %v3801_v16 = vpop.permute.xlu0 %3800  ;;  %v4504_v30 = vrot.slane %v4503_v60, 4  ;;  %v5295_v51 = vcombine.low %v3585_v9, %v3588_v32  ;;  %v4514_v11 = vrot.slane %v4513_v46, 4  ;;  %v4542_v57 = vrot.slane %v4540_v59, 5  ;;  %v5688_v46 = vld [vmem:[#allocation2 + $0x3c] sm:$0xf] }
 0x2fc   : > { %v3841_v50 = vpop.permute.xlu1 %3840  ;;  %v4025_v47 = vsel %vm2014_vm14, %v4009_v31, %v3801_v16  ;;  %v4527_v44 = vor.u32 %v4526_v42, %v4523_v45  ;;  %v4537_v55 = vor.u32 %v4536_v52, %v4532_v56  ;;  %v5226_v25 = vrot.slane %v3529_v17, 9 }
 0x2fd   : > { %v4042_v21 = vsel %vm4034_vm1, %v4025_v47, %v3841_v50  ;;  %v4509_v36 = vsel %vm6000_vm5, %v4504_v30, %v4508_v43  ;;  %v4519_v0 = vsel %vm6000_vm5, %v4514_v11, %v4518_v61  ;;  %v5231_v48 = vcombine.low %v5684_v10, %v5685_v12  ;;  %v5689_v61 = vld [vmem:[#allocation2 + $0x40] sm:$0xf]  ;;  %v5690_v10 = vld [vmem:[#allocation2 + $0x48] sm:$0xf]  ;;  %v5691_v12 = vld [vmem:[#allocation2 + $0x4c] sm:$0xf] }
 0x2fe   : > { %v4528_v38 = vrot.slane %v4527_v44, 4  ;;  %v5348_v18 = vcombine.low %v4509_v36, %v4519_v0  ;;  %v4538_v8 = vrot.slane %v4537_v55, 4  ;;  %v3605_v3 = vrot.slane %v7396_v23, 5 }
 0x2ff   : > { %v3889_v33 = vpop.permute.xlu0 %3888  ;;  %v3608_v26 = vrot.slane %v7412_v40, 5  ;;  %v3591_v53 = vrot.slane %v5686_v58, 5  ;;  %v5224_v6 = vrot.slane %v3527_v27, 9  ;;  %v3594_v28 = vrot.slane %v5687_v24, 5 }
 0x300   : > { %v4059_v2 = vsel %vm4051_vm8, %v4042_v21, %v3889_v33  ;;  %v4533_v34 = vsel %vm6000_vm5, %v4528_v38, %v4532_v56  ;;  %5489 = vmatprep.mubr.msk.bf16.mxu0 %vm1857_vm6, %v5348_v18  ;;  %v4543_v13 = vsel %vm6000_vm5, %v4538_v8, %v4542_v57  ;;  %v7585_v22 = vsel %vm5953_vm2, %v5226_v25, %v3605_v3 }
 0x301   : > { %v3929_v4 = vpop.permute.xlu1 %3928  ;;  %v5349_v20 = vcombine.low %v4533_v34, %v4543_v13  ;;  %v3607_v62 = vrot.slane %v3605_v3, 4  ;;  %v3593_v32 = vrot.slane %v3591_v53, 4  ;;  %v3592_v35 = vsel %vm5953_vm2, %v5224_v6, %v3591_v53 }
 0x302   : > { %v4079_v54 = vsel %vm4068_vm4, %v4059_v2, %v3929_v4  ;;  %v5232_v42 = vcombine.low %v5688_v46, %v5689_v61  ;;  %v3598_v56 = vrot.slane %v7316_v29, 5  ;;  %v3601_v36 = vrot.slane %v7324_v49, 5 }
 0x303   : > { %4246 = vmatmul.mubr.bf16.gmra.mxu1 %v4079_v54  ;;  %5490 = vmatmul.mubr.msk.bf16.gmra.mxu0 %vm1857_vm6, %v5349_v20  ;;  %v7591_v39 = vsel %vm5953_vm2, %v3607_v62, %v3608_v26  ;;  %v3595_v16 = vsel %vm5953_vm2, %v3593_v32, %v3594_v28 }
 0x304   : > { %v3675_v1 = vpop.permute.xlu0 %3674  ;;  %5312 = vmatprep.mubr.msk.bf16.mxu1 %vm1888_vm7, %v5295_v51  ;;  %v5298_v40 = vcombine.low %v7585_v22, %v7591_v39  ;;  %v5296_v19 = vcombine.low %v3592_v35, %v3595_v16  ;;  %v3528_v51 = vld [vmem:[#allocation2 + $0x60] sm:$0xe]  ;;  %v3600_v33 = vrot.slane %v3598_v56, 4 }
 0x305   : > { %v3976_v23 = vsel %vm1888_vm7, %v5231_v48, %v3675_v1  ;;  %v3715_v9 = vpop.permute.xlu1 %3714  ;;  %v5225_v21 = vrot.slane %v3528_v51, 9  ;;  %v5233_v48 = vcombine.low %v5690_v10, %v5691_v12  ;;  %v7643_v16 = vld [vmem:[%s7837_s4 + $0x2] ss:$0 sm:$0xff] }
 0x306   : > { %v3995_v7 = vsel %vm1930_vm10, %v3976_v23, %v3715_v9  ;;  %v3602_v0 = vsel %vm5953_vm2, %v3600_v33, %v3601_v36 }
 0x307   : > { %v3599_v29 = vsel %vm5953_vm2, %v5225_v21, %v3598_v56 }
 0x308   : > { %v3763_v63 = vpop.permute.xlu0 %3762  ;;  %v5297_v18 = vcombine.low %v3599_v29, %v3602_v0 }
 0x309   : > { %v4011_v43 = vsel %vm1972_vm12, %v3995_v7, %v3763_v63  ;;  %v5234_v7 = vcombine.low %v7333_v15, %v7341_v5 }
 0x30c   : > { %v3843_v31 = vpop.permute.xlu0 %3842  ;;  %v3803_v14 = vpop.permute.xlu1 %3802 }
 0x30d   : > { %v4027_v45 = vsel %vm2014_vm14, %v4011_v43, %v3803_v14 }
 0x30e   : > { %v4044_v50 = vsel %vm4034_vm1, %v4027_v45, %v3843_v31 }
 0x310   : > { %v3891_v60 = vpop.permute.xlu1 %3890 }
 0x311   : > { %v4061_v41 = vsel %vm4051_vm8, %v4044_v50, %v3891_v60  ;;  %v7648_v60 = vld [vmem:[%s7837_s4 + $0x4] ss:$0 sm:$0xff] }
 0x312   : > { %v3931_v59 = vpop.permute.xlu0 %3930 }
 0x313   : > { %v4082_v47 = vsel %vm4068_vm4, %v4061_v41, %v3931_v59  ;;  %v7653_v41 = vld [vmem:[%s7837_s4 + $0x3] ss:$0 sm:$0xff] }
 0x314   : > { %4254 = vmatmul.mubr.bf16.gmra.mxu1 %v4082_v47  ;;  %v7659_v47 = vld [vmem:[%s7837_s4 + $0x5] ss:$0 sm:$0xff] }
 0x315   : > { %v3677_v30 = vpop.permute.xlu1 %3676  ;;  %5313 = vmatprep.mubr.msk.bf16.mxu1 %vm1888_vm7, %v5296_v19 }
 0x316   : > { %v3717_v52 = vpop.permute.xlu0 %3716  ;;  %v3979_v11 = vsel %vm1888_vm7, %v5232_v42, %v3677_v30 }
 0x317   : > { %v3997_v17 = vsel %vm1930_vm10, %v3979_v11, %v3717_v52 }
 0x319   : > { %v3765_v44 = vpop.permute.xlu1 %3764 }
 0x31a   : > { %v4013_v55 = vsel %vm1972_vm12, %v3997_v17, %v3765_v44 }
 0x31d   : > { %v3805_v57 = vpop.permute.xlu0 %3804  ;;  %v3845_v2 = vpop.permute.xlu1 %3844 }
 0x31e   : > { %v4029_v4 = vsel %vm2014_vm14, %v4013_v55, %v3805_v57 }
 0x31f   : > { %v4046_v38 = vsel %vm4034_vm1, %v4029_v4, %v3845_v2 }
 0x321   : > { %v3893_v54 = vpop.permute.xlu0 %3892 }
 0x322   : > { %v4063_v8 = vsel %vm4051_vm8, %v4046_v38, %v3893_v54  ;;  %v3933_v25 = vpop.permute.xlu1 %3932 }
 0x323   : > { %v4085_v49 = vsel %vm4068_vm4, %v4063_v8, %v3933_v25 }
 0x324   : > { %4262 = vmatmul.mubr.bf16.gmra.mxu1 %v4085_v49 }
 0x325   : > { %5314 = vmatprep.mubr.msk.bf16.mxu1 %vm1888_vm7, %v5297_v18 }
 0x326   : > { %v3719_v3 = vpop.permute.xlu1 %3718 }
 0x327   : > { %v3679_v34 = vpop.permute.xlu0 %3678 }
 0x328   : > { %v3982_v37 = vsel %vm1888_vm7, %v5233_v48, %v3679_v34 }
 0x329   : > { %v3999_v13 = vsel %vm1930_vm10, %v3982_v37, %v3719_v3 }
 0x32b   : > { %v3767_v1 = vpop.permute.xlu0 %3766 }
 0x32c   : > { %v4015_v26 = vsel %vm1972_vm12, %v3999_v13, %v3767_v1 }
 0x32d   : > { %v3807_v20 = vpop.permute.xlu1 %3806 }
 0x32e   : > { %v4031_v53 = vsel %vm2014_vm14, %v4015_v26, %v3807_v20 }
 0x32f   : > { %v3847_v58 = vpop.permute.xlu0 %3846 }
 0x330   : > { %v4048_v62 = vsel %vm4034_vm1, %v4031_v53, %v3847_v58 }
 0x331   : > { %v3895_v23 = vpop.permute.xlu1 %3894 }
 0x332   : > { %v4065_v9 = vsel %vm4051_vm8, %v4048_v62, %v3895_v23 }
 0x334   : > { %v3935_v27 = vpop.permute.xlu0 %3934 }
 0x335   : > { %v4088_v63 = vsel %vm4068_vm4, %v4065_v9, %v3935_v27 }
 0x336   : > { %4270 = vmatmul.mubr.bf16.gmra.mxu1 %v4088_v63 }
 0x337   : > { %5315 = vmatprep.mubr.msk.bf16.mxu1 %vm1888_vm7, %v5298_v40 }
 0x338   : > { %v3681_v6 = vpop.permute.xlu1 %3680  ;;  %v3721_v32 = vpop.permute.xlu0 %3720 }
 0x339   : > { %v3985_v24 = vsel %vm1888_vm7, %v5234_v7, %v3681_v6 }
 0x33a   : > { %v4001_v28 = vsel %vm1930_vm10, %v3985_v24, %v3721_v32 }
 0x33c   : > { %v3769_v43 = vpop.permute.xlu1 %3768 }
 0x33d   : > { %v4017_v31 = vsel %vm1972_vm12, %v4001_v28, %v3769_v43 }
 0x33e   : > { %v3809_v14 = vpop.permute.xlu0 %3808 }
 0x33f   : > { %v4033_v45 = vsel %vm2014_vm14, %v4017_v31, %v3809_v14 }
 0x340   : > { %v3849_v35 = vpop.permute.xlu1 %3848 }
 0x341   : > { %v4050_v15 = vsel %vm4034_vm1, %v4033_v45, %v3849_v35 }
 0x342   : > { %v3897_v5 = vpop.permute.xlu0 %3896 }
 0x343   : > { %v4067_v22 = vsel %vm4051_vm8, %v4050_v15, %v3897_v5 }
 0x344   : > { %v3937_v39 = vpop.permute.xlu1 %3936 }
 0x345   : > { %v4091_v40 = vsel %vm4068_vm4, %v4067_v22, %v3937_v39 }
 0x346   : > { %4278 = vmatmul.mubr.bf16.gmra.mxu1 %v4091_v40 }
 0x39d   : > { %v5479_v50 = vpop.f32.mrf.mxu0  ;;  %v4223_v19 = vpop.f32.mrf.mxu1 }
 0x39e   : > { %v4291_v59 = vmul.f32 %v7643_v16, %v4223_v19  ;;  %v4700_v56 = vmul.f32 %v5479_v50, %v7648_v60 }
 0x39f   : > { %v4630_v46 = vpop.f32.mrf.mxu0  ;;  %v4225_v61 = vpop.f32.mrf.mxu1 }
 0x3a0   : > { %v4312_v42 = vadd.f32 %v7653_v41, %v4291_v59  ;;  %v4698_v30 = vmul.f32 %v7648_v60, %v4630_v46  ;;  %v4721_v57 = vadd.f32 %v7659_v47, %v4700_v56 }
 0x3a1   : > { %v5480_v52 = vpop.f32.mrf.mxu0  ;;  %v4226_v51 = vpop.f32.mrf.mxu1 }
 0x3a2   : > { %v4719_v11 = vadd.f32 %v7659_v47, %v4698_v30  ;;  %v4292_v44 = vmul.f32 %v7643_v16, %v4226_v51  ;;  %v4701_v29 = vmul.f32 %v5480_v52, %v7648_v60 }
 0x3a3   : > { %v4633_v17 = vpop.f32.mrf.mxu0  ;;  %v4228_v21 = vpop.f32.mrf.mxu1 }
 0x3a4   : > { %v4735_v33 = vadd.f32 %v4719_v11, %v4312_v42  ;;  %v4313_v36 = vadd.f32 %v7653_v41, %v4292_v44  ;;  %v4699_v55 = vmul.f32 %v7648_v60, %v4633_v17  ;;  %v4722_v10 = vadd.f32 %v7659_v47, %v4701_v29 }
 0x3a5   : > { %v4231_v2 = vpop.f32.mrf.mxu1 }
 0x3a6   : > { %v4751_v4 = vmax.f32 %v4735_v33, 0.0  ;;  %v4720_v0 = vadd.f32 %v7659_v47, %v4699_v55  ;;  %v4293_v38 = vmul.f32 %v7643_v16, %v4231_v2 }
 0x3a7   : > { %v4233_v54 = vpop.f32.mrf.mxu1 }
 0x3a8   : > { %v5404_v18 = vpack.c.bf16 %v4751_v4, %v4751_v4  ;;  %v4736_v8 = vadd.f32 %v4720_v0, %v4313_v36  ;;  %v4314_v25 = vadd.f32 %v7653_v41, %v4293_v38 }
 0x3a9   : > { %v4234_v49 = vpop.f32.mrf.mxu1 }
 0x3aa   : > { %4831 = vst.msk [vmem:[%s7040_s10] sm:$0xf] %vm2542_vm0, %v5404_v18  ;;  %v4752_v12 = vmax.f32 %v4736_v8, 0.0  ;;  %v4737_v48 = vadd.f32 %v4721_v57, %v4314_v25  ;;  %v4294_v34 = vmul.f32 %v7643_v16, %v4234_v49 }
 0x3ab   : > { %v4236_v3 = vpop.f32.mrf.mxu1  ;;  %v5483_v37 = vpop.f32.mrf.mxu0 }
 0x3ac   : > { %v5405_v1 = vpack.c.bf16 %v4752_v12, %v4752_v12  ;;  %v4753_v13 = vmax.f32 %v4737_v48, 0.0  ;;  %v4315_v26 = vadd.f32 %v7653_v41, %v4294_v34  ;;  %v4704_v56 = vmul.f32 %v5483_v37, %v7648_v60 }
 0x3ad   : > { %v4646_v20 = vpop.f32.mrf.mxu0 }
 0x3ae   : > { %4832 = vst.msk [vmem:[%s7040_s10 + $0x4] sm:$0xf] %vm2542_vm0, %v5405_v1  ;;  %v5406_v58 = vpack.c.bf16 %v4753_v13, %v4753_v13  ;;  %v4738_v53 = vadd.f32 %v4722_v10, %v4315_v26  ;;  %v4702_v9 = vmul.f32 %v7648_v60, %v4646_v20  ;;  %v4725_v44 = vadd.f32 %v7659_v47, %v4704_v56 }
 0x3af   : > { %v5484_v62 = vpop.f32.mrf.mxu0 }
 0x3b0   : > { %4833 = vst.msk [vmem:[%s7040_s10 + $0x8] sm:$0xf] %vm2542_vm0, %v5406_v58  ;;  %v4754_v23 = vmax.f32 %v4738_v53, 0.0  ;;  %v4723_v32 = vadd.f32 %v7659_v47, %v4702_v9  ;;  %v4705_v17 = vmul.f32 %v5484_v62, %v7648_v60 }
 0x3b1   : > { %v4649_v27 = vpop.f32.mrf.mxu0 }
 0x3b2   : > { %v5407_v63 = vpack.c.bf16 %v4754_v23, %v4754_v23  ;;  %v4239_v7 = vpop.f32.mrf.mxu1  ;;  %v4703_v24 = vmul.f32 %v7648_v60, %v4649_v27  ;;  %v4726_v4 = vadd.f32 %v7659_v47, %v4705_v17 }
 0x3b3   : > { %v4295_v6 = vmul.f32 %v7643_v16, %v4239_v7 }
 0x3b4   : > { %4834 = vst.msk [vmem:[%s7040_s10 + $0xc] sm:$0xf] %vm2542_vm0, %v5407_v63  ;;  %v4241_v28 = vpop.f32.mrf.mxu1  ;;  %v4724_v35 = vadd.f32 %v7659_v47, %v4703_v24 }
 0x3b5   : > { %v4316_v43 = vadd.f32 %v7653_v41, %v4295_v6 }
 0x3b6   : > { %v4242_v31 = vpop.f32.mrf.mxu1 }
 0x3b7   : > { %v4739_v14 = vadd.f32 %v4723_v32, %v4316_v43  ;;  %v4296_v45 = vmul.f32 %v7643_v16, %v4242_v31 }
 0x3b8   : > { %v4244_v15 = vpop.f32.mrf.mxu1  ;;  %v5487_v5 = vpop.f32.mrf.mxu0 }
 0x3b9   : > { %v4755_v22 = vmax.f32 %v4739_v14, 0.0  ;;  %v4317_v39 = vadd.f32 %v7653_v41, %v4296_v45  ;;  %v4708_v40 = vmul.f32 %v5487_v5, %v7648_v60 }
 0x3ba   : > { %v4662_v50 = vpop.f32.mrf.mxu0 }
 0x3bb   : > { %v5408_v19 = vpack.c.bf16 %v4755_v22, %v4755_v22  ;;  %v4740_v59 = vadd.f32 %v4724_v35, %v4317_v39  ;;  %v7694_v46 = vadd.f32 %v7659_v47, %v4708_v40  ;;  %v4706_v62 = vmul.f32 %v7648_v60, %v4662_v50 }
 0x3bc   : > { %v5488_v61 = vpop.f32.mrf.mxu0 }
 0x3bd   : > { %4835 = vst.msk [vmem:[%s7040_s10 + $0x10] sm:$0xf] %vm2542_vm0, %v5408_v19  ;;  %v4756_v42 = vmax.f32 %v4740_v59, 0.0  ;;  %v4709_v30 = vmul.f32 %v5488_v61, %v7648_v60  ;;  %v4727_v27 = vadd.f32 %v7659_v47, %v4706_v62 }
 0x3be   : > { %v4665_v36 = vpop.f32.mrf.mxu0 }
 0x3bf   : > { %v5409_v52 = vpack.c.bf16 %v4756_v42, %v4756_v42  ;;  %v7701_v51 = vadd.f32 %v7659_v47, %v4709_v30  ;;  %v4707_v63 = vmul.f32 %v7648_v60, %v4665_v36 }
 0x3c1   : > { %4836 = vst.msk [vmem:[%s7040_s10 + $0x14] sm:$0xf] %vm2542_vm0, %v5409_v52  ;;  %v4728_v43 = vadd.f32 %v7659_v47, %v4707_v63 }
 0x3c3   : > { %v4247_v11 = vpop.f32.mrf.mxu1  ;;  %v5491_v2 = vpop.f32.mrf.mxu0 }
 0x3c4   : > { %v4297_v21 = vmul.f32 %v7643_v16, %v4247_v11  ;;  %v4712_v38 = vmul.f32 %v5491_v2, %v7648_v60 }
 0x3c5   : > { %v4249_v33 = vpop.f32.mrf.mxu1  ;;  %v4678_v18 = vpop.f32.mrf.mxu0 }
 0x3c6   : > { %v4318_v55 = vadd.f32 %v7653_v41, %v4297_v21  ;;  %v7714_v49 = vadd.f32 %v7659_v47, %v4712_v38  ;;  %v4710_v10 = vmul.f32 %v7648_v60, %v4678_v18 }
 0x3c7   : > { %v4250_v57 = vpop.f32.mrf.mxu1  ;;  %v5492_v12 = vpop.f32.mrf.mxu0 }
 0x3c8   : > { %v4741_v29 = vadd.f32 %v4725_v44, %v4318_v55  ;;  %v4298_v0 = vmul.f32 %v7643_v16, %v4250_v57  ;;  %v4731_v3 = vadd.f32 %v7659_v47, %v4710_v10  ;;  %v4713_v37 = vmul.f32 %v5492_v12, %v7648_v60 }
 0x3c9   : > { %v4252_v54 = vpop.f32.mrf.mxu1  ;;  %v4681_v1 = vpop.f32.mrf.mxu0 }
 0x3ca   : > { %v4757_v8 = vmax.f32 %v4741_v29, 0.0  ;;  %v4319_v25 = vadd.f32 %v7653_v41, %v4298_v0  ;;  %v7722_v26 = vadd.f32 %v7659_v47, %v4713_v37  ;;  %v4711_v20 = vmul.f32 %v7648_v60, %v4681_v1 }
 0x3cc   : > { %v5410_v48 = vpack.c.bf16 %v4757_v8, %v4757_v8  ;;  %v4742_v34 = vadd.f32 %v4726_v4, %v4319_v25  ;;  %v4732_v53 = vadd.f32 %v7659_v47, %v4711_v20 }
 0x3ce   : > { %4837 = vst.msk [vmem:[%s7040_s10 + $0x18] sm:$0xf] %vm2542_vm0, %v5410_v48  ;;  %v4758_v13 = vmax.f32 %v4742_v34, 0.0 }
 0x3d0   : > { %v5411_v58 = vpack.c.bf16 %v4758_v13, %v4758_v13 }
 0x3d2   : > { %4838 = vst.msk [vmem:[%s7040_s10 + $0x1c] sm:$0xf] %vm2542_vm0, %v5411_v58 }
 0x3d4   : > { %v4255_v23 = vpop.f32.mrf.mxu1 }
 0x3d5   : > { %v4299_v9 = vmul.f32 %v7643_v16, %v4255_v23 }
 0x3d6   : > { %v4257_v7 = vpop.f32.mrf.mxu1 }
 0x3d7   : > { %v4320_v6 = vadd.f32 %v7653_v41, %v4299_v9 }
 0x3d8   : > { %v4258_v32 = vpop.f32.mrf.mxu1 }
 0x3d9   : > { %v4743_v24 = vadd.f32 %v4727_v27, %v4320_v6  ;;  %v4300_v28 = vmul.f32 %v7643_v16, %v4258_v32 }
 0x3da   : > { %v4260_v31 = vpop.f32.mrf.mxu1 }
 0x3db   : > { %v4759_v14 = vmax.f32 %v4743_v24, 0.0  ;;  %v4321_v45 = vadd.f32 %v7653_v41, %v4300_v28 }
 0x3dd   : > { %v5412_v35 = vpack.c.bf16 %v4759_v14, %v4759_v14  ;;  %v4744_v15 = vadd.f32 %v4728_v43, %v4321_v45 }
 0x3df   : > { %4839 = vst.msk [vmem:[%s7040_s10 + $0x20] sm:$0xf] %vm2542_vm0, %v5412_v35  ;;  %v4760_v5 = vmax.f32 %v4744_v15, 0.0 }
 0x3e1   : > { %v5413_v60 = vpack.c.bf16 %v4760_v5, %v4760_v5 }
 0x3e3   : > { %4840 = vst.msk [vmem:[%s7040_s10 + $0x24] sm:$0xf] %vm2542_vm0, %v5413_v60 }
 0x3e4   : > { %v4263_v22 = vpop.f32.mrf.mxu1 }
 0x3e5   : > { %v4301_v39 = vmul.f32 %v7643_v16, %v4263_v22 }
 0x3e6   : > { %v4265_v40 = vpop.f32.mrf.mxu1 }
 0x3e7   : > { %v4322_v47 = vadd.f32 %v7653_v41, %v4301_v39 }
 0x3e8   : > { %v4266_v50 = vpop.f32.mrf.mxu1 }
 0x3e9   : > { %v4745_v19 = vadd.f32 %v7694_v46, %v4322_v47  ;;  %v4302_v59 = vmul.f32 %v7643_v16, %v4266_v50 }
 0x3ea   : > { %v4268_v61 = vpop.f32.mrf.mxu1 }
 0x3eb   : > { %v4761_v42 = vmax.f32 %v4745_v19, 0.0  ;;  %v4323_v30 = vadd.f32 %v7653_v41, %v4302_v59 }
 0x3ed   : > { %v5414_v56 = vpack.c.bf16 %v4761_v42, %v4761_v42  ;;  %v4746_v52 = vadd.f32 %v7701_v51, %v4323_v30 }
 0x3ef   : > { %4841 = vst.msk [vmem:[%s7040_s10 + $0x28] sm:$0xf] %vm2542_vm0, %v5414_v56  ;;  %v4762_v11 = vmax.f32 %v4746_v52, 0.0 }
 0x3f1   : > { %v5415_v44 = vpack.c.bf16 %v4762_v11, %v4762_v11 }
 0x3f3   : > { %4842 = vst.msk [vmem:[%s7040_s10 + $0x2c] sm:$0xf] %vm2542_vm0, %v5415_v44 }
 0x3f6   : > { %v4271_v17 = vpop.f32.mrf.mxu1 }
 0x3f7   : > { %v4303_v46 = vmul.f32 %v7643_v16, %v4271_v17 }
 0x3f8   : > { %v4273_v21 = vpop.f32.mrf.mxu1 }
 0x3f9   : > { %v4324_v33 = vadd.f32 %v7653_v41, %v4303_v46 }
 0x3fa   : > { %v4274_v36 = vpop.f32.mrf.mxu1 }
 0x3fb   : > { %v4747_v55 = vadd.f32 %v4731_v3, %v4324_v33  ;;  %v4304_v51 = vmul.f32 %v7643_v16, %v4274_v36 }
 0x3fc   : > { %v4276_v57 = vpop.f32.mrf.mxu1 }
 0x3fd   : > { %v4763_v2 = vmax.f32 %v4747_v55, 0.0  ;;  %v4325_v4 = vadd.f32 %v7653_v41, %v4304_v51 }
 0x3ff   : > { %v5416_v29 = vpack.c.bf16 %v4763_v2, %v4763_v2  ;;  %v4748_v0 = vadd.f32 %v4732_v53, %v4325_v4 }
 0x401   : > { %4843 = vst.msk [vmem:[%s7040_s10 + $0x30] sm:$0xf] %vm2542_vm0, %v5416_v29  ;;  %v4764_v38 = vmax.f32 %v4748_v0, 0.0 }
 0x403   : > { %v5417_v54 = vpack.c.bf16 %v4764_v38, %v4764_v38 }
 0x405   : > { %4844 = vst.msk [vmem:[%s7040_s10 + $0x34] sm:$0xf] %vm2542_vm0, %v5417_v54 }
 0x406   : > { %v4279_v18 = vpop.f32.mrf.mxu1 }
 0x407   : > { %v4305_v8 = vmul.f32 %v7643_v16, %v4279_v18 }
 0x408   : > { %v4281_v25 = vpop.f32.mrf.mxu1 }
 0x409   : > { %v4326_v10 = vadd.f32 %v7653_v41, %v4305_v8 }
 0x40a   : > { %v4282_v12 = vpop.f32.mrf.mxu1 }
 0x40b   : > { %v4749_v48 = vadd.f32 %v7714_v49, %v4326_v10  ;;  %v4306_v34 = vmul.f32 %v7643_v16, %v4282_v12 }
 0x40c   : > { %v4284_v3 = vpop.f32.mrf.mxu1 }
 0x40d   : > { %v4765_v37 = vmax.f32 %v4749_v48, 0.0  ;;  %v4327_v1 = vadd.f32 %v7653_v41, %v4306_v34 }
 0x40f   : > { %v5418_v13 = vpack.c.bf16 %v4765_v37, %v4765_v37  ;;  %v4750_v20 = vadd.f32 %v7722_v26, %v4327_v1 }
 0x411   : > { %4845 = vst.msk [vmem:[%s7040_s10 + $0x38] sm:$0xf] %vm2542_vm0, %v5418_v13  ;;  %v4766_v58 = vmax.f32 %v4750_v20, 0.0 }
 0x413   : > { %v5419_v16 = vpack.c.bf16 %v4766_v58, %v4766_v58 }
 0x415   : > { %4846 = vst.msk [vmem:[%s7040_s10 + $0x3c] sm:$0xf] %vm2542_vm0, %v5419_v16 }
 0x416   : > { %5705 = shalt.err (!%p5702_p9)
}
 0x417   : > { %s5706_s10 = scalar_lea.hbm %s7772_s13, 1024  ;;  %s5710_s21 = scalar_lea.hbm %s7838_s5, 4096 }
 0x418   : > { %p5707_p10 = scmp.ne.s32.totalorder %s7772_s13, %s5706_s10  ;;  %p5711_p13 = scmp.lt.s32.totalorder %s7772_s13, %s7838_s5 }
 0x419   : > { %p5712_p0 = scmp.lt.s32.totalorder %s5710_s21, %s5706_s10 }
 0x41a   : > { %p5708_p11 = pnand %p5707_p10, %p5883_p3 }
 0x41b   : > { %p5713_p1 = por %p5712_p0, %p5711_p13 }
 0x41c   : > { %p5709_p12 = pneg %p5708_p11 }
 0x41e   : > { %p5714_p2 = pnand %p5713_p1, %p5709_p12 }
 0x420   : > { %5717 = shalt.err (!%p5714_p2)
}
 0x421   : > { %s5801_s12 = smov 4  }
 0x422   : > { %5496 = dma.vmem_to_hbm [thread:$0]  (%p5883_p3), %s7774_s9, 1024, %s7772_s13, %s7780_s30, %s5793_s16, %s5793_s16, %s5801_s12  }
 0x423 PF: > { %p5502_p4 = scmp.ge.s32.totalorder %s5784_s25, 2  ;;  %s4879_s15 = sand.u32 1, %s5756_s18  }
 0x424   : > { %s4880_s14 = scalar_lea.sflag [#allocation4], %s4879_s15 }
 0x425   : > { %p5499_p5 = pnand %p5502_p4, %p5892_p8 }
 0x427   : > { %p5500_p6 = pneg %p5499_p5 }
 0x429   : > { %5751 = dma.done.wait (%p5500_p6), %s4880_s14, 1024  }
 0x42a   : > { %5753 = vsyncadd (%p5500_p6), %s4880_s14, 4294966272  ;;  %s18_s25 = sadd.s32 1, %s5784_s25   ;;  %s7855_s18 = smov %s5760_s19 }
 0x42b   : > { %p15_p7 = scmp.ge.s32.totalorder %s18_s25, 6   ;;  %s7856_s19 = smov %s5764_s20 }
 0x42c   : > { %s7857_s20 = smov %s5901_s11  ;;  %s7858_s21 = smov %s5776_s23 }
 0x42d   : > { %s7859_s22 = smov %s5780_s24  ;;  %s7860_s23 = smov %s7863_s28 }
 0x42e   : > { %s7861_s24 = smov %s7867_s29  ;;  %17 = sbr.rel (!%p15_p7) target bundleno = 5 (0x5), region = 89 }
 0x433   :  { %4885 = vsyncpa [#allocation4], 1 }
 0x434   :  { %4887 = vsyncpa [#allocation4 + $0x1], 1 }

</bundles_post_ra>
